<compile_context>
chip_gen: v7x
topology: tpu7x:2x2x1
jax: 0.10.0
libtpu: 0.0.40
codegen_flags: <defaults>
</compile_context>

<pallas_src>
import jax
import jax.numpy as jnp
from jax.experimental import pallas as pl
from jax.experimental.pallas import tpu as pltpu

HIDDEN = 64       # hidden units of layer1
TILE_R = 256      # sublane rows per grid block (512 KiB f32 block)
TILE_C = 512      # lanes per row (lane-dense batch axis)
ROW_ALIGN = 8     # pad row count to the sublane multiple


def pinn_kernel(x_ref, a_ref, c_ref, lin_ref, o_ref):
    # x_ref/o_ref: (tile_r, 512) f32 VMEM blocks, batch points on lanes/sublanes.
    # a_ref/c_ref: (64,) f32 in SMEM; lin_ref: (2,) f32 in SMEM holding [A, C].
    x = x_ref[...]
    acc0 = jnp.zeros_like(x)
    acc1 = jnp.zeros_like(x)

    # Fully fused hidden layer, statically unrolled, 4 VALU ops per unit:
    #   t = x + c_j ; u = |t| ; acc += a_j * u
    # Two independent accumulators keep the VALU slots fed.
    for j in range(0, HIDDEN, 2):
        acc0 = acc0 + a_ref[j] * jnp.abs(x + c_ref[j])
        acc1 = acc1 + a_ref[j + 1] * jnp.abs(x + c_ref[j + 1])

    o_ref[...] = acc0 + acc1 + (lin_ref[0] * x + lin_ref[1])


def _prepare_params(w1, b1, w2, b2, eps=1e-6):
    """Fold (w1, b1, w2, b2) into the |x + c| form used by the kernel."""
    w1f = w1.reshape(HIDDEN).astype(jnp.float32)
    b1f = b1.reshape(HIDDEN).astype(jnp.float32)
    w2f = w2.reshape(HIDDEN).astype(jnp.float32)
    b2f = b2.reshape(()).astype(jnp.float32)

    active = jnp.abs(w1f) > eps
    safe_w1 = jnp.where(active, w1f, 1.0)

    a = jnp.where(active, 0.5 * w2f * jnp.abs(w1f), 0.0)
    c = jnp.where(active, b1f / safe_w1, 0.0)
    A = 0.5 * jnp.sum(jnp.where(active, w2f * w1f, 0.0))
    C = (b2f
         + 0.5 * jnp.sum(jnp.where(active, w2f * b1f, 0.0))
         + jnp.sum(jnp.where(active, 0.0, w2f * jnp.maximum(b1f, 0.0))))
    lin = jnp.stack([A, C])
    return a, c, lin


def pinn_forward(x, w1, b1, w2, b2):
    """x: (N, 1) f32.  w1/b1: (1, 64), w2: (64, 1), b2: (1, 1).  Returns (N, 1)."""
    N = x.shape[0]
    a, c, lin = _prepare_params(w1, b1, w2, b2)

    # Lane-dense repack of the batch: (N,1) -> (rows, 512) slab, padded only to a
    # 4096-point (8 sublanes x 512 lanes) boundary (not to a full grid block).
    align = ROW_ALIGN * TILE_C
    padded = pl.cdiv(N, align) * align
    xf = jnp.pad(x.reshape(-1).astype(jnp.float32), (0, padded - N))
    rows = padded // TILE_C
    x2 = xf.reshape(rows, TILE_C)

    tile_r = min(TILE_R, rows)            # shrink the block for tiny inputs
    num_blocks = pl.cdiv(rows, tile_r)    # ragged last block is masked by Pallas

    smem_spec = pl.BlockSpec(memory_space=pltpu.MemorySpace.SMEM)

    out2 = pl.pallas_call(
        pinn_kernel,
        out_shape=jax.ShapeDtypeStruct((rows, TILE_C), jnp.float32),
        grid=(num_blocks,),
        in_specs=[
            pl.BlockSpec((tile_r, TILE_C), lambda i: (i, 0)),  # streamed x blocks
            smem_spec,   # a_j  (resident, loaded once)
            smem_spec,   # c_j
            smem_spec,   # [A, C]
        ],
        out_specs=pl.BlockSpec((tile_r, TILE_C), lambda i: (i, 0)),
        compiler_params=pltpu.CompilerParams(
            dimension_semantics=("parallel",),  # megacore-split batch on v7x
        ),
    )(x2, a, c, lin)

    # Drop the zero-padded tail; padded lanes are never returned as valid data.
    return out2.reshape(padded)[:N].reshape(N, 1)


def init_params(key):
    # Deterministic init mimicking nn.Linear's U(-1/sqrt(fan_in), 1/sqrt(fan_in)).
    k1, k2, k3, k4 = jax.random.split(key, 4)
    bound1 = 1.0 / jnp.sqrt(1.0)    # fan_in = 1
    bound2 = 1.0 / jnp.sqrt(64.0)   # fan_in = 64
    w1 = jax.random.uniform(k1, (1, HIDDEN), jnp.float32, -bound1, bound1)
    b1 = jax.random.uniform(k2, (1, HIDDEN), jnp.float32, -bound1, bound1)
    w2 = jax.random.uniform(k3, (HIDDEN, 1), jnp.float32, -bound2, bound2)
    b2 = jax.random.uniform(k4, (1, 1), jnp.float32, -bound2, bound2)
    return w1, b1, w2, b2


if __name__ == "__main__":
    key = jax.random.PRNGKey(0)
    kx, kp = jax.random.split(key)

    # Non-multiple of 4096: exercises the ragged / padded tail path while staying small.
    N = 5000
    x = jax.random.normal(kx, (N, 1), jnp.float32)
    w1, b1, w2, b2 = init_params(kp)

    out = pinn_forward(x, w1, b1, w2, b2)
    jax.block_until_ready(out)

    # Reference check in plain JAX (exact layer form).
    ref = jnp.maximum(x @ w1 + b1, 0.0) @ w2 + b2
    assert out.shape == (N, 1)
    # Tolerance slightly relaxed vs 1e-5: the |x + c_j| regrouping changes f32 rounding.
    assert jnp.allclose(out, ref, atol=1e-4, rtol=1e-5), float(jnp.max(jnp.abs(out - ref)))

    print("KERNEL_OK")
</pallas_src>

<mosaic_0001>
module attributes {stable_mosaic.version = 11 : i64} {
  func.func @pinn_kernel(%arg0: i32, %arg1: memref<16x512xf32, #tpu.memory_space<vmem>>, %arg2: memref<64xf32, #tpu.memory_space<smem>>, %arg3: memref<64xf32, #tpu.memory_space<smem>>, %arg4: memref<2xf32, #tpu.memory_space<smem>>, %arg5: memref<16x512xf32, #tpu.memory_space<vmem>>) attributes {dimension_semantics = [#tpu.dimension_semantics<parallel>], iteration_bounds = array<i64: 1>, scalar_prefetch = 0 : i64, scratch_operands = 0 : i64, tpu.core_type = #tpu.core_type<tc>, window_params = [{transform_indices = @transform_0, window_bounds = array<i64: 16, 512>}, {transform_indices = @transform_1, window_bounds = array<i64: 64>}, {transform_indices = @transform_2, window_bounds = array<i64: 64>}, {transform_indices = @transform_3, window_bounds = array<i64: 2>}, {transform_indices = @transform_4, window_bounds = array<i64: 16, 512>}]} {
    %c0 = arith.constant 0 : index
    %c0_0 = arith.constant 0 : index
    %0 = vector.load %arg1[%c0, %c0_0] : memref<16x512xf32, #tpu.memory_space<vmem>>, vector<16x512xf32>
    %cst = arith.constant 0.000000e+00 : f32
    %1 = vector.broadcast %cst : f32 to vector<16x512xf32>
    %cst_1 = arith.constant 0.000000e+00 : f32
    %2 = vector.broadcast %cst_1 : f32 to vector<16x512xf32>
    %c0_2 = arith.constant 0 : index
    %3 = memref.load %arg2[%c0_2] : memref<64xf32, #tpu.memory_space<smem>>
    %c0_3 = arith.constant 0 : index
    %4 = memref.load %arg3[%c0_3] : memref<64xf32, #tpu.memory_space<smem>>
    %5 = vector.broadcast %4 : f32 to vector<16x512xf32>
    %6 = arith.addf %0, %5 : vector<16x512xf32>
    %7 = math.absf %6 : vector<16x512xf32>
    %8 = vector.broadcast %3 : f32 to vector<16x512xf32>
    %9 = arith.mulf %8, %7 : vector<16x512xf32>
    %10 = arith.addf %1, %9 : vector<16x512xf32>
    %c1 = arith.constant 1 : index
    %11 = memref.load %arg2[%c1] : memref<64xf32, #tpu.memory_space<smem>>
    %c1_4 = arith.constant 1 : index
    %12 = memref.load %arg3[%c1_4] : memref<64xf32, #tpu.memory_space<smem>>
    %13 = vector.broadcast %12 : f32 to vector<16x512xf32>
    %14 = arith.addf %0, %13 : vector<16x512xf32>
    %15 = math.absf %14 : vector<16x512xf32>
    %16 = vector.broadcast %11 : f32 to vector<16x512xf32>
    %17 = arith.mulf %16, %15 : vector<16x512xf32>
    %18 = arith.addf %2, %17 : vector<16x512xf32>
    %c2 = arith.constant 2 : index
    %19 = memref.load %arg2[%c2] : memref<64xf32, #tpu.memory_space<smem>>
    %c2_5 = arith.constant 2 : index
    %20 = memref.load %arg3[%c2_5] : memref<64xf32, #tpu.memory_space<smem>>
    %21 = vector.broadcast %20 : f32 to vector<16x512xf32>
    %22 = arith.addf %0, %21 : vector<16x512xf32>
    %23 = math.absf %22 : vector<16x512xf32>
    %24 = vector.broadcast %19 : f32 to vector<16x512xf32>
    %25 = arith.mulf %24, %23 : vector<16x512xf32>
    %26 = arith.addf %10, %25 : vector<16x512xf32>
    %c3 = arith.constant 3 : index
    %27 = memref.load %arg2[%c3] : memref<64xf32, #tpu.memory_space<smem>>
    %c3_6 = arith.constant 3 : index
    %28 = memref.load %arg3[%c3_6] : memref<64xf32, #tpu.memory_space<smem>>
    %29 = vector.broadcast %28 : f32 to vector<16x512xf32>
    %30 = arith.addf %0, %29 : vector<16x512xf32>
    %31 = math.absf %30 : vector<16x512xf32>
    %32 = vector.broadcast %27 : f32 to vector<16x512xf32>
    %33 = arith.mulf %32, %31 : vector<16x512xf32>
    %34 = arith.addf %18, %33 : vector<16x512xf32>
    %c4 = arith.constant 4 : index
    %35 = memref.load %arg2[%c4] : memref<64xf32, #tpu.memory_space<smem>>
    %c4_7 = arith.constant 4 : index
    %36 = memref.load %arg3[%c4_7] : memref<64xf32, #tpu.memory_space<smem>>
    %37 = vector.broadcast %36 : f32 to vector<16x512xf32>
    %38 = arith.addf %0, %37 : vector<16x512xf32>
    %39 = math.absf %38 : vector<16x512xf32>
    %40 = vector.broadcast %35 : f32 to vector<16x512xf32>
    %41 = arith.mulf %40, %39 : vector<16x512xf32>
    %42 = arith.addf %26, %41 : vector<16x512xf32>
    %c5 = arith.constant 5 : index
    %43 = memref.load %arg2[%c5] : memref<64xf32, #tpu.memory_space<smem>>
    %c5_8 = arith.constant 5 : index
    %44 = memref.load %arg3[%c5_8] : memref<64xf32, #tpu.memory_space<smem>>
    %45 = vector.broadcast %44 : f32 to vector<16x512xf32>
    %46 = arith.addf %0, %45 : vector<16x512xf32>
    %47 = math.absf %46 : vector<16x512xf32>
    %48 = vector.broadcast %43 : f32 to vector<16x512xf32>
    %49 = arith.mulf %48, %47 : vector<16x512xf32>
    %50 = arith.addf %34, %49 : vector<16x512xf32>
    %c6 = arith.constant 6 : index
    %51 = memref.load %arg2[%c6] : memref<64xf32, #tpu.memory_space<smem>>
    %c6_9 = arith.constant 6 : index
    %52 = memref.load %arg3[%c6_9] : memref<64xf32, #tpu.memory_space<smem>>
    %53 = vector.broadcast %52 : f32 to vector<16x512xf32>
    %54 = arith.addf %0, %53 : vector<16x512xf32>
    %55 = math.absf %54 : vector<16x512xf32>
    %56 = vector.broadcast %51 : f32 to vector<16x512xf32>
    %57 = arith.mulf %56, %55 : vector<16x512xf32>
    %58 = arith.addf %42, %57 : vector<16x512xf32>
    %c7 = arith.constant 7 : index
    %59 = memref.load %arg2[%c7] : memref<64xf32, #tpu.memory_space<smem>>
    %c7_10 = arith.constant 7 : index
    %60 = memref.load %arg3[%c7_10] : memref<64xf32, #tpu.memory_space<smem>>
    %61 = vector.broadcast %60 : f32 to vector<16x512xf32>
    %62 = arith.addf %0, %61 : vector<16x512xf32>
    %63 = math.absf %62 : vector<16x512xf32>
    %64 = vector.broadcast %59 : f32 to vector<16x512xf32>
    %65 = arith.mulf %64, %63 : vector<16x512xf32>
    %66 = arith.addf %50, %65 : vector<16x512xf32>
    %c8 = arith.constant 8 : index
    %67 = memref.load %arg2[%c8] : memref<64xf32, #tpu.memory_space<smem>>
    %c8_11 = arith.constant 8 : index
    %68 = memref.load %arg3[%c8_11] : memref<64xf32, #tpu.memory_space<smem>>
    %69 = vector.broadcast %68 : f32 to vector<16x512xf32>
    %70 = arith.addf %0, %69 : vector<16x512xf32>
    %71 = math.absf %70 : vector<16x512xf32>
    %72 = vector.broadcast %67 : f32 to vector<16x512xf32>
    %73 = arith.mulf %72, %71 : vector<16x512xf32>
    %74 = arith.addf %58, %73 : vector<16x512xf32>
    %c9 = arith.constant 9 : index
    %75 = memref.load %arg2[%c9] : memref<64xf32, #tpu.memory_space<smem>>
    %c9_12 = arith.constant 9 : index
    %76 = memref.load %arg3[%c9_12] : memref<64xf32, #tpu.memory_space<smem>>
    %77 = vector.broadcast %76 : f32 to vector<16x512xf32>
    %78 = arith.addf %0, %77 : vector<16x512xf32>
    %79 = math.absf %78 : vector<16x512xf32>
    %80 = vector.broadcast %75 : f32 to vector<16x512xf32>
    %81 = arith.mulf %80, %79 : vector<16x512xf32>
    %82 = arith.addf %66, %81 : vector<16x512xf32>
    %c10 = arith.constant 10 : index
    %83 = memref.load %arg2[%c10] : memref<64xf32, #tpu.memory_space<smem>>
    %c10_13 = arith.constant 10 : index
    %84 = memref.load %arg3[%c10_13] : memref<64xf32, #tpu.memory_space<smem>>
    %85 = vector.broadcast %84 : f32 to vector<16x512xf32>
    %86 = arith.addf %0, %85 : vector<16x512xf32>
    %87 = math.absf %86 : vector<16x512xf32>
    %88 = vector.broadcast %83 : f32 to vector<16x512xf32>
    %89 = arith.mulf %88, %87 : vector<16x512xf32>
    %90 = arith.addf %74, %89 : vector<16x512xf32>
    %c11 = arith.constant 11 : index
    %91 = memref.load %arg2[%c11] : memref<64xf32, #tpu.memory_space<smem>>
    %c11_14 = arith.constant 11 : index
    %92 = memref.load %arg3[%c11_14] : memref<64xf32, #tpu.memory_space<smem>>
    %93 = vector.broadcast %92 : f32 to vector<16x512xf32>
    %94 = arith.addf %0, %93 : vector<16x512xf32>
    %95 = math.absf %94 : vector<16x512xf32>
    %96 = vector.broadcast %91 : f32 to vector<16x512xf32>
    %97 = arith.mulf %96, %95 : vector<16x512xf32>
    %98 = arith.addf %82, %97 : vector<16x512xf32>
    %c12 = arith.constant 12 : index
    %99 = memref.load %arg2[%c12] : memref<64xf32, #tpu.memory_space<smem>>
    %c12_15 = arith.constant 12 : index
    %100 = memref.load %arg3[%c12_15] : memref<64xf32, #tpu.memory_space<smem>>
    %101 = vector.broadcast %100 : f32 to vector<16x512xf32>
    %102 = arith.addf %0, %101 : vector<16x512xf32>
    %103 = math.absf %102 : vector<16x512xf32>
    %104 = vector.broadcast %99 : f32 to vector<16x512xf32>
    %105 = arith.mulf %104, %103 : vector<16x512xf32>
    %106 = arith.addf %90, %105 : vector<16x512xf32>
    %c13 = arith.constant 13 : index
    %107 = memref.load %arg2[%c13] : memref<64xf32, #tpu.memory_space<smem>>
    %c13_16 = arith.constant 13 : index
    %108 = memref.load %arg3[%c13_16] : memref<64xf32, #tpu.memory_space<smem>>
    %109 = vector.broadcast %108 : f32 to vector<16x512xf32>
    %110 = arith.addf %0, %109 : vector<16x512xf32>
    %111 = math.absf %110 : vector<16x512xf32>
    %112 = vector.broadcast %107 : f32 to vector<16x512xf32>
    %113 = arith.mulf %112, %111 : vector<16x512xf32>
    %114 = arith.addf %98, %113 : vector<16x512xf32>
    %c14 = arith.constant 14 : index
    %115 = memref.load %arg2[%c14] : memref<64xf32, #tpu.memory_space<smem>>
    %c14_17 = arith.constant 14 : index
    %116 = memref.load %arg3[%c14_17] : memref<64xf32, #tpu.memory_space<smem>>
    %117 = vector.broadcast %116 : f32 to vector<16x512xf32>
    %118 = arith.addf %0, %117 : vector<16x512xf32>
    %119 = math.absf %118 : vector<16x512xf32>
    %120 = vector.broadcast %115 : f32 to vector<16x512xf32>
    %121 = arith.mulf %120, %119 : vector<16x512xf32>
    %122 = arith.addf %106, %121 : vector<16x512xf32>
    %c15 = arith.constant 15 : index
    %123 = memref.load %arg2[%c15] : memref<64xf32, #tpu.memory_space<smem>>
    %c15_18 = arith.constant 15 : index
    %124 = memref.load %arg3[%c15_18] : memref<64xf32, #tpu.memory_space<smem>>
    %125 = vector.broadcast %124 : f32 to vector<16x512xf32>
    %126 = arith.addf %0, %125 : vector<16x512xf32>
    %127 = math.absf %126 : vector<16x512xf32>
    %128 = vector.broadcast %123 : f32 to vector<16x512xf32>
    %129 = arith.mulf %128, %127 : vector<16x512xf32>
    %130 = arith.addf %114, %129 : vector<16x512xf32>
    %c16 = arith.constant 16 : index
    %131 = memref.load %arg2[%c16] : memref<64xf32, #tpu.memory_space<smem>>
    %c16_19 = arith.constant 16 : index
    %132 = memref.load %arg3[%c16_19] : memref<64xf32, #tpu.memory_space<smem>>
    %133 = vector.broadcast %132 : f32 to vector<16x512xf32>
    %134 = arith.addf %0, %133 : vector<16x512xf32>
    %135 = math.absf %134 : vector<16x512xf32>
    %136 = vector.broadcast %131 : f32 to vector<16x512xf32>
    %137 = arith.mulf %136, %135 : vector<16x512xf32>
    %138 = arith.addf %122, %137 : vector<16x512xf32>
    %c17 = arith.constant 17 : index
    %139 = memref.load %arg2[%c17] : memref<64xf32, #tpu.memory_space<smem>>
    %c17_20 = arith.constant 17 : index
    %140 = memref.load %arg3[%c17_20] : memref<64xf32, #tpu.memory_space<smem>>
    %141 = vector.broadcast %140 : f32 to vector<16x512xf32>
    %142 = arith.addf %0, %141 : vector<16x512xf32>
    %143 = math.absf %142 : vector<16x512xf32>
    %144 = vector.broadcast %139 : f32 to vector<16x512xf32>
    %145 = arith.mulf %144, %143 : vector<16x512xf32>
    %146 = arith.addf %130, %145 : vector<16x512xf32>
    %c18 = arith.constant 18 : index
    %147 = memref.load %arg2[%c18] : memref<64xf32, #tpu.memory_space<smem>>
    %c18_21 = arith.constant 18 : index
    %148 = memref.load %arg3[%c18_21] : memref<64xf32, #tpu.memory_space<smem>>
    %149 = vector.broadcast %148 : f32 to vector<16x512xf32>
    %150 = arith.addf %0, %149 : vector<16x512xf32>
    %151 = math.absf %150 : vector<16x512xf32>
    %152 = vector.broadcast %147 : f32 to vector<16x512xf32>
    %153 = arith.mulf %152, %151 : vector<16x512xf32>
    %154 = arith.addf %138, %153 : vector<16x512xf32>
    %c19 = arith.constant 19 : index
    %155 = memref.load %arg2[%c19] : memref<64xf32, #tpu.memory_space<smem>>
    %c19_22 = arith.constant 19 : index
    %156 = memref.load %arg3[%c19_22] : memref<64xf32, #tpu.memory_space<smem>>
    %157 = vector.broadcast %156 : f32 to vector<16x512xf32>
    %158 = arith.addf %0, %157 : vector<16x512xf32>
    %159 = math.absf %158 : vector<16x512xf32>
    %160 = vector.broadcast %155 : f32 to vector<16x512xf32>
    %161 = arith.mulf %160, %159 : vector<16x512xf32>
    %162 = arith.addf %146, %161 : vector<16x512xf32>
    %c20 = arith.constant 20 : index
    %163 = memref.load %arg2[%c20] : memref<64xf32, #tpu.memory_space<smem>>
    %c20_23 = arith.constant 20 : index
    %164 = memref.load %arg3[%c20_23] : memref<64xf32, #tpu.memory_space<smem>>
    %165 = vector.broadcast %164 : f32 to vector<16x512xf32>
    %166 = arith.addf %0, %165 : vector<16x512xf32>
    %167 = math.absf %166 : vector<16x512xf32>
    %168 = vector.broadcast %163 : f32 to vector<16x512xf32>
    %169 = arith.mulf %168, %167 : vector<16x512xf32>
    %170 = arith.addf %154, %169 : vector<16x512xf32>
    %c21 = arith.constant 21 : index
    %171 = memref.load %arg2[%c21] : memref<64xf32, #tpu.memory_space<smem>>
    %c21_24 = arith.constant 21 : index
    %172 = memref.load %arg3[%c21_24] : memref<64xf32, #tpu.memory_space<smem>>
    %173 = vector.broadcast %172 : f32 to vector<16x512xf32>
    %174 = arith.addf %0, %173 : vector<16x512xf32>
    %175 = math.absf %174 : vector<16x512xf32>
    %176 = vector.broadcast %171 : f32 to vector<16x512xf32>
    %177 = arith.mulf %176, %175 : vector<16x512xf32>
    %178 = arith.addf %162, %177 : vector<16x512xf32>
    %c22 = arith.constant 22 : index
    %179 = memref.load %arg2[%c22] : memref<64xf32, #tpu.memory_space<smem>>
    %c22_25 = arith.constant 22 : index
    %180 = memref.load %arg3[%c22_25] : memref<64xf32, #tpu.memory_space<smem>>
    %181 = vector.broadcast %180 : f32 to vector<16x512xf32>
    %182 = arith.addf %0, %181 : vector<16x512xf32>
    %183 = math.absf %182 : vector<16x512xf32>
    %184 = vector.broadcast %179 : f32 to vector<16x512xf32>
    %185 = arith.mulf %184, %183 : vector<16x512xf32>
    %186 = arith.addf %170, %185 : vector<16x512xf32>
    %c23 = arith.constant 23 : index
    %187 = memref.load %arg2[%c23] : memref<64xf32, #tpu.memory_space<smem>>
    %c23_26 = arith.constant 23 : index
    %188 = memref.load %arg3[%c23_26] : memref<64xf32, #tpu.memory_space<smem>>
    %189 = vector.broadcast %188 : f32 to vector<16x512xf32>
    %190 = arith.addf %0, %189 : vector<16x512xf32>
    %191 = math.absf %190 : vector<16x512xf32>
    %192 = vector.broadcast %187 : f32 to vector<16x512xf32>
    %193 = arith.mulf %192, %191 : vector<16x512xf32>
    %194 = arith.addf %178, %193 : vector<16x512xf32>
    %c24 = arith.constant 24 : index
    %195 = memref.load %arg2[%c24] : memref<64xf32, #tpu.memory_space<smem>>
    %c24_27 = arith.constant 24 : index
    %196 = memref.load %arg3[%c24_27] : memref<64xf32, #tpu.memory_space<smem>>
    %197 = vector.broadcast %196 : f32 to vector<16x512xf32>
    %198 = arith.addf %0, %197 : vector<16x512xf32>
    %199 = math.absf %198 : vector<16x512xf32>
    %200 = vector.broadcast %195 : f32 to vector<16x512xf32>
    %201 = arith.mulf %200, %199 : vector<16x512xf32>
    %202 = arith.addf %186, %201 : vector<16x512xf32>
    %c25 = arith.constant 25 : index
    %203 = memref.load %arg2[%c25] : memref<64xf32, #tpu.memory_space<smem>>
    %c25_28 = arith.constant 25 : index
    %204 = memref.load %arg3[%c25_28] : memref<64xf32, #tpu.memory_space<smem>>
    %205 = vector.broadcast %204 : f32 to vector<16x512xf32>
    %206 = arith.addf %0, %205 : vector<16x512xf32>
    %207 = math.absf %206 : vector<16x512xf32>
    %208 = vector.broadcast %203 : f32 to vector<16x512xf32>
    %209 = arith.mulf %208, %207 : vector<16x512xf32>
    %210 = arith.addf %194, %209 : vector<16x512xf32>
    %c26 = arith.constant 26 : index
    %211 = memref.load %arg2[%c26] : memref<64xf32, #tpu.memory_space<smem>>
    %c26_29 = arith.constant 26 : index
    %212 = memref.load %arg3[%c26_29] : memref<64xf32, #tpu.memory_space<smem>>
    %213 = vector.broadcast %212 : f32 to vector<16x512xf32>
    %214 = arith.addf %0, %213 : vector<16x512xf32>
    %215 = math.absf %214 : vector<16x512xf32>
    %216 = vector.broadcast %211 : f32 to vector<16x512xf32>
    %217 = arith.mulf %216, %215 : vector<16x512xf32>
    %218 = arith.addf %202, %217 : vector<16x512xf32>
    %c27 = arith.constant 27 : index
    %219 = memref.load %arg2[%c27] : memref<64xf32, #tpu.memory_space<smem>>
    %c27_30 = arith.constant 27 : index
    %220 = memref.load %arg3[%c27_30] : memref<64xf32, #tpu.memory_space<smem>>
    %221 = vector.broadcast %220 : f32 to vector<16x512xf32>
    %222 = arith.addf %0, %221 : vector<16x512xf32>
    %223 = math.absf %222 : vector<16x512xf32>
    %224 = vector.broadcast %219 : f32 to vector<16x512xf32>
    %225 = arith.mulf %224, %223 : vector<16x512xf32>
    %226 = arith.addf %210, %225 : vector<16x512xf32>
    %c28 = arith.constant 28 : index
    %227 = memref.load %arg2[%c28] : memref<64xf32, #tpu.memory_space<smem>>
    %c28_31 = arith.constant 28 : index
    %228 = memref.load %arg3[%c28_31] : memref<64xf32, #tpu.memory_space<smem>>
    %229 = vector.broadcast %228 : f32 to vector<16x512xf32>
    %230 = arith.addf %0, %229 : vector<16x512xf32>
    %231 = math.absf %230 : vector<16x512xf32>
    %232 = vector.broadcast %227 : f32 to vector<16x512xf32>
    %233 = arith.mulf %232, %231 : vector<16x512xf32>
    %234 = arith.addf %218, %233 : vector<16x512xf32>
    %c29 = arith.constant 29 : index
    %235 = memref.load %arg2[%c29] : memref<64xf32, #tpu.memory_space<smem>>
    %c29_32 = arith.constant 29 : index
    %236 = memref.load %arg3[%c29_32] : memref<64xf32, #tpu.memory_space<smem>>
    %237 = vector.broadcast %236 : f32 to vector<16x512xf32>
    %238 = arith.addf %0, %237 : vector<16x512xf32>
    %239 = math.absf %238 : vector<16x512xf32>
    %240 = vector.broadcast %235 : f32 to vector<16x512xf32>
    %241 = arith.mulf %240, %239 : vector<16x512xf32>
    %242 = arith.addf %226, %241 : vector<16x512xf32>
    %c30 = arith.constant 30 : index
    %243 = memref.load %arg2[%c30] : memref<64xf32, #tpu.memory_space<smem>>
    %c30_33 = arith.constant 30 : index
    %244 = memref.load %arg3[%c30_33] : memref<64xf32, #tpu.memory_space<smem>>
    %245 = vector.broadcast %244 : f32 to vector<16x512xf32>
    %246 = arith.addf %0, %245 : vector<16x512xf32>
    %247 = math.absf %246 : vector<16x512xf32>
    %248 = vector.broadcast %243 : f32 to vector<16x512xf32>
    %249 = arith.mulf %248, %247 : vector<16x512xf32>
    %250 = arith.addf %234, %249 : vector<16x512xf32>
    %c31 = arith.constant 31 : index
    %251 = memref.load %arg2[%c31] : memref<64xf32, #tpu.memory_space<smem>>
    %c31_34 = arith.constant 31 : index
    %252 = memref.load %arg3[%c31_34] : memref<64xf32, #tpu.memory_space<smem>>
    %253 = vector.broadcast %252 : f32 to vector<16x512xf32>
    %254 = arith.addf %0, %253 : vector<16x512xf32>
    %255 = math.absf %254 : vector<16x512xf32>
    %256 = vector.broadcast %251 : f32 to vector<16x512xf32>
    %257 = arith.mulf %256, %255 : vector<16x512xf32>
    %258 = arith.addf %242, %257 : vector<16x512xf32>
    %c32 = arith.constant 32 : index
    %259 = memref.load %arg2[%c32] : memref<64xf32, #tpu.memory_space<smem>>
    %c32_35 = arith.constant 32 : index
    %260 = memref.load %arg3[%c32_35] : memref<64xf32, #tpu.memory_space<smem>>
    %261 = vector.broadcast %260 : f32 to vector<16x512xf32>
    %262 = arith.addf %0, %261 : vector<16x512xf32>
    %263 = math.absf %262 : vector<16x512xf32>
    %264 = vector.broadcast %259 : f32 to vector<16x512xf32>
    %265 = arith.mulf %264, %263 : vector<16x512xf32>
    %266 = arith.addf %250, %265 : vector<16x512xf32>
    %c33 = arith.constant 33 : index
    %267 = memref.load %arg2[%c33] : memref<64xf32, #tpu.memory_space<smem>>
    %c33_36 = arith.constant 33 : index
    %268 = memref.load %arg3[%c33_36] : memref<64xf32, #tpu.memory_space<smem>>
    %269 = vector.broadcast %268 : f32 to vector<16x512xf32>
    %270 = arith.addf %0, %269 : vector<16x512xf32>
    %271 = math.absf %270 : vector<16x512xf32>
    %272 = vector.broadcast %267 : f32 to vector<16x512xf32>
    %273 = arith.mulf %272, %271 : vector<16x512xf32>
    %274 = arith.addf %258, %273 : vector<16x512xf32>
    %c34 = arith.constant 34 : index
    %275 = memref.load %arg2[%c34] : memref<64xf32, #tpu.memory_space<smem>>
    %c34_37 = arith.constant 34 : index
    %276 = memref.load %arg3[%c34_37] : memref<64xf32, #tpu.memory_space<smem>>
    %277 = vector.broadcast %276 : f32 to vector<16x512xf32>
    %278 = arith.addf %0, %277 : vector<16x512xf32>
    %279 = math.absf %278 : vector<16x512xf32>
    %280 = vector.broadcast %275 : f32 to vector<16x512xf32>
    %281 = arith.mulf %280, %279 : vector<16x512xf32>
    %282 = arith.addf %266, %281 : vector<16x512xf32>
    %c35 = arith.constant 35 : index
    %283 = memref.load %arg2[%c35] : memref<64xf32, #tpu.memory_space<smem>>
    %c35_38 = arith.constant 35 : index
    %284 = memref.load %arg3[%c35_38] : memref<64xf32, #tpu.memory_space<smem>>
    %285 = vector.broadcast %284 : f32 to vector<16x512xf32>
    %286 = arith.addf %0, %285 : vector<16x512xf32>
    %287 = math.absf %286 : vector<16x512xf32>
    %288 = vector.broadcast %283 : f32 to vector<16x512xf32>
    %289 = arith.mulf %288, %287 : vector<16x512xf32>
    %290 = arith.addf %274, %289 : vector<16x512xf32>
    %c36 = arith.constant 36 : index
    %291 = memref.load %arg2[%c36] : memref<64xf32, #tpu.memory_space<smem>>
    %c36_39 = arith.constant 36 : index
    %292 = memref.load %arg3[%c36_39] : memref<64xf32, #tpu.memory_space<smem>>
    %293 = vector.broadcast %292 : f32 to vector<16x512xf32>
    %294 = arith.addf %0, %293 : vector<16x512xf32>
    %295 = math.absf %294 : vector<16x512xf32>
    %296 = vector.broadcast %291 : f32 to vector<16x512xf32>
    %297 = arith.mulf %296, %295 : vector<16x512xf32>
    %298 = arith.addf %282, %297 : vector<16x512xf32>
    %c37 = arith.constant 37 : index
    %299 = memref.load %arg2[%c37] : memref<64xf32, #tpu.memory_space<smem>>
    %c37_40 = arith.constant 37 : index
    %300 = memref.load %arg3[%c37_40] : memref<64xf32, #tpu.memory_space<smem>>
    %301 = vector.broadcast %300 : f32 to vector<16x512xf32>
    %302 = arith.addf %0, %301 : vector<16x512xf32>
    %303 = math.absf %302 : vector<16x512xf32>
    %304 = vector.broadcast %299 : f32 to vector<16x512xf32>
    %305 = arith.mulf %304, %303 : vector<16x512xf32>
    %306 = arith.addf %290, %305 : vector<16x512xf32>
    %c38 = arith.constant 38 : index
    %307 = memref.load %arg2[%c38] : memref<64xf32, #tpu.memory_space<smem>>
    %c38_41 = arith.constant 38 : index
    %308 = memref.load %arg3[%c38_41] : memref<64xf32, #tpu.memory_space<smem>>
    %309 = vector.broadcast %308 : f32 to vector<16x512xf32>
    %310 = arith.addf %0, %309 : vector<16x512xf32>
    %311 = math.absf %310 : vector<16x512xf32>
    %312 = vector.broadcast %307 : f32 to vector<16x512xf32>
    %313 = arith.mulf %312, %311 : vector<16x512xf32>
    %314 = arith.addf %298, %313 : vector<16x512xf32>
    %c39 = arith.constant 39 : index
    %315 = memref.load %arg2[%c39] : memref<64xf32, #tpu.memory_space<smem>>
    %c39_42 = arith.constant 39 : index
    %316 = memref.load %arg3[%c39_42] : memref<64xf32, #tpu.memory_space<smem>>
    %317 = vector.broadcast %316 : f32 to vector<16x512xf32>
    %318 = arith.addf %0, %317 : vector<16x512xf32>
    %319 = math.absf %318 : vector<16x512xf32>
    %320 = vector.broadcast %315 : f32 to vector<16x512xf32>
    %321 = arith.mulf %320, %319 : vector<16x512xf32>
    %322 = arith.addf %306, %321 : vector<16x512xf32>
    %c40 = arith.constant 40 : index
    %323 = memref.load %arg2[%c40] : memref<64xf32, #tpu.memory_space<smem>>
    %c40_43 = arith.constant 40 : index
    %324 = memref.load %arg3[%c40_43] : memref<64xf32, #tpu.memory_space<smem>>
    %325 = vector.broadcast %324 : f32 to vector<16x512xf32>
    %326 = arith.addf %0, %325 : vector<16x512xf32>
    %327 = math.absf %326 : vector<16x512xf32>
    %328 = vector.broadcast %323 : f32 to vector<16x512xf32>
    %329 = arith.mulf %328, %327 : vector<16x512xf32>
    %330 = arith.addf %314, %329 : vector<16x512xf32>
    %c41 = arith.constant 41 : index
    %331 = memref.load %arg2[%c41] : memref<64xf32, #tpu.memory_space<smem>>
    %c41_44 = arith.constant 41 : index
    %332 = memref.load %arg3[%c41_44] : memref<64xf32, #tpu.memory_space<smem>>
    %333 = vector.broadcast %332 : f32 to vector<16x512xf32>
    %334 = arith.addf %0, %333 : vector<16x512xf32>
    %335 = math.absf %334 : vector<16x512xf32>
    %336 = vector.broadcast %331 : f32 to vector<16x512xf32>
    %337 = arith.mulf %336, %335 : vector<16x512xf32>
    %338 = arith.addf %322, %337 : vector<16x512xf32>
    %c42 = arith.constant 42 : index
    %339 = memref.load %arg2[%c42] : memref<64xf32, #tpu.memory_space<smem>>
    %c42_45 = arith.constant 42 : index
    %340 = memref.load %arg3[%c42_45] : memref<64xf32, #tpu.memory_space<smem>>
    %341 = vector.broadcast %340 : f32 to vector<16x512xf32>
    %342 = arith.addf %0, %341 : vector<16x512xf32>
    %343 = math.absf %342 : vector<16x512xf32>
    %344 = vector.broadcast %339 : f32 to vector<16x512xf32>
    %345 = arith.mulf %344, %343 : vector<16x512xf32>
    %346 = arith.addf %330, %345 : vector<16x512xf32>
    %c43 = arith.constant 43 : index
    %347 = memref.load %arg2[%c43] : memref<64xf32, #tpu.memory_space<smem>>
    %c43_46 = arith.constant 43 : index
    %348 = memref.load %arg3[%c43_46] : memref<64xf32, #tpu.memory_space<smem>>
    %349 = vector.broadcast %348 : f32 to vector<16x512xf32>
    %350 = arith.addf %0, %349 : vector<16x512xf32>
    %351 = math.absf %350 : vector<16x512xf32>
    %352 = vector.broadcast %347 : f32 to vector<16x512xf32>
    %353 = arith.mulf %352, %351 : vector<16x512xf32>
    %354 = arith.addf %338, %353 : vector<16x512xf32>
    %c44 = arith.constant 44 : index
    %355 = memref.load %arg2[%c44] : memref<64xf32, #tpu.memory_space<smem>>
    %c44_47 = arith.constant 44 : index
    %356 = memref.load %arg3[%c44_47] : memref<64xf32, #tpu.memory_space<smem>>
    %357 = vector.broadcast %356 : f32 to vector<16x512xf32>
    %358 = arith.addf %0, %357 : vector<16x512xf32>
    %359 = math.absf %358 : vector<16x512xf32>
    %360 = vector.broadcast %355 : f32 to vector<16x512xf32>
    %361 = arith.mulf %360, %359 : vector<16x512xf32>
    %362 = arith.addf %346, %361 : vector<16x512xf32>
    %c45 = arith.constant 45 : index
    %363 = memref.load %arg2[%c45] : memref<64xf32, #tpu.memory_space<smem>>
    %c45_48 = arith.constant 45 : index
    %364 = memref.load %arg3[%c45_48] : memref<64xf32, #tpu.memory_space<smem>>
    %365 = vector.broadcast %364 : f32 to vector<16x512xf32>
    %366 = arith.addf %0, %365 : vector<16x512xf32>
    %367 = math.absf %366 : vector<16x512xf32>
    %368 = vector.broadcast %363 : f32 to vector<16x512xf32>
    %369 = arith.mulf %368, %367 : vector<16x512xf32>
    %370 = arith.addf %354, %369 : vector<16x512xf32>
    %c46 = arith.constant 46 : index
    %371 = memref.load %arg2[%c46] : memref<64xf32, #tpu.memory_space<smem>>
    %c46_49 = arith.constant 46 : index
    %372 = memref.load %arg3[%c46_49] : memref<64xf32, #tpu.memory_space<smem>>
    %373 = vector.broadcast %372 : f32 to vector<16x512xf32>
    %374 = arith.addf %0, %373 : vector<16x512xf32>
    %375 = math.absf %374 : vector<16x512xf32>
    %376 = vector.broadcast %371 : f32 to vector<16x512xf32>
    %377 = arith.mulf %376, %375 : vector<16x512xf32>
    %378 = arith.addf %362, %377 : vector<16x512xf32>
    %c47 = arith.constant 47 : index
    %379 = memref.load %arg2[%c47] : memref<64xf32, #tpu.memory_space<smem>>
    %c47_50 = arith.constant 47 : index
    %380 = memref.load %arg3[%c47_50] : memref<64xf32, #tpu.memory_space<smem>>
    %381 = vector.broadcast %380 : f32 to vector<16x512xf32>
    %382 = arith.addf %0, %381 : vector<16x512xf32>
    %383 = math.absf %382 : vector<16x512xf32>
    %384 = vector.broadcast %379 : f32 to vector<16x512xf32>
    %385 = arith.mulf %384, %383 : vector<16x512xf32>
    %386 = arith.addf %370, %385 : vector<16x512xf32>
    %c48 = arith.constant 48 : index
    %387 = memref.load %arg2[%c48] : memref<64xf32, #tpu.memory_space<smem>>
    %c48_51 = arith.constant 48 : index
    %388 = memref.load %arg3[%c48_51] : memref<64xf32, #tpu.memory_space<smem>>
    %389 = vector.broadcast %388 : f32 to vector<16x512xf32>
    %390 = arith.addf %0, %389 : vector<16x512xf32>
    %391 = math.absf %390 : vector<16x512xf32>
    %392 = vector.broadcast %387 : f32 to vector<16x512xf32>
    %393 = arith.mulf %392, %391 : vector<16x512xf32>
    %394 = arith.addf %378, %393 : vector<16x512xf32>
    %c49 = arith.constant 49 : index
    %395 = memref.load %arg2[%c49] : memref<64xf32, #tpu.memory_space<smem>>
    %c49_52 = arith.constant 49 : index
    %396 = memref.load %arg3[%c49_52] : memref<64xf32, #tpu.memory_space<smem>>
    %397 = vector.broadcast %396 : f32 to vector<16x512xf32>
    %398 = arith.addf %0, %397 : vector<16x512xf32>
    %399 = math.absf %398 : vector<16x512xf32>
    %400 = vector.broadcast %395 : f32 to vector<16x512xf32>
    %401 = arith.mulf %400, %399 : vector<16x512xf32>
    %402 = arith.addf %386, %401 : vector<16x512xf32>
    %c50 = arith.constant 50 : index
    %403 = memref.load %arg2[%c50] : memref<64xf32, #tpu.memory_space<smem>>
    %c50_53 = arith.constant 50 : index
    %404 = memref.load %arg3[%c50_53] : memref<64xf32, #tpu.memory_space<smem>>
    %405 = vector.broadcast %404 : f32 to vector<16x512xf32>
    %406 = arith.addf %0, %405 : vector<16x512xf32>
    %407 = math.absf %406 : vector<16x512xf32>
    %408 = vector.broadcast %403 : f32 to vector<16x512xf32>
    %409 = arith.mulf %408, %407 : vector<16x512xf32>
    %410 = arith.addf %394, %409 : vector<16x512xf32>
    %c51 = arith.constant 51 : index
    %411 = memref.load %arg2[%c51] : memref<64xf32, #tpu.memory_space<smem>>
    %c51_54 = arith.constant 51 : index
    %412 = memref.load %arg3[%c51_54] : memref<64xf32, #tpu.memory_space<smem>>
    %413 = vector.broadcast %412 : f32 to vector<16x512xf32>
    %414 = arith.addf %0, %413 : vector<16x512xf32>
    %415 = math.absf %414 : vector<16x512xf32>
    %416 = vector.broadcast %411 : f32 to vector<16x512xf32>
    %417 = arith.mulf %416, %415 : vector<16x512xf32>
    %418 = arith.addf %402, %417 : vector<16x512xf32>
    %c52 = arith.constant 52 : index
    %419 = memref.load %arg2[%c52] : memref<64xf32, #tpu.memory_space<smem>>
    %c52_55 = arith.constant 52 : index
    %420 = memref.load %arg3[%c52_55] : memref<64xf32, #tpu.memory_space<smem>>
    %421 = vector.broadcast %420 : f32 to vector<16x512xf32>
    %422 = arith.addf %0, %421 : vector<16x512xf32>
    %423 = math.absf %422 : vector<16x512xf32>
    %424 = vector.broadcast %419 : f32 to vector<16x512xf32>
    %425 = arith.mulf %424, %423 : vector<16x512xf32>
    %426 = arith.addf %410, %425 : vector<16x512xf32>
    %c53 = arith.constant 53 : index
    %427 = memref.load %arg2[%c53] : memref<64xf32, #tpu.memory_space<smem>>
    %c53_56 = arith.constant 53 : index
    %428 = memref.load %arg3[%c53_56] : memref<64xf32, #tpu.memory_space<smem>>
    %429 = vector.broadcast %428 : f32 to vector<16x512xf32>
    %430 = arith.addf %0, %429 : vector<16x512xf32>
    %431 = math.absf %430 : vector<16x512xf32>
    %432 = vector.broadcast %427 : f32 to vector<16x512xf32>
    %433 = arith.mulf %432, %431 : vector<16x512xf32>
    %434 = arith.addf %418, %433 : vector<16x512xf32>
    %c54 = arith.constant 54 : index
    %435 = memref.load %arg2[%c54] : memref<64xf32, #tpu.memory_space<smem>>
    %c54_57 = arith.constant 54 : index
    %436 = memref.load %arg3[%c54_57] : memref<64xf32, #tpu.memory_space<smem>>
    %437 = vector.broadcast %436 : f32 to vector<16x512xf32>
    %438 = arith.addf %0, %437 : vector<16x512xf32>
    %439 = math.absf %438 : vector<16x512xf32>
    %440 = vector.broadcast %435 : f32 to vector<16x512xf32>
    %441 = arith.mulf %440, %439 : vector<16x512xf32>
    %442 = arith.addf %426, %441 : vector<16x512xf32>
    %c55 = arith.constant 55 : index
    %443 = memref.load %arg2[%c55] : memref<64xf32, #tpu.memory_space<smem>>
    %c55_58 = arith.constant 55 : index
    %444 = memref.load %arg3[%c55_58] : memref<64xf32, #tpu.memory_space<smem>>
    %445 = vector.broadcast %444 : f32 to vector<16x512xf32>
    %446 = arith.addf %0, %445 : vector<16x512xf32>
    %447 = math.absf %446 : vector<16x512xf32>
    %448 = vector.broadcast %443 : f32 to vector<16x512xf32>
    %449 = arith.mulf %448, %447 : vector<16x512xf32>
    %450 = arith.addf %434, %449 : vector<16x512xf32>
    %c56 = arith.constant 56 : index
    %451 = memref.load %arg2[%c56] : memref<64xf32, #tpu.memory_space<smem>>
    %c56_59 = arith.constant 56 : index
    %452 = memref.load %arg3[%c56_59] : memref<64xf32, #tpu.memory_space<smem>>
    %453 = vector.broadcast %452 : f32 to vector<16x512xf32>
    %454 = arith.addf %0, %453 : vector<16x512xf32>
    %455 = math.absf %454 : vector<16x512xf32>
    %456 = vector.broadcast %451 : f32 to vector<16x512xf32>
    %457 = arith.mulf %456, %455 : vector<16x512xf32>
    %458 = arith.addf %442, %457 : vector<16x512xf32>
    %c57 = arith.constant 57 : index
    %459 = memref.load %arg2[%c57] : memref<64xf32, #tpu.memory_space<smem>>
    %c57_60 = arith.constant 57 : index
    %460 = memref.load %arg3[%c57_60] : memref<64xf32, #tpu.memory_space<smem>>
    %461 = vector.broadcast %460 : f32 to vector<16x512xf32>
    %462 = arith.addf %0, %461 : vector<16x512xf32>
    %463 = math.absf %462 : vector<16x512xf32>
    %464 = vector.broadcast %459 : f32 to vector<16x512xf32>
    %465 = arith.mulf %464, %463 : vector<16x512xf32>
    %466 = arith.addf %450, %465 : vector<16x512xf32>
    %c58 = arith.constant 58 : index
    %467 = memref.load %arg2[%c58] : memref<64xf32, #tpu.memory_space<smem>>
    %c58_61 = arith.constant 58 : index
    %468 = memref.load %arg3[%c58_61] : memref<64xf32, #tpu.memory_space<smem>>
    %469 = vector.broadcast %468 : f32 to vector<16x512xf32>
    %470 = arith.addf %0, %469 : vector<16x512xf32>
    %471 = math.absf %470 : vector<16x512xf32>
    %472 = vector.broadcast %467 : f32 to vector<16x512xf32>
    %473 = arith.mulf %472, %471 : vector<16x512xf32>
    %474 = arith.addf %458, %473 : vector<16x512xf32>
    %c59 = arith.constant 59 : index
    %475 = memref.load %arg2[%c59] : memref<64xf32, #tpu.memory_space<smem>>
    %c59_62 = arith.constant 59 : index
    %476 = memref.load %arg3[%c59_62] : memref<64xf32, #tpu.memory_space<smem>>
    %477 = vector.broadcast %476 : f32 to vector<16x512xf32>
    %478 = arith.addf %0, %477 : vector<16x512xf32>
    %479 = math.absf %478 : vector<16x512xf32>
    %480 = vector.broadcast %475 : f32 to vector<16x512xf32>
    %481 = arith.mulf %480, %479 : vector<16x512xf32>
    %482 = arith.addf %466, %481 : vector<16x512xf32>
    %c60 = arith.constant 60 : index
    %483 = memref.load %arg2[%c60] : memref<64xf32, #tpu.memory_space<smem>>
    %c60_63 = arith.constant 60 : index
    %484 = memref.load %arg3[%c60_63] : memref<64xf32, #tpu.memory_space<smem>>
    %485 = vector.broadcast %484 : f32 to vector<16x512xf32>
    %486 = arith.addf %0, %485 : vector<16x512xf32>
    %487 = math.absf %486 : vector<16x512xf32>
    %488 = vector.broadcast %483 : f32 to vector<16x512xf32>
    %489 = arith.mulf %488, %487 : vector<16x512xf32>
    %490 = arith.addf %474, %489 : vector<16x512xf32>
    %c61 = arith.constant 61 : index
    %491 = memref.load %arg2[%c61] : memref<64xf32, #tpu.memory_space<smem>>
    %c61_64 = arith.constant 61 : index
    %492 = memref.load %arg3[%c61_64] : memref<64xf32, #tpu.memory_space<smem>>
    %493 = vector.broadcast %492 : f32 to vector<16x512xf32>
    %494 = arith.addf %0, %493 : vector<16x512xf32>
    %495 = math.absf %494 : vector<16x512xf32>
    %496 = vector.broadcast %491 : f32 to vector<16x512xf32>
    %497 = arith.mulf %496, %495 : vector<16x512xf32>
    %498 = arith.addf %482, %497 : vector<16x512xf32>
    %c62 = arith.constant 62 : index
    %499 = memref.load %arg2[%c62] : memref<64xf32, #tpu.memory_space<smem>>
    %c62_65 = arith.constant 62 : index
    %500 = memref.load %arg3[%c62_65] : memref<64xf32, #tpu.memory_space<smem>>
    %501 = vector.broadcast %500 : f32 to vector<16x512xf32>
    %502 = arith.addf %0, %501 : vector<16x512xf32>
    %503 = math.absf %502 : vector<16x512xf32>
    %504 = vector.broadcast %499 : f32 to vector<16x512xf32>
    %505 = arith.mulf %504, %503 : vector<16x512xf32>
    %506 = arith.addf %490, %505 : vector<16x512xf32>
    %c63 = arith.constant 63 : index
    %507 = memref.load %arg2[%c63] : memref<64xf32, #tpu.memory_space<smem>>
    %c63_66 = arith.constant 63 : index
    %508 = memref.load %arg3[%c63_66] : memref<64xf32, #tpu.memory_space<smem>>
    %509 = vector.broadcast %508 : f32 to vector<16x512xf32>
    %510 = arith.addf %0, %509 : vector<16x512xf32>
    %511 = math.absf %510 : vector<16x512xf32>
    %512 = vector.broadcast %507 : f32 to vector<16x512xf32>
    %513 = arith.mulf %512, %511 : vector<16x512xf32>
    %514 = arith.addf %498, %513 : vector<16x512xf32>
    %515 = arith.addf %506, %514 : vector<16x512xf32>
    %c0_67 = arith.constant 0 : index
    %516 = memref.load %arg4[%c0_67] : memref<2xf32, #tpu.memory_space<smem>>
    %517 = vector.broadcast %516 : f32 to vector<16x512xf32>
    %518 = arith.mulf %517, %0 : vector<16x512xf32>
    %c1_68 = arith.constant 1 : index
    %519 = memref.load %arg4[%c1_68] : memref<2xf32, #tpu.memory_space<smem>>
    %520 = vector.broadcast %519 : f32 to vector<16x512xf32>
    %521 = arith.addf %518, %520 : vector<16x512xf32>
    %522 = arith.addf %515, %521 : vector<16x512xf32>
    %c0_69 = arith.constant 0 : index
    %c0_70 = arith.constant 0 : index
    %523 = vector.load %arg5[%c0_69, %c0_70] : memref<16x512xf32, #tpu.memory_space<vmem>>, vector<16x512xf32>
    tpu.vector_store %arg5[%c0_69, %c0_70], %522 {strides = array<i32>} : memref<16x512xf32, #tpu.memory_space<vmem>>, vector<16x512xf32>,
    return
  }
  func.func @transform_0(%arg0: i32) -> (i32, i32) {
    %c0_i32 = arith.constant 0 : i32
    %c0_i32_0 = arith.constant 0 : i32
    return %arg0, %c0_i32 : i32, i32
  }
  func.func @transform_1(%arg0: i32) -> i32 {
    %c0_i32 = arith.constant 0 : i32
    %c0_i32_0 = arith.constant 0 : i32
    return %c0_i32 : i32
  }
  func.func @transform_2(%arg0: i32) -> i32 {
    %c0_i32 = arith.constant 0 : i32
    %c0_i32_0 = arith.constant 0 : i32
    return %c0_i32 : i32
  }
  func.func @transform_3(%arg0: i32) -> i32 {
    %c0_i32 = arith.constant 0 : i32
    %c0_i32_0 = arith.constant 0 : i32
    return %c0_i32 : i32
  }
  func.func @transform_4(%arg0: i32) -> (i32, i32) {
    %c0_i32 = arith.constant 0 : i32
    %c0_i32_0 = arith.constant 0 : i32
    return %arg0, %c0_i32 : i32, i32
  }
}

</mosaic_0001>

<bundles_post_ra>
// kernel: tpu_custom_call.1
= control target key start
LH: loop header
LB: loop body
LE: loop exit
PB: predicated region body
PF: predicated region fallthrough
CT: control target
= control target key end

     0   :  { %9 = vsyncpa [#allocation3], 0  ;;  %s5219_s0 = inlined_call_operand.hbm [shape: f32[16,512], index: 0, kind: input, shape index: {}]   ;;  %s5220_s1 = inlined_call_operand.vmem [shape: f32[64], index: 1, kind: input, shape index: {}]   ;;  %s5221_s2 = inlined_call_operand.vmem [shape: f32[64], index: 2, kind: input, shape index: {}]   ;;  %s5222_s3 = inlined_call_operand.vmem [shape: f32[2], index: 3, kind: input, shape index: {}]   ;;  %s5223_s4 = inlined_call_operand.hbm [shape: f32[16,512], index: 4, kind: output, shape index: {}]  }
   0x1   :  { %10 = vsyncpa [#allocation5], 0 }
   0x2   :  { %11 = vsyncpa [#allocation8], 0  ;;  %s41_s17 = sshll.u32 %s5221_s2, 4  ;;  %s42_s17 = int_to_ptr.vmem [resolvable:$true] %s41_s17 }
   0x3   :  { %12 = vsyncpa [#allocation4], 0  ;;  %s2609_s18 = scalar_lea.vmem %s42_s17, 16  ;;  %p2614_p1 = scmp.lt.s32.totalorder %s42_s17, %s42_s17 }
   0x4   :  { %p2610_p0 = scmp.ne.s32.totalorder %s42_s17, %s2609_s18  ;;  %p2615_p2 = scmp.lt.s32.totalorder %s2609_s18, %s2609_s18 }
   0x6   :  { %p2616_p3 = por %p2615_p2, %p2614_p1 }
   0x8   :  { %p2617_p4 = pnand %p2616_p3, %p2610_p0 }
   0xa   :  { %2620 = shalt.err (!%p2617_p4)
}
   0xb   :  { %s2697_s19 = smov [#allocation7]   ;;  %s2698_s20 = smov [#allocation2]  }
   0xc   :  { %44 = dma.vmem_to_smem %s42_s17, 16, %s2697_s19, [#allocation8]  }
   0xd   :  { %s18_s21 = sshll.u32 %s2698_s20, 4  ;;  %s2621_s24 = scalar_lea.hbm %s5219_s0, 1024  ;;  %s19_s21 = int_to_ptr.vmem [resolvable:$true] %s18_s21 }
   0xe   :  { %p2622_p5 = scmp.ne.s32.totalorder %s5219_s0, %s2621_s24  ;;  %p2625_p6 = scmp.lt.u32.totalorder %s2621_s24, %s5219_s0 }
  0x10   :  { %p2627_p7 = pnand %p2625_p6, %p2622_p5 }
  0x12   :  { %2630 = shalt.err (!%p2627_p7)
}
  0x13   :  { %s2631_s28 = scalar_lea.vmem %s19_s21, 1024  ;;  %p2636_p9 = scmp.lt.s32.totalorder %s19_s21, %s19_s21 }
  0x14   :  { %p2632_p8 = scmp.ne.s32.totalorder %s19_s21, %s2631_s28  ;;  %p2637_p10 = scmp.lt.s32.totalorder %s2631_s28, %s2631_s28 }
  0x16   :  { %p2638_p11 = por %p2637_p10, %p2636_p9 }
  0x18   :  { %p2639_p12 = pnand %p2638_p11, %p2632_p8 }
  0x1a   :  { %2642 = shalt.err (!%p2639_p12)
}
  0x1b   :  { %s2699_s29 = smov 512   ;;  %s2700_s30 = smov 32  }
  0x1c   :  { %24 = dma.hbm_to_vmem [thread:$0]  %s5219_s0, 1024, %s19_s21, [#allocation3], %s2699_s29, %s2699_s29, %s2700_s30  }
  0x1d   :  { %s31_s9 = sshll.u32 %s5220_s1, 4  ;;  %s51_s12 = sshll.u32 %s5222_s3, 4  ;;  %s32_s9 = int_to_ptr.vmem [resolvable:$true] %s31_s9  ;;  %s52_s12 = int_to_ptr.vmem [resolvable:$true] %s51_s12 }
  0x1e   :  { %s2643_s13 = scalar_lea.vmem %s32_s9, 16  ;;  %p2648_p0 = scmp.lt.s32.totalorder %s32_s9, %s32_s9 }
  0x1f   :  { %p2644_p13 = scmp.ne.s32.totalorder %s32_s9, %s2643_s13  ;;  %p2649_p1 = scmp.lt.s32.totalorder %s2643_s13, %s2643_s13 }
  0x21   :  { %p2650_p2 = por %p2649_p1, %p2648_p0 }
  0x23   :  { %p2651_p3 = pnand %p2650_p2, %p2644_p13 }
  0x25   :  { %2654 = shalt.err (!%p2651_p3)
}
  0x26   :  { %s2701_s14 = smov [#allocation6]   ;;  %s2655_s0 = scalar_lea.vmem %s52_s12, 16 }
  0x27   :  { %34 = dma.vmem_to_smem %s32_s9, 16, %s2701_s14, [#allocation5]  }
  0x28   :  { %p2656_p4 = scmp.ne.s32.totalorder %s52_s12, %s2655_s0  ;;  %p2660_p5 = scmp.lt.s32.totalorder %s52_s12, %s52_s12 }
  0x29   :  { %p2661_p6 = scmp.lt.s32.totalorder %s2655_s0, %s2655_s0 }
  0x2b   :  { %p2662_p7 = por %p2661_p6, %p2660_p5 }
  0x2d   :  { %p2663_p8 = pnand %p2662_p7, %p2656_p4 }
  0x2f   :  { %2666 = shalt.err (!%p2663_p8)
}
  0x30   :  { %s2702_s1 = smov [#allocation9]  }
  0x31   :  { %54 = dma.vmem_to_smem %s52_s12, 16, %s2702_s1, [#allocation8]  }
  0x32   :  { %2689 = dma.done.wait [#allocation3], 1024  }
  0x33   :  { %2690 = vsyncadd [#allocation3], 4294966272 }
  0x34   :  { %2691 = dma.done.wait [#allocation5], 16  }
  0x35   :  { %2692 = vsyncadd [#allocation5], 4294967280 }
  0x36   :  { %2693 = dma.done.wait [#allocation8], 32  }
  0x37   :  { %2694 = vsyncadd [#allocation8], 4294967264 }
  0x38   :  { %67 = sfence }
  0x39   :  { %s76_s3 = sld [smem:[#allocation6]]  ;;  %s2444_s16 = sld [smem:[#allocation7 + $0x1]]  ;;  %v2753_v0 = vld [vmem:[#allocation2] sm:$0xff]  ;;  %v2755_v1 = vld [vmem:[#allocation2 + $0x8] sm:$0xff]  ;;  %v2757_v2 = vld [vmem:[#allocation2 + $0x10] sm:$0xff] }
  0x3a   :  { %s77_s15 = sld [smem:[#allocation7]]  ;;  %v2759_v3 = vld [vmem:[#allocation2 + $0x18] sm:$0xff]  ;;  %v2761_v4 = vld [vmem:[#allocation2 + $0x20] sm:$0xff]  ;;  %v2763_v5 = vld [vmem:[#allocation2 + $0x28] sm:$0xff]  ;;  %s2777_s17 = sld [smem:[#allocation6 + $0x1]] }
  0x3b   :  { %v2765_v6 = vld [vmem:[#allocation2 + $0x30] sm:$0xff]  ;;  %v2767_v7 = vld [vmem:[#allocation2 + $0x38] sm:$0xff]  ;;  %s2779_s18 = sld [smem:[#allocation6 + $0x2]]  ;;  %s2794_s20 = sld [smem:[#allocation7 + $0x3]] }
  0x3c   :  { %s2786_s19 = sld [smem:[#allocation7 + $0x2]]  ;;  %s2824_s21 = sld [smem:[#allocation6 + $0x3]] }
  0x3d   :  { %s2848_s22 = sld [smem:[#allocation6 + $0x4]]  ;;  %s2856_s24 = sld [smem:[#allocation7 + $0x5]] }
  0x3e   :  { %s2850_s23 = sld [smem:[#allocation7 + $0x4]]  ;;  %s2894_s25 = sld [smem:[#allocation6 + $0x5]] }
  0x3f   :  { %v95_v9 = vstv %s76_s3  ;;  %v114_v21 = vstv %s2444_s16  ;;  %s2924_s2 = sld [smem:[#allocation6 + $0x6]]  ;;  %s2932_s27 = sld [smem:[#allocation7 + $0x7]] }
  0x40   :  { %v78_v8 = vstv %s77_s15  ;;  %v115_v25 = vadd.f32 %v114_v21, %v2753_v0  ;;  %v116_v36 = vadd.f32 %v114_v21, %v2755_v1  ;;  %v117_v37 = vadd.f32 %v114_v21, %v2757_v2  ;;  %s2926_s26 = sld [smem:[#allocation7 + $0x6]]  ;;  %s2970_s28 = sld [smem:[#allocation6 + $0x7]] }
  0x41   :  { %v79_v10 = vadd.f32 %v78_v8, %v2753_v0  ;;  %v80_v11 = vadd.f32 %v78_v8, %v2755_v1  ;;  %v81_v12 = vadd.f32 %v78_v8, %v2757_v2  ;;  %v82_v13 = vadd.f32 %v78_v8, %v2759_v3  ;;  %s3000_s5 = sld [smem:[#allocation6 + $0x8]]  ;;  %s3008_s7 = sld [smem:[#allocation7 + $0x9]] }
  0x42   :  { %v83_v14 = vadd.f32 %v78_v8, %v2761_v4  ;;  %v84_v15 = vadd.f32 %v78_v8, %v2763_v5  ;;  %v85_v16 = vadd.f32 %v78_v8, %v2765_v6  ;;  %v86_v17 = vadd.f32 %v78_v8, %v2767_v7  ;;  %s3002_s6 = sld [smem:[#allocation7 + $0x8]]  ;;  %s3046_s8 = sld [smem:[#allocation6 + $0x9]] }
  0x43   :  { %v87_v18 = vand.u32 2147483647, %v79_v10  ;;  %v88_v19 = vand.u32 2147483647, %v80_v11  ;;  %v89_v20 = vand.u32 2147483647, %v81_v12  ;;  %v118_v38 = vadd.f32 %v114_v21, %v2759_v3 }
  0x44   :  { %v90_v22 = vand.u32 2147483647, %v82_v13  ;;  %v91_v23 = vand.u32 2147483647, %v83_v14  ;;  %v92_v24 = vand.u32 2147483647, %v84_v15  ;;  %v119_v39 = vadd.f32 %v114_v21, %v2761_v4 }
  0x45   :  { %v93_v26 = vand.u32 2147483647, %v85_v16  ;;  %v94_v27 = vand.u32 2147483647, %v86_v17  ;;  %v2782_v28 = vmul.f32 %v95_v9, %v87_v18  ;;  %v2784_v29 = vmul.f32 %v95_v9, %v88_v19  ;;  %s3076_s9 = sld [smem:[#allocation6 + $0xa]]  ;;  %s3084_s11 = sld [smem:[#allocation7 + $0xb]] }
  0x46   :  { %v98_v30 = vmul.f32 %v95_v9, %v89_v20  ;;  %v99_v31 = vmul.f32 %v95_v9, %v90_v22  ;;  %v100_v32 = vmul.f32 %v95_v9, %v91_v23  ;;  %v101_v33 = vmul.f32 %v95_v9, %v92_v24  ;;  %s3078_s10 = sld [smem:[#allocation7 + $0xa]]  ;;  %s3122_s12 = sld [smem:[#allocation6 + $0xb]] }
  0x47   :  { %v102_v34 = vmul.f32 %v95_v9, %v93_v26  ;;  %v103_v35 = vmul.f32 %v95_v9, %v94_v27  ;;  %v120_v40 = vadd.f32 %v114_v21, %v2763_v5  ;;  %v121_v41 = vadd.f32 %v114_v21, %v2765_v6  ;;  %s3152_s13 = sld [smem:[#allocation6 + $0xc]]  ;;  %s3160_s0 = sld [smem:[#allocation7 + $0xd]] }
  0x48   :  { %v122_v42 = vadd.f32 %v114_v21, %v2767_v7  ;;  %v123_v43 = vand.u32 2147483647, %v115_v25  ;;  %v124_v44 = vand.u32 2147483647, %v116_v36  ;;  %v125_v45 = vand.u32 2147483647, %v117_v37 }
  0x49   :  { %v126_v46 = vand.u32 2147483647, %v118_v38  ;;  %v127_v47 = vand.u32 2147483647, %v119_v39  ;;  %v128_v48 = vand.u32 2147483647, %v120_v40  ;;  %v131_v49 = vstv %s2777_s17 }
  0x4a   :  { %v129_v50 = vand.u32 2147483647, %v121_v41  ;;  %v130_v51 = vand.u32 2147483647, %v122_v42  ;;  %v2798_v52 = vmul.f32 %v131_v49, %v123_v43  ;;  %v2800_v53 = vmul.f32 %v131_v49, %v124_v44  ;;  %s3154_s14 = sld [smem:[#allocation7 + $0xc]]  ;;  %s3198_s1 = sld [smem:[#allocation6 + $0xd]] }
  0x4b   :  { %v2802_v54 = vmul.f32 %v131_v49, %v125_v45  ;;  %v2804_v55 = vmul.f32 %v131_v49, %v126_v46  ;;  %v2806_v56 = vmul.f32 %v131_v49, %v127_v47  ;;  %v2808_v57 = vmul.f32 %v131_v49, %v128_v48  ;;  %s3228_s3 = sld [smem:[#allocation6 + $0xe]]  ;;  %s3236_s16 = sld [smem:[#allocation7 + $0xf]] }
  0x4c   :  { %v2810_v58 = vmul.f32 %v131_v49, %v129_v50  ;;  %v2812_v59 = vmul.f32 %v131_v49, %v130_v51  ;;  %v150_v60 = vstv %s2786_s19  ;;  %v167_v61 = vstv %s2779_s18  ;;  %s3230_s15 = sld [smem:[#allocation7 + $0xe]]  ;;  %s3274_s17 = sld [smem:[#allocation6 + $0xf]] }
  0x4d   :  { %v151_v62 = vadd.f32 %v150_v60, %v2753_v0  ;;  %v152_v63 = vadd.f32 %v150_v60, %v2755_v1  ;;  %v153_v8 = vadd.f32 %v150_v60, %v2757_v2  ;;  %v154_v9 = vadd.f32 %v150_v60, %v2759_v3  ;;  %s3310_s18 = sld [smem:[#allocation6 + $0x10]] }
  0x4e   :  { %v155_v10 = vadd.f32 %v150_v60, %v2761_v4  ;;  %v156_v11 = vadd.f32 %v150_v60, %v2763_v5  ;;  %v157_v12 = vadd.f32 %v150_v60, %v2765_v6  ;;  %v158_v13 = vadd.f32 %v150_v60, %v2767_v7  ;;  %s3312_s19 = sld [smem:[#allocation7 + $0x10]] }
  0x4f   :  { %v159_v14 = vand.u32 2147483647, %v151_v62  ;;  %v160_v15 = vand.u32 2147483647, %v152_v63  ;;  %v161_v16 = vand.u32 2147483647, %v153_v8  ;;  %v186_v17 = vstv %s2794_s20 }
  0x50   :  { %v162_v18 = vand.u32 2147483647, %v154_v9  ;;  %v163_v19 = vand.u32 2147483647, %v155_v10  ;;  %v164_v20 = vand.u32 2147483647, %v156_v11  ;;  %v187_v21 = vadd.f32 %v186_v17, %v2753_v0 }
  0x51   :  { %v165_v22 = vand.u32 2147483647, %v157_v12  ;;  %v166_v23 = vand.u32 2147483647, %v158_v13  ;;  %v168_v24 = vmul.f32 %v167_v61, %v159_v14  ;;  %v169_v25 = vmul.f32 %v167_v61, %v160_v15  ;;  %s3326_s20 = sld [smem:[#allocation7 + $0x11]] }
  0x52   :  { %v170_v26 = vmul.f32 %v167_v61, %v161_v16  ;;  %v171_v27 = vmul.f32 %v167_v61, %v162_v18  ;;  %v172_v36 = vmul.f32 %v167_v61, %v163_v19  ;;  %v173_v37 = vmul.f32 %v167_v61, %v164_v20 }
  0x53   :  { %v174_v38 = vmul.f32 %v167_v61, %v165_v22  ;;  %v175_v39 = vmul.f32 %v167_v61, %v166_v23  ;;  %v2829_v40 = vadd.f32 %v168_v24, %v2782_v28  ;;  %v2832_v41 = vadd.f32 %v169_v25, %v2784_v29 }
  0x54   :  { %v2834_v42 = vadd.f32 %v170_v26, %v98_v30  ;;  %v2836_v43 = vadd.f32 %v171_v27, %v99_v31  ;;  %v2838_v44 = vadd.f32 %v172_v36, %v100_v32  ;;  %v2840_v45 = vadd.f32 %v173_v37, %v101_v33 }
  0x55   :  { %v2842_v46 = vadd.f32 %v174_v38, %v102_v34  ;;  %v2844_v47 = vadd.f32 %v175_v39, %v103_v35  ;;  %v188_v48 = vadd.f32 %v186_v17, %v2755_v1  ;;  %v189_v28 = vadd.f32 %v186_v17, %v2757_v2 }
  0x56   :  { %v190_v29 = vadd.f32 %v186_v17, %v2759_v3  ;;  %v191_v30 = vadd.f32 %v186_v17, %v2761_v4  ;;  %v192_v31 = vadd.f32 %v186_v17, %v2763_v5  ;;  %v193_v32 = vadd.f32 %v186_v17, %v2765_v6 }
  0x57   :  { %v194_v33 = vadd.f32 %v186_v17, %v2767_v7  ;;  %v195_v34 = vand.u32 2147483647, %v187_v21  ;;  %v196_v35 = vand.u32 2147483647, %v188_v48  ;;  %v197_v49 = vand.u32 2147483647, %v189_v28 }
  0x58   :  { %v198_v50 = vand.u32 2147483647, %v190_v29  ;;  %v199_v51 = vand.u32 2147483647, %v191_v30  ;;  %v200_v60 = vand.u32 2147483647, %v192_v31  ;;  %v203_v61 = vstv %s2824_s21 }
  0x59   :  { %v201_v62 = vand.u32 2147483647, %v193_v32  ;;  %v202_v63 = vand.u32 2147483647, %v194_v33  ;;  %v204_v8 = vmul.f32 %v203_v61, %v195_v34  ;;  %v205_v9 = vmul.f32 %v203_v61, %v196_v35  ;;  %s3366_s21 = sld [smem:[#allocation6 + $0x11]] }
  0x5a   :  { %v206_v10 = vmul.f32 %v203_v61, %v197_v49  ;;  %v207_v11 = vmul.f32 %v203_v61, %v198_v50  ;;  %v208_v12 = vmul.f32 %v203_v61, %v199_v51  ;;  %v209_v13 = vmul.f32 %v203_v61, %v200_v60 }
  0x5b   :  { %v210_v14 = vmul.f32 %v203_v61, %v201_v62  ;;  %v211_v15 = vmul.f32 %v203_v61, %v202_v63  ;;  %v2861_v16 = vadd.f32 %v204_v8, %v2798_v52  ;;  %v2864_v17 = vadd.f32 %v205_v9, %v2800_v53 }
  0x5c   :  { %v2867_v18 = vadd.f32 %v206_v10, %v2802_v54  ;;  %v2870_v19 = vadd.f32 %v207_v11, %v2804_v55  ;;  %v2873_v20 = vadd.f32 %v208_v12, %v2806_v56  ;;  %v2876_v21 = vadd.f32 %v209_v13, %v2808_v57 }
  0x5d   :  { %v2879_v22 = vadd.f32 %v210_v14, %v2810_v58  ;;  %v2882_v52 = vadd.f32 %v211_v15, %v2812_v59  ;;  %v222_v53 = vstv %s2850_s23  ;;  %v239_v23 = vstv %s2848_s22  ;;  %s3396_s22 = sld [smem:[#allocation6 + $0x12]] }
  0x5e   :  { %v223_v54 = vadd.f32 %v222_v53, %v2753_v0  ;;  %v224_v55 = vadd.f32 %v222_v53, %v2755_v1  ;;  %v225_v24 = vadd.f32 %v222_v53, %v2757_v2  ;;  %v226_v56 = vadd.f32 %v222_v53, %v2759_v3  ;;  %s3398_s23 = sld [smem:[#allocation7 + $0x12]] }
  0x5f   :  { %v227_v57 = vadd.f32 %v222_v53, %v2761_v4  ;;  %v228_v25 = vadd.f32 %v222_v53, %v2763_v5  ;;  %v229_v58 = vadd.f32 %v222_v53, %v2765_v6  ;;  %v230_v26 = vadd.f32 %v222_v53, %v2767_v7 }
  0x60   :  { %v231_v59 = vand.u32 2147483647, %v223_v54  ;;  %v232_v27 = vand.u32 2147483647, %v224_v55  ;;  %v233_v36 = vand.u32 2147483647, %v225_v24  ;;  %v258_v37 = vstv %s2856_s24 }
  0x61   :  { %v234_v38 = vand.u32 2147483647, %v226_v56  ;;  %v235_v39 = vand.u32 2147483647, %v227_v57  ;;  %v236_v48 = vand.u32 2147483647, %v228_v25  ;;  %v259_v28 = vadd.f32 %v258_v37, %v2753_v0 }
  0x62   :  { %v237_v29 = vand.u32 2147483647, %v229_v58  ;;  %v238_v30 = vand.u32 2147483647, %v230_v26  ;;  %v240_v31 = vmul.f32 %v239_v23, %v231_v59  ;;  %v241_v32 = vmul.f32 %v239_v23, %v232_v27  ;;  %s3404_s24 = sld [smem:[#allocation7 + $0x13]] }
  0x63   :  { %v242_v33 = vmul.f32 %v239_v23, %v233_v36  ;;  %v243_v34 = vmul.f32 %v239_v23, %v234_v38  ;;  %v244_v35 = vmul.f32 %v239_v23, %v235_v39  ;;  %v245_v49 = vmul.f32 %v239_v23, %v236_v48 }
  0x64   :  { %v246_v50 = vmul.f32 %v239_v23, %v237_v29  ;;  %v247_v51 = vmul.f32 %v239_v23, %v238_v30  ;;  %v2899_v60 = vadd.f32 %v240_v31, %v2829_v40  ;;  %v2902_v61 = vadd.f32 %v241_v32, %v2832_v41 }
  0x65   :  { %v2905_v62 = vadd.f32 %v242_v33, %v2834_v42  ;;  %v2908_v63 = vadd.f32 %v243_v34, %v2836_v43  ;;  %v2911_v8 = vadd.f32 %v244_v35, %v2838_v44  ;;  %v2914_v9 = vadd.f32 %v245_v49, %v2840_v45 }
  0x66   :  { %v2917_v10 = vadd.f32 %v246_v50, %v2842_v46  ;;  %v2920_v40 = vadd.f32 %v247_v51, %v2844_v47  ;;  %v260_v41 = vadd.f32 %v258_v37, %v2755_v1  ;;  %v261_v42 = vadd.f32 %v258_v37, %v2757_v2 }
  0x67   :  { %v262_v43 = vadd.f32 %v258_v37, %v2759_v3  ;;  %v263_v44 = vadd.f32 %v258_v37, %v2761_v4  ;;  %v264_v45 = vadd.f32 %v258_v37, %v2763_v5  ;;  %v265_v46 = vadd.f32 %v258_v37, %v2765_v6 }
  0x68   :  { %v266_v47 = vadd.f32 %v258_v37, %v2767_v7  ;;  %v267_v11 = vand.u32 2147483647, %v259_v28  ;;  %v268_v12 = vand.u32 2147483647, %v260_v41  ;;  %v269_v13 = vand.u32 2147483647, %v261_v42 }
  0x69   :  { %v270_v14 = vand.u32 2147483647, %v262_v43  ;;  %v271_v15 = vand.u32 2147483647, %v263_v44  ;;  %v272_v53 = vand.u32 2147483647, %v264_v45  ;;  %v275_v23 = vstv %s2894_s25 }
  0x6a   :  { %v273_v54 = vand.u32 2147483647, %v265_v46  ;;  %v274_v55 = vand.u32 2147483647, %v266_v47  ;;  %v276_v24 = vmul.f32 %v275_v23, %v267_v11  ;;  %v277_v56 = vmul.f32 %v275_v23, %v268_v12  ;;  %s3442_s25 = sld [smem:[#allocation6 + $0x13]] }
  0x6b   :  { %v278_v57 = vmul.f32 %v275_v23, %v269_v13  ;;  %v279_v25 = vmul.f32 %v275_v23, %v270_v14  ;;  %v280_v58 = vmul.f32 %v275_v23, %v271_v15  ;;  %v281_v26 = vmul.f32 %v275_v23, %v272_v53 }
  0x6c   :  { %v282_v59 = vmul.f32 %v275_v23, %v273_v54  ;;  %v283_v27 = vmul.f32 %v275_v23, %v274_v55  ;;  %v2937_v36 = vadd.f32 %v276_v24, %v2861_v16  ;;  %v2940_v37 = vadd.f32 %v277_v56, %v2864_v17 }
  0x6d   :  { %v2943_v38 = vadd.f32 %v278_v57, %v2867_v18  ;;  %v2946_v39 = vadd.f32 %v279_v25, %v2870_v19  ;;  %v2949_v48 = vadd.f32 %v280_v58, %v2873_v20  ;;  %v2952_v28 = vadd.f32 %v281_v26, %v2876_v21 }
  0x6e   :  { %v2955_v29 = vadd.f32 %v282_v59, %v2879_v22  ;;  %v2958_v16 = vadd.f32 %v283_v27, %v2882_v52  ;;  %v294_v17 = vstv %s2926_s26  ;;  %v311_v30 = vstv %s2924_s2  ;;  %s3472_s2 = sld [smem:[#allocation6 + $0x14]] }
  0x6f   :  { %v295_v18 = vadd.f32 %v294_v17, %v2753_v0  ;;  %v296_v19 = vadd.f32 %v294_v17, %v2755_v1  ;;  %v297_v31 = vadd.f32 %v294_v17, %v2757_v2  ;;  %v298_v20 = vadd.f32 %v294_v17, %v2759_v3  ;;  %s3474_s26 = sld [smem:[#allocation7 + $0x14]] }
  0x70   :  { %v299_v21 = vadd.f32 %v294_v17, %v2761_v4  ;;  %v300_v32 = vadd.f32 %v294_v17, %v2763_v5  ;;  %v301_v22 = vadd.f32 %v294_v17, %v2765_v6  ;;  %v302_v33 = vadd.f32 %v294_v17, %v2767_v7 }
  0x71   :  { %v303_v52 = vand.u32 2147483647, %v295_v18  ;;  %v304_v34 = vand.u32 2147483647, %v296_v19  ;;  %v305_v35 = vand.u32 2147483647, %v297_v31  ;;  %v330_v49 = vstv %s2932_s27 }
  0x72   :  { %v306_v50 = vand.u32 2147483647, %v298_v20  ;;  %v307_v51 = vand.u32 2147483647, %v299_v21  ;;  %v308_v41 = vand.u32 2147483647, %v300_v32  ;;  %v331_v42 = vadd.f32 %v330_v49, %v2753_v0 }
  0x73   :  { %v309_v43 = vand.u32 2147483647, %v301_v22  ;;  %v310_v44 = vand.u32 2147483647, %v302_v33  ;;  %v312_v45 = vmul.f32 %v311_v30, %v303_v52  ;;  %v313_v46 = vmul.f32 %v311_v30, %v304_v34  ;;  %s3480_s27 = sld [smem:[#allocation7 + $0x15]] }
  0x74   :  { %v314_v47 = vmul.f32 %v311_v30, %v305_v35  ;;  %v315_v11 = vmul.f32 %v311_v30, %v306_v50  ;;  %v316_v12 = vmul.f32 %v311_v30, %v307_v51  ;;  %v317_v13 = vmul.f32 %v311_v30, %v308_v41 }
  0x75   :  { %v318_v14 = vmul.f32 %v311_v30, %v309_v43  ;;  %v319_v15 = vmul.f32 %v311_v30, %v310_v44  ;;  %v2975_v53 = vadd.f32 %v312_v45, %v2899_v60  ;;  %v2978_v23 = vadd.f32 %v313_v46, %v2902_v61 }
  0x76   :  { %v2981_v54 = vadd.f32 %v314_v47, %v2905_v62  ;;  %v2984_v55 = vadd.f32 %v315_v11, %v2908_v63  ;;  %v2987_v24 = vadd.f32 %v316_v12, %v2911_v8  ;;  %v2990_v56 = vadd.f32 %v317_v13, %v2914_v9 }
  0x77   :  { %v2993_v57 = vadd.f32 %v318_v14, %v2917_v10  ;;  %v2996_v60 = vadd.f32 %v319_v15, %v2920_v40  ;;  %v332_v61 = vadd.f32 %v330_v49, %v2755_v1  ;;  %v333_v62 = vadd.f32 %v330_v49, %v2757_v2 }
  0x78   :  { %v334_v63 = vadd.f32 %v330_v49, %v2759_v3  ;;  %v335_v8 = vadd.f32 %v330_v49, %v2761_v4  ;;  %v336_v9 = vadd.f32 %v330_v49, %v2763_v5  ;;  %v337_v10 = vadd.f32 %v330_v49, %v2765_v6 }
  0x79   :  { %v338_v40 = vadd.f32 %v330_v49, %v2767_v7  ;;  %v339_v25 = vand.u32 2147483647, %v331_v42  ;;  %v340_v58 = vand.u32 2147483647, %v332_v61  ;;  %v341_v26 = vand.u32 2147483647, %v333_v62 }
  0x7a   :  { %v342_v59 = vand.u32 2147483647, %v334_v63  ;;  %v343_v27 = vand.u32 2147483647, %v335_v8  ;;  %v344_v17 = vand.u32 2147483647, %v336_v9  ;;  %v347_v30 = vstv %s2970_s28 }
  0x7b   :  { %v345_v18 = vand.u32 2147483647, %v337_v10  ;;  %v346_v19 = vand.u32 2147483647, %v338_v40  ;;  %v348_v31 = vmul.f32 %v347_v30, %v339_v25  ;;  %v349_v20 = vmul.f32 %v347_v30, %v340_v58  ;;  %s3518_s28 = sld [smem:[#allocation6 + $0x15]] }
  0x7c   :  { %v350_v21 = vmul.f32 %v347_v30, %v341_v26  ;;  %v351_v32 = vmul.f32 %v347_v30, %v342_v59  ;;  %v352_v22 = vmul.f32 %v347_v30, %v343_v27  ;;  %v353_v33 = vmul.f32 %v347_v30, %v344_v17 }
  0x7d   :  { %v354_v52 = vmul.f32 %v347_v30, %v345_v18  ;;  %v355_v34 = vmul.f32 %v347_v30, %v346_v19  ;;  %v3013_v35 = vadd.f32 %v348_v31, %v2937_v36  ;;  %v3016_v49 = vadd.f32 %v349_v20, %v2940_v37 }
  0x7e   :  { %v3019_v50 = vadd.f32 %v350_v21, %v2943_v38  ;;  %v3022_v51 = vadd.f32 %v351_v32, %v2946_v39  ;;  %v3025_v41 = vadd.f32 %v352_v22, %v2949_v48  ;;  %v3028_v42 = vadd.f32 %v353_v33, %v2952_v28 }
  0x7f   :  { %v3031_v43 = vadd.f32 %v354_v52, %v2955_v29  ;;  %v3034_v36 = vadd.f32 %v355_v34, %v2958_v16  ;;  %v366_v37 = vstv %s3002_s6  ;;  %v383_v44 = vstv %s3000_s5  ;;  %s3548_s5 = sld [smem:[#allocation6 + $0x16]] }
  0x80   :  { %v367_v38 = vadd.f32 %v366_v37, %v2753_v0  ;;  %v368_v39 = vadd.f32 %v366_v37, %v2755_v1  ;;  %v369_v45 = vadd.f32 %v366_v37, %v2757_v2  ;;  %v370_v48 = vadd.f32 %v366_v37, %v2759_v3  ;;  %s3550_s6 = sld [smem:[#allocation7 + $0x16]] }
  0x81   :  { %v371_v28 = vadd.f32 %v366_v37, %v2761_v4  ;;  %v372_v46 = vadd.f32 %v366_v37, %v2763_v5  ;;  %v373_v29 = vadd.f32 %v366_v37, %v2765_v6  ;;  %v374_v47 = vadd.f32 %v366_v37, %v2767_v7 }
  0x82   :  { %v375_v16 = vand.u32 2147483647, %v367_v38  ;;  %v376_v11 = vand.u32 2147483647, %v368_v39  ;;  %v377_v12 = vand.u32 2147483647, %v369_v45  ;;  %v402_v13 = vstv %s3008_s7 }
  0x83   :  { %v378_v14 = vand.u32 2147483647, %v370_v48  ;;  %v379_v15 = vand.u32 2147483647, %v371_v28  ;;  %v380_v61 = vand.u32 2147483647, %v372_v46  ;;  %v403_v62 = vadd.f32 %v402_v13, %v2753_v0 }
  0x84   :  { %v381_v63 = vand.u32 2147483647, %v373_v29  ;;  %v382_v8 = vand.u32 2147483647, %v374_v47  ;;  %v384_v9 = vmul.f32 %v383_v44, %v375_v16  ;;  %v385_v10 = vmul.f32 %v383_v44, %v376_v11  ;;  %s3556_s7 = sld [smem:[#allocation7 + $0x17]] }
  0x85   :  { %v386_v40 = vmul.f32 %v383_v44, %v377_v12  ;;  %v387_v25 = vmul.f32 %v383_v44, %v378_v14  ;;  %v388_v58 = vmul.f32 %v383_v44, %v379_v15  ;;  %v389_v26 = vmul.f32 %v383_v44, %v380_v61 }
  0x86   :  { %v390_v59 = vmul.f32 %v383_v44, %v381_v63  ;;  %v391_v27 = vmul.f32 %v383_v44, %v382_v8  ;;  %v3051_v17 = vadd.f32 %v384_v9, %v2975_v53  ;;  %v3054_v30 = vadd.f32 %v385_v10, %v2978_v23 }
  0x87   :  { %v3057_v18 = vadd.f32 %v386_v40, %v2981_v54  ;;  %v3060_v19 = vadd.f32 %v387_v25, %v2984_v55  ;;  %v3063_v31 = vadd.f32 %v388_v58, %v2987_v24  ;;  %v3066_v20 = vadd.f32 %v389_v26, %v2990_v56 }
  0x88   :  { %v3069_v21 = vadd.f32 %v390_v59, %v2993_v57  ;;  %v3072_v53 = vadd.f32 %v391_v27, %v2996_v60  ;;  %v404_v23 = vadd.f32 %v402_v13, %v2755_v1  ;;  %v405_v54 = vadd.f32 %v402_v13, %v2757_v2 }
  0x89   :  { %v406_v55 = vadd.f32 %v402_v13, %v2759_v3  ;;  %v407_v24 = vadd.f32 %v402_v13, %v2761_v4  ;;  %v408_v56 = vadd.f32 %v402_v13, %v2763_v5  ;;  %v409_v57 = vadd.f32 %v402_v13, %v2765_v6 }
  0x8a   :  { %v410_v60 = vadd.f32 %v402_v13, %v2767_v7  ;;  %v411_v32 = vand.u32 2147483647, %v403_v62  ;;  %v412_v22 = vand.u32 2147483647, %v404_v23  ;;  %v413_v33 = vand.u32 2147483647, %v405_v54 }
  0x8b   :  { %v414_v52 = vand.u32 2147483647, %v406_v55  ;;  %v415_v34 = vand.u32 2147483647, %v407_v24  ;;  %v416_v37 = vand.u32 2147483647, %v408_v56  ;;  %v419_v44 = vstv %s3046_s8 }
  0x8c   :  { %v417_v38 = vand.u32 2147483647, %v409_v57  ;;  %v418_v39 = vand.u32 2147483647, %v410_v60  ;;  %v420_v45 = vmul.f32 %v419_v44, %v411_v32  ;;  %v421_v48 = vmul.f32 %v419_v44, %v412_v22  ;;  %s3594_s8 = sld [smem:[#allocation6 + $0x17]] }
  0x8d   :  { %v422_v28 = vmul.f32 %v419_v44, %v413_v33  ;;  %v423_v46 = vmul.f32 %v419_v44, %v414_v52  ;;  %v424_v29 = vmul.f32 %v419_v44, %v415_v34  ;;  %v425_v47 = vmul.f32 %v419_v44, %v416_v37 }
  0x8e   :  { %v426_v16 = vmul.f32 %v419_v44, %v417_v38  ;;  %v427_v11 = vmul.f32 %v419_v44, %v418_v39  ;;  %v3089_v12 = vadd.f32 %v420_v45, %v3013_v35  ;;  %v3092_v13 = vadd.f32 %v421_v48, %v3016_v49 }
  0x8f   :  { %v3095_v14 = vadd.f32 %v422_v28, %v3019_v50  ;;  %v3098_v15 = vadd.f32 %v423_v46, %v3022_v51  ;;  %v3101_v61 = vadd.f32 %v424_v29, %v3025_v41  ;;  %v3104_v62 = vadd.f32 %v425_v47, %v3028_v42 }
  0x90   :  { %v3107_v63 = vadd.f32 %v426_v16, %v3031_v43  ;;  %v3110_v35 = vadd.f32 %v427_v11, %v3034_v36  ;;  %v438_v49 = vstv %s3078_s10  ;;  %v455_v8 = vstv %s3076_s9  ;;  %s3624_s9 = sld [smem:[#allocation6 + $0x18]] }
  0x91   :  { %v439_v50 = vadd.f32 %v438_v49, %v2753_v0  ;;  %v440_v51 = vadd.f32 %v438_v49, %v2755_v1  ;;  %v441_v9 = vadd.f32 %v438_v49, %v2757_v2  ;;  %v442_v41 = vadd.f32 %v438_v49, %v2759_v3  ;;  %s3626_s10 = sld [smem:[#allocation7 + $0x18]] }
  0x92   :  { %v443_v42 = vadd.f32 %v438_v49, %v2761_v4  ;;  %v444_v10 = vadd.f32 %v438_v49, %v2763_v5  ;;  %v445_v43 = vadd.f32 %v438_v49, %v2765_v6  ;;  %v446_v40 = vadd.f32 %v438_v49, %v2767_v7 }
  0x93   :  { %v447_v36 = vand.u32 2147483647, %v439_v50  ;;  %v448_v25 = vand.u32 2147483647, %v440_v51  ;;  %v449_v58 = vand.u32 2147483647, %v441_v9  ;;  %v474_v26 = vstv %s3084_s11 }
  0x94   :  { %v450_v59 = vand.u32 2147483647, %v442_v41  ;;  %v451_v27 = vand.u32 2147483647, %v443_v42  ;;  %v452_v23 = vand.u32 2147483647, %v444_v10  ;;  %v475_v54 = vadd.f32 %v474_v26, %v2753_v0 }
  0x95   :  { %v453_v55 = vand.u32 2147483647, %v445_v43  ;;  %v454_v24 = vand.u32 2147483647, %v446_v40  ;;  %v456_v56 = vmul.f32 %v455_v8, %v447_v36  ;;  %v457_v57 = vmul.f32 %v455_v8, %v448_v25  ;;  %s3632_s11 = sld [smem:[#allocation7 + $0x19]] }
  0x96   :  { %v458_v60 = vmul.f32 %v455_v8, %v449_v58  ;;  %v459_v32 = vmul.f32 %v455_v8, %v450_v59  ;;  %v460_v22 = vmul.f32 %v455_v8, %v451_v27  ;;  %v461_v33 = vmul.f32 %v455_v8, %v452_v23 }
  0x97   :  { %v462_v52 = vmul.f32 %v455_v8, %v453_v55  ;;  %v463_v34 = vmul.f32 %v455_v8, %v454_v24  ;;  %v3127_v37 = vadd.f32 %v456_v56, %v3051_v17  ;;  %v3130_v44 = vadd.f32 %v457_v57, %v3054_v30 }
  0x98   :  { %v3133_v38 = vadd.f32 %v458_v60, %v3057_v18  ;;  %v3136_v39 = vadd.f32 %v459_v32, %v3060_v19  ;;  %v3139_v45 = vadd.f32 %v460_v22, %v3063_v31  ;;  %v3142_v48 = vadd.f32 %v461_v33, %v3066_v20 }
  0x99   :  { %v3145_v28 = vadd.f32 %v462_v52, %v3069_v21  ;;  %v3148_v17 = vadd.f32 %v463_v34, %v3072_v53  ;;  %v476_v30 = vadd.f32 %v474_v26, %v2755_v1  ;;  %v477_v18 = vadd.f32 %v474_v26, %v2757_v2 }
  0x9a   :  { %v478_v19 = vadd.f32 %v474_v26, %v2759_v3  ;;  %v479_v31 = vadd.f32 %v474_v26, %v2761_v4  ;;  %v480_v20 = vadd.f32 %v474_v26, %v2763_v5  ;;  %v481_v21 = vadd.f32 %v474_v26, %v2765_v6 }
  0x9b   :  { %v482_v53 = vadd.f32 %v474_v26, %v2767_v7  ;;  %v483_v46 = vand.u32 2147483647, %v475_v54  ;;  %v484_v29 = vand.u32 2147483647, %v476_v30  ;;  %v485_v47 = vand.u32 2147483647, %v477_v18 }
  0x9c   :  { %v486_v16 = vand.u32 2147483647, %v478_v19  ;;  %v487_v11 = vand.u32 2147483647, %v479_v31  ;;  %v488_v49 = vand.u32 2147483647, %v480_v20  ;;  %v491_v8 = vstv %s3122_s12 }
  0x9d   :  { %v489_v50 = vand.u32 2147483647, %v481_v21  ;;  %v490_v51 = vand.u32 2147483647, %v482_v53  ;;  %v492_v9 = vmul.f32 %v491_v8, %v483_v46  ;;  %v493_v41 = vmul.f32 %v491_v8, %v484_v29  ;;  %s3670_s12 = sld [smem:[#allocation6 + $0x19]] }
  0x9e   :  { %v494_v42 = vmul.f32 %v491_v8, %v485_v47  ;;  %v495_v10 = vmul.f32 %v491_v8, %v486_v16  ;;  %v496_v43 = vmul.f32 %v491_v8, %v487_v11  ;;  %v497_v40 = vmul.f32 %v491_v8, %v488_v49 }
  0x9f   :  { %v498_v36 = vmul.f32 %v491_v8, %v489_v50  ;;  %v499_v25 = vmul.f32 %v491_v8, %v490_v51  ;;  %v3165_v58 = vadd.f32 %v492_v9, %v3089_v12  ;;  %v3168_v26 = vadd.f32 %v493_v41, %v3092_v13 }
  0xa0   :  { %v3171_v59 = vadd.f32 %v494_v42, %v3095_v14  ;;  %v3174_v27 = vadd.f32 %v495_v10, %v3098_v15  ;;  %v3177_v23 = vadd.f32 %v496_v43, %v3101_v61  ;;  %v3180_v54 = vadd.f32 %v497_v40, %v3104_v62 }
  0xa1   :  { %v3183_v55 = vadd.f32 %v498_v36, %v3107_v63  ;;  %v3186_v12 = vadd.f32 %v499_v25, %v3110_v35  ;;  %v510_v13 = vstv %s3154_s14  ;;  %v527_v24 = vstv %s3152_s13  ;;  %s3700_s13 = sld [smem:[#allocation6 + $0x1a]] }
  0xa2   :  { %v511_v14 = vadd.f32 %v510_v13, %v2753_v0  ;;  %v512_v15 = vadd.f32 %v510_v13, %v2755_v1  ;;  %v513_v56 = vadd.f32 %v510_v13, %v2757_v2  ;;  %v514_v61 = vadd.f32 %v510_v13, %v2759_v3  ;;  %s3702_s14 = sld [smem:[#allocation7 + $0x1a]] }
  0xa3   :  { %v515_v62 = vadd.f32 %v510_v13, %v2761_v4  ;;  %v516_v57 = vadd.f32 %v510_v13, %v2763_v5  ;;  %v517_v63 = vadd.f32 %v510_v13, %v2765_v6  ;;  %v518_v60 = vadd.f32 %v510_v13, %v2767_v7 }
  0xa4   :  { %v519_v35 = vand.u32 2147483647, %v511_v14  ;;  %v520_v32 = vand.u32 2147483647, %v512_v15  ;;  %v521_v22 = vand.u32 2147483647, %v513_v56  ;;  %v546_v33 = vstv %s3160_s0 }
  0xa5   :  { %v522_v52 = vand.u32 2147483647, %v514_v61  ;;  %v523_v34 = vand.u32 2147483647, %v515_v62  ;;  %v524_v30 = vand.u32 2147483647, %v516_v57  ;;  %v547_v18 = vadd.f32 %v546_v33, %v2753_v0 }
  0xa6   :  { %v525_v19 = vand.u32 2147483647, %v517_v63  ;;  %v526_v31 = vand.u32 2147483647, %v518_v60  ;;  %v528_v20 = vmul.f32 %v527_v24, %v519_v35  ;;  %v529_v21 = vmul.f32 %v527_v24, %v520_v32  ;;  %s3708_s0 = sld [smem:[#allocation7 + $0x1b]] }
  0xa7   :  { %v530_v53 = vmul.f32 %v527_v24, %v521_v22  ;;  %v531_v46 = vmul.f32 %v527_v24, %v522_v52  ;;  %v532_v29 = vmul.f32 %v527_v24, %v523_v34  ;;  %v533_v47 = vmul.f32 %v527_v24, %v524_v30 }
  0xa8   :  { %v534_v16 = vmul.f32 %v527_v24, %v525_v19  ;;  %v535_v11 = vmul.f32 %v527_v24, %v526_v31  ;;  %v3203_v49 = vadd.f32 %v528_v20, %v3127_v37  ;;  %v3206_v8 = vadd.f32 %v529_v21, %v3130_v44 }
  0xa9   :  { %v3209_v50 = vadd.f32 %v530_v53, %v3133_v38  ;;  %v3212_v51 = vadd.f32 %v531_v46, %v3136_v39  ;;  %v3215_v9 = vadd.f32 %v532_v29, %v3139_v45  ;;  %v3218_v41 = vadd.f32 %v533_v47, %v3142_v48 }
  0xaa   :  { %v3221_v42 = vadd.f32 %v534_v16, %v3145_v28  ;;  %v3224_v37 = vadd.f32 %v535_v11, %v3148_v17  ;;  %v548_v44 = vadd.f32 %v546_v33, %v2755_v1  ;;  %v549_v38 = vadd.f32 %v546_v33, %v2757_v2 }
  0xab   :  { %v550_v39 = vadd.f32 %v546_v33, %v2759_v3  ;;  %v551_v45 = vadd.f32 %v546_v33, %v2761_v4  ;;  %v552_v48 = vadd.f32 %v546_v33, %v2763_v5  ;;  %v553_v28 = vadd.f32 %v546_v33, %v2765_v6 }
  0xac   :  { %v554_v17 = vadd.f32 %v546_v33, %v2767_v7  ;;  %v555_v10 = vand.u32 2147483647, %v547_v18  ;;  %v556_v43 = vand.u32 2147483647, %v548_v44  ;;  %v557_v40 = vand.u32 2147483647, %v549_v38 }
  0xad   :  { %v558_v36 = vand.u32 2147483647, %v550_v39  ;;  %v559_v25 = vand.u32 2147483647, %v551_v45  ;;  %v560_v13 = vand.u32 2147483647, %v552_v48  ;;  %v563_v24 = vstv %s3198_s1 }
  0xae   :  { %v561_v14 = vand.u32 2147483647, %v553_v28  ;;  %v562_v15 = vand.u32 2147483647, %v554_v17  ;;  %v564_v56 = vmul.f32 %v563_v24, %v555_v10  ;;  %v565_v61 = vmul.f32 %v563_v24, %v556_v43  ;;  %s3746_s1 = sld [smem:[#allocation6 + $0x1b]] }
  0xaf   :  { %v566_v62 = vmul.f32 %v563_v24, %v557_v40  ;;  %v567_v57 = vmul.f32 %v563_v24, %v558_v36  ;;  %v568_v63 = vmul.f32 %v563_v24, %v559_v25  ;;  %v569_v60 = vmul.f32 %v563_v24, %v560_v13  ;;  %v3307_v13 = vld [vmem:[#allocation2 + $0x10] sm:$0xff] }
  0xb0   :  { %v570_v35 = vmul.f32 %v563_v24, %v561_v14  ;;  %v571_v32 = vmul.f32 %v563_v24, %v562_v15  ;;  %v3241_v22 = vadd.f32 %v564_v56, %v3165_v58  ;;  %v3244_v33 = vadd.f32 %v565_v61, %v3168_v26  ;;  %v3320_v24 = vld [vmem:[#allocation2 + $0x28] sm:$0xff]  ;;  %v3323_v15 = vld [vmem:[#allocation2 + $0x30] sm:$0xff]  ;;  %v3328_v61 = vld [vmem:[#allocation2 + $0x38] sm:$0xff] }
  0xb1   :  { %v3247_v52 = vadd.f32 %v566_v62, %v3171_v59  ;;  %v3250_v34 = vadd.f32 %v567_v57, %v3174_v27  ;;  %v3253_v30 = vadd.f32 %v568_v63, %v3177_v23  ;;  %v3256_v18 = vadd.f32 %v569_v60, %v3180_v54 }
  0xb2   :  { %v3259_v19 = vadd.f32 %v570_v35, %v3183_v55  ;;  %v3262_v58 = vadd.f32 %v571_v32, %v3186_v12  ;;  %v582_v26 = vstv %s3230_s15  ;;  %v599_v31 = vstv %s3228_s3  ;;  %s3776_s3 = sld [smem:[#allocation6 + $0x1c]] }
  0xb3   :  { %v583_v59 = vadd.f32 %v582_v26, %v2753_v0  ;;  %v584_v27 = vadd.f32 %v582_v26, %v2755_v1  ;;  %v585_v20 = vadd.f32 %v582_v26, %v2757_v2  ;;  %v586_v23 = vadd.f32 %v582_v26, %v2759_v3  ;;  %v3277_v2 = vld [vmem:[#allocation2] sm:$0xff]  ;;  %s3778_s15 = sld [smem:[#allocation7 + $0x1c]] }
  0xb4   :  { %v587_v54 = vadd.f32 %v582_v26, %v2761_v4  ;;  %v588_v21 = vadd.f32 %v582_v26, %v2763_v5  ;;  %v589_v55 = vadd.f32 %v582_v26, %v2765_v6  ;;  %v590_v53 = vadd.f32 %v582_v26, %v2767_v7 }
  0xb5   :  { %v591_v12 = vand.u32 2147483647, %v583_v59  ;;  %v592_v46 = vand.u32 2147483647, %v584_v27  ;;  %v593_v29 = vand.u32 2147483647, %v585_v20  ;;  %v618_v0 = vstv %s3236_s16 }
  0xb6   :  { %v594_v47 = vand.u32 2147483647, %v586_v23  ;;  %v595_v1 = vand.u32 2147483647, %v587_v54  ;;  %v596_v16 = vand.u32 2147483647, %v588_v21  ;;  %v619_v3 = vadd.f32 %v3277_v2, %v618_v0 }
  0xb7   :  { %v597_v4 = vand.u32 2147483647, %v589_v55  ;;  %v598_v11 = vand.u32 2147483647, %v590_v53  ;;  %v600_v5 = vmul.f32 %v599_v31, %v591_v12  ;;  %v601_v44 = vmul.f32 %v599_v31, %v592_v46  ;;  %s3784_s16 = sld [smem:[#allocation7 + $0x1d]] }
  0xb8   :  { %v602_v6 = vmul.f32 %v599_v31, %v593_v29  ;;  %v603_v38 = vmul.f32 %v599_v31, %v594_v47  ;;  %v604_v7 = vmul.f32 %v599_v31, %v595_v1  ;;  %v605_v39 = vmul.f32 %v599_v31, %v596_v16 }
  0xb9   :  { %v606_v45 = vmul.f32 %v599_v31, %v597_v4  ;;  %v607_v48 = vmul.f32 %v599_v31, %v598_v11  ;;  %v3281_v28 = vadd.f32 %v600_v5, %v3203_v49  ;;  %v3284_v17 = vadd.f32 %v601_v44, %v3206_v8  ;;  %v3304_v8 = vld [vmem:[#allocation2 + $0x8] sm:$0xff] }
  0xba   :  { %v3287_v10 = vadd.f32 %v602_v6, %v3209_v50  ;;  %v3290_v43 = vadd.f32 %v603_v38, %v3212_v51  ;;  %v3293_v40 = vadd.f32 %v604_v7, %v3215_v9  ;;  %v3296_v36 = vadd.f32 %v605_v39, %v3218_v41  ;;  %v3314_v9 = vld [vmem:[#allocation2 + $0x18] sm:$0xff] }
  0xbb   :  { %v3299_v25 = vadd.f32 %v606_v45, %v3221_v42  ;;  %v3302_v49 = vadd.f32 %v607_v48, %v3224_v37  ;;  %v620_v50 = vadd.f32 %v3304_v8, %v618_v0  ;;  %v621_v51 = vadd.f32 %v3307_v13, %v618_v0  ;;  %v3317_v42 = vld [vmem:[#allocation2 + $0x20] sm:$0xff] }
  0xbc   :  { %v622_v41 = vadd.f32 %v3314_v9, %v618_v0  ;;  %v623_v37 = vadd.f32 %v3317_v42, %v618_v0  ;;  %v624_v14 = vadd.f32 %v3320_v24, %v618_v0  ;;  %v625_v56 = vadd.f32 %v3323_v15, %v618_v0 }
  0xbd   :  { %v626_v62 = vadd.f32 %v3328_v61, %v618_v0  ;;  %v627_v57 = vand.u32 2147483647, %v619_v3  ;;  %v628_v63 = vand.u32 2147483647, %v620_v50  ;;  %v629_v60 = vand.u32 2147483647, %v621_v51 }
  0xbe   :  { %v630_v35 = vand.u32 2147483647, %v622_v41  ;;  %v631_v32 = vand.u32 2147483647, %v623_v37  ;;  %v632_v26 = vand.u32 2147483647, %v624_v14  ;;  %v635_v31 = vstv %s3274_s17 }
  0xbf   :  { %v633_v59 = vand.u32 2147483647, %v625_v56  ;;  %v634_v27 = vand.u32 2147483647, %v626_v62  ;;  %v636_v20 = vmul.f32 %v635_v31, %v627_v57  ;;  %v637_v23 = vmul.f32 %v635_v31, %v628_v63  ;;  %s3822_s17 = sld [smem:[#allocation6 + $0x1d]] }
  0xc0   :  { %v638_v54 = vmul.f32 %v635_v31, %v629_v60  ;;  %v639_v21 = vmul.f32 %v635_v31, %v630_v35  ;;  %v640_v55 = vmul.f32 %v635_v31, %v631_v32  ;;  %v641_v53 = vmul.f32 %v635_v31, %v632_v26 }
  0xc1   :  { %v642_v12 = vmul.f32 %v635_v31, %v633_v59  ;;  %v643_v46 = vmul.f32 %v635_v31, %v634_v27  ;;  %v3333_v29 = vadd.f32 %v636_v20, %v3241_v22  ;;  %v3336_v0 = vadd.f32 %v637_v23, %v3244_v33 }
  0xc2   :  { %v3339_v47 = vadd.f32 %v638_v54, %v3247_v52  ;;  %v3342_v1 = vadd.f32 %v639_v21, %v3250_v34  ;;  %v3345_v16 = vadd.f32 %v640_v55, %v3253_v30  ;;  %v3348_v3 = vadd.f32 %v641_v53, %v3256_v18 }
  0xc3   :  { %v3351_v4 = vadd.f32 %v642_v12, %v3259_v19  ;;  %v3354_v22 = vadd.f32 %v643_v46, %v3262_v58  ;;  %v654_v33 = vstv %s3312_s19  ;;  %v671_v11 = vstv %s3310_s18  ;;  %s3852_s18 = sld [smem:[#allocation6 + $0x1e]] }
  0xc4   :  { %v655_v52 = vadd.f32 %v3277_v2, %v654_v33  ;;  %v656_v34 = vadd.f32 %v3304_v8, %v654_v33  ;;  %v657_v5 = vadd.f32 %v3307_v13, %v654_v33  ;;  %v658_v30 = vadd.f32 %v3314_v9, %v654_v33  ;;  %s3854_s19 = sld [smem:[#allocation7 + $0x1e]] }
  0xc5   :  { %v659_v18 = vadd.f32 %v3317_v42, %v654_v33  ;;  %v660_v44 = vadd.f32 %v3320_v24, %v654_v33  ;;  %v661_v19 = vadd.f32 %v3323_v15, %v654_v33  ;;  %v662_v6 = vadd.f32 %v3328_v61, %v654_v33 }
  0xc6   :  { %v663_v58 = vand.u32 2147483647, %v655_v52  ;;  %v664_v38 = vand.u32 2147483647, %v656_v34  ;;  %v665_v7 = vand.u32 2147483647, %v657_v5  ;;  %v690_v39 = vstv %s3326_s20 }
  0xc7   :  { %v666_v45 = vand.u32 2147483647, %v658_v30  ;;  %v667_v48 = vand.u32 2147483647, %v659_v18  ;;  %v668_v50 = vand.u32 2147483647, %v660_v44  ;;  %v691_v51 = vadd.f32 %v3277_v2, %v690_v39 }
  0xc8   :  { %v669_v41 = vand.u32 2147483647, %v661_v19  ;;  %v670_v37 = vand.u32 2147483647, %v662_v6  ;;  %v672_v14 = vmul.f32 %v671_v11, %v663_v58  ;;  %v673_v56 = vmul.f32 %v671_v11, %v664_v38  ;;  %s3860_s20 = sld [smem:[#allocation7 + $0x1f]] }
  0xc9   :  { %v674_v62 = vmul.f32 %v671_v11, %v665_v7  ;;  %v675_v57 = vmul.f32 %v671_v11, %v666_v45  ;;  %v676_v63 = vmul.f32 %v671_v11, %v667_v48  ;;  %v677_v60 = vmul.f32 %v671_v11, %v668_v50 }
  0xca   :  { %v678_v35 = vmul.f32 %v671_v11, %v669_v41  ;;  %v679_v32 = vmul.f32 %v671_v11, %v670_v37  ;;  %v3371_v26 = vadd.f32 %v672_v14, %v3281_v28  ;;  %v3374_v31 = vadd.f32 %v673_v56, %v3284_v17 }
  0xcb   :  { %v3377_v59 = vadd.f32 %v674_v62, %v3287_v10  ;;  %v3380_v27 = vadd.f32 %v675_v57, %v3290_v43  ;;  %v3383_v20 = vadd.f32 %v676_v63, %v3293_v40  ;;  %v3386_v23 = vadd.f32 %v677_v60, %v3296_v36 }
  0xcc   :  { %v3389_v54 = vadd.f32 %v678_v35, %v3299_v25  ;;  %v3392_v28 = vadd.f32 %v679_v32, %v3302_v49  ;;  %v692_v17 = vadd.f32 %v3304_v8, %v690_v39  ;;  %v693_v10 = vadd.f32 %v3307_v13, %v690_v39 }
  0xcd   :  { %v694_v43 = vadd.f32 %v3314_v9, %v690_v39  ;;  %v695_v40 = vadd.f32 %v3317_v42, %v690_v39  ;;  %v696_v36 = vadd.f32 %v3320_v24, %v690_v39  ;;  %v697_v25 = vadd.f32 %v3323_v15, %v690_v39 }
  0xce   :  { %v698_v49 = vadd.f32 %v3328_v61, %v690_v39  ;;  %v699_v21 = vand.u32 2147483647, %v691_v51  ;;  %v700_v55 = vand.u32 2147483647, %v692_v17  ;;  %v701_v53 = vand.u32 2147483647, %v693_v10 }
  0xcf   :  { %v702_v12 = vand.u32 2147483647, %v694_v43  ;;  %v703_v46 = vand.u32 2147483647, %v695_v40  ;;  %v704_v33 = vand.u32 2147483647, %v696_v36  ;;  %v707_v11 = vstv %s3366_s21 }
  0xd0   :  { %v705_v52 = vand.u32 2147483647, %v697_v25  ;;  %v706_v34 = vand.u32 2147483647, %v698_v49  ;;  %v708_v5 = vmul.f32 %v707_v11, %v699_v21  ;;  %v709_v30 = vmul.f32 %v707_v11, %v700_v55  ;;  %s3914_s21 = sld [smem:[#allocation6 + $0x1f]] }
  0xd1   :  { %v710_v18 = vmul.f32 %v707_v11, %v701_v53  ;;  %v711_v44 = vmul.f32 %v707_v11, %v702_v12  ;;  %v712_v19 = vmul.f32 %v707_v11, %v703_v46  ;;  %v713_v6 = vmul.f32 %v707_v11, %v704_v33 }
  0xd2   :  { %v714_v58 = vmul.f32 %v707_v11, %v705_v52  ;;  %v715_v38 = vmul.f32 %v707_v11, %v706_v34  ;;  %v3409_v7 = vadd.f32 %v708_v5, %v3333_v29  ;;  %v3412_v39 = vadd.f32 %v709_v30, %v3336_v0 }
  0xd3   :  { %v3415_v45 = vadd.f32 %v710_v18, %v3339_v47  ;;  %v3418_v48 = vadd.f32 %v711_v44, %v3342_v1  ;;  %v3421_v50 = vadd.f32 %v712_v19, %v3345_v16  ;;  %v3424_v51 = vadd.f32 %v713_v6, %v3348_v3 }
  0xd4   :  { %v3427_v41 = vadd.f32 %v714_v58, %v3351_v4  ;;  %v3430_v29 = vadd.f32 %v715_v38, %v3354_v22  ;;  %v726_v0 = vstv %s3398_s23  ;;  %v743_v37 = vstv %s3396_s22  ;;  %s3944_s22 = sld [smem:[#allocation6 + $0x20]] }
  0xd5   :  { %v727_v47 = vadd.f32 %v3277_v2, %v726_v0  ;;  %v728_v1 = vadd.f32 %v3304_v8, %v726_v0  ;;  %v729_v14 = vadd.f32 %v3307_v13, %v726_v0  ;;  %v730_v16 = vadd.f32 %v3314_v9, %v726_v0  ;;  %s3946_s23 = sld [smem:[#allocation7 + $0x20]] }
  0xd6   :  { %v731_v3 = vadd.f32 %v3317_v42, %v726_v0  ;;  %v732_v56 = vadd.f32 %v3320_v24, %v726_v0  ;;  %v733_v4 = vadd.f32 %v3323_v15, %v726_v0  ;;  %v734_v62 = vadd.f32 %v3328_v61, %v726_v0 }
  0xd7   :  { %v735_v22 = vand.u32 2147483647, %v727_v47  ;;  %v736_v57 = vand.u32 2147483647, %v728_v1  ;;  %v737_v63 = vand.u32 2147483647, %v729_v14  ;;  %v762_v60 = vstv %s3404_s24 }
  0xd8   :  { %v738_v35 = vand.u32 2147483647, %v730_v16  ;;  %v739_v32 = vand.u32 2147483647, %v731_v3  ;;  %v740_v17 = vand.u32 2147483647, %v732_v56  ;;  %v763_v10 = vadd.f32 %v3277_v2, %v762_v60 }
  0xd9   :  { %v741_v43 = vand.u32 2147483647, %v733_v4  ;;  %v742_v40 = vand.u32 2147483647, %v734_v62  ;;  %v744_v36 = vmul.f32 %v743_v37, %v735_v22  ;;  %v745_v25 = vmul.f32 %v743_v37, %v736_v57  ;;  %s3952_s24 = sld [smem:[#allocation7 + $0x21]] }
  0xda   :  { %v746_v49 = vmul.f32 %v743_v37, %v737_v63  ;;  %v747_v21 = vmul.f32 %v743_v37, %v738_v35  ;;  %v748_v55 = vmul.f32 %v743_v37, %v739_v32  ;;  %v749_v53 = vmul.f32 %v743_v37, %v740_v17 }
  0xdb   :  { %v750_v12 = vmul.f32 %v743_v37, %v741_v43  ;;  %v751_v46 = vmul.f32 %v743_v37, %v742_v40  ;;  %v3447_v33 = vadd.f32 %v744_v36, %v3371_v26  ;;  %v3450_v11 = vadd.f32 %v745_v25, %v3374_v31 }
  0xdc   :  { %v3453_v52 = vadd.f32 %v746_v49, %v3377_v59  ;;  %v3456_v34 = vadd.f32 %v747_v21, %v3380_v27  ;;  %v3459_v5 = vadd.f32 %v748_v55, %v3383_v20  ;;  %v3462_v30 = vadd.f32 %v749_v53, %v3386_v23 }
  0xdd   :  { %v3465_v18 = vadd.f32 %v750_v12, %v3389_v54  ;;  %v3468_v26 = vadd.f32 %v751_v46, %v3392_v28  ;;  %v764_v31 = vadd.f32 %v3304_v8, %v762_v60  ;;  %v765_v59 = vadd.f32 %v3307_v13, %v762_v60 }
  0xde   :  { %v766_v27 = vadd.f32 %v3314_v9, %v762_v60  ;;  %v767_v20 = vadd.f32 %v3317_v42, %v762_v60  ;;  %v768_v23 = vadd.f32 %v3320_v24, %v762_v60  ;;  %v769_v54 = vadd.f32 %v3323_v15, %v762_v60 }
  0xdf   :  { %v770_v28 = vadd.f32 %v3328_v61, %v762_v60  ;;  %v771_v44 = vand.u32 2147483647, %v763_v10  ;;  %v772_v19 = vand.u32 2147483647, %v764_v31  ;;  %v773_v6 = vand.u32 2147483647, %v765_v59 }
  0xe0   :  { %v774_v58 = vand.u32 2147483647, %v766_v27  ;;  %v775_v38 = vand.u32 2147483647, %v767_v20  ;;  %v776_v0 = vand.u32 2147483647, %v768_v23  ;;  %v779_v37 = vstv %s3442_s25 }
  0xe1   :  { %v777_v47 = vand.u32 2147483647, %v769_v54  ;;  %v778_v1 = vand.u32 2147483647, %v770_v28  ;;  %v780_v14 = vmul.f32 %v779_v37, %v771_v44  ;;  %v781_v16 = vmul.f32 %v779_v37, %v772_v19  ;;  %s3990_s25 = sld [smem:[#allocation6 + $0x21]] }
  0xe2   :  { %v782_v3 = vmul.f32 %v779_v37, %v773_v6  ;;  %v783_v56 = vmul.f32 %v779_v37, %v774_v58  ;;  %v784_v4 = vmul.f32 %v779_v37, %v775_v38  ;;  %v785_v62 = vmul.f32 %v779_v37, %v776_v0 }
  0xe3   :  { %v786_v22 = vmul.f32 %v779_v37, %v777_v47  ;;  %v787_v57 = vmul.f32 %v779_v37, %v778_v1  ;;  %v3485_v63 = vadd.f32 %v780_v14, %v3409_v7  ;;  %v3488_v60 = vadd.f32 %v781_v16, %v3412_v39 }
  0xe4   :  { %v3491_v35 = vadd.f32 %v782_v3, %v3415_v45  ;;  %v3494_v32 = vadd.f32 %v783_v56, %v3418_v48  ;;  %v3497_v17 = vadd.f32 %v784_v4, %v3421_v50  ;;  %v3500_v10 = vadd.f32 %v785_v62, %v3424_v51 }
  0xe5   :  { %v3503_v43 = vadd.f32 %v786_v22, %v3427_v41  ;;  %v3506_v7 = vadd.f32 %v787_v57, %v3430_v29  ;;  %v798_v39 = vstv %s3474_s26  ;;  %v815_v40 = vstv %s3472_s2  ;;  %s4020_s2 = sld [smem:[#allocation6 + $0x22]] }
  0xe6   :  { %v799_v45 = vadd.f32 %v3277_v2, %v798_v39  ;;  %v800_v48 = vadd.f32 %v3304_v8, %v798_v39  ;;  %v801_v36 = vadd.f32 %v3307_v13, %v798_v39  ;;  %v802_v50 = vadd.f32 %v3314_v9, %v798_v39  ;;  %s4022_s26 = sld [smem:[#allocation7 + $0x22]] }
  0xe7   :  { %v803_v51 = vadd.f32 %v3317_v42, %v798_v39  ;;  %v804_v25 = vadd.f32 %v3320_v24, %v798_v39  ;;  %v805_v41 = vadd.f32 %v3323_v15, %v798_v39  ;;  %v806_v49 = vadd.f32 %v3328_v61, %v798_v39 }
  0xe8   :  { %v807_v29 = vand.u32 2147483647, %v799_v45  ;;  %v808_v21 = vand.u32 2147483647, %v800_v48  ;;  %v809_v55 = vand.u32 2147483647, %v801_v36  ;;  %v834_v53 = vstv %s3480_s27 }
  0xe9   :  { %v810_v12 = vand.u32 2147483647, %v802_v50  ;;  %v811_v46 = vand.u32 2147483647, %v803_v51  ;;  %v812_v31 = vand.u32 2147483647, %v804_v25  ;;  %v835_v59 = vadd.f32 %v3277_v2, %v834_v53 }
  0xea   :  { %v813_v27 = vand.u32 2147483647, %v805_v41  ;;  %v814_v20 = vand.u32 2147483647, %v806_v49  ;;  %v816_v23 = vmul.f32 %v815_v40, %v807_v29  ;;  %v817_v54 = vmul.f32 %v815_v40, %v808_v21  ;;  %s4028_s27 = sld [smem:[#allocation7 + $0x23]] }
  0xeb   :  { %v818_v28 = vmul.f32 %v815_v40, %v809_v55  ;;  %v819_v44 = vmul.f32 %v815_v40, %v810_v12  ;;  %v820_v19 = vmul.f32 %v815_v40, %v811_v46  ;;  %v821_v6 = vmul.f32 %v815_v40, %v812_v31 }
  0xec   :  { %v822_v58 = vmul.f32 %v815_v40, %v813_v27  ;;  %v823_v38 = vmul.f32 %v815_v40, %v814_v20  ;;  %v3523_v0 = vadd.f32 %v816_v23, %v3447_v33  ;;  %v3526_v37 = vadd.f32 %v817_v54, %v3450_v11 }
  0xed   :  { %v3529_v47 = vadd.f32 %v818_v28, %v3453_v52  ;;  %v3532_v1 = vadd.f32 %v819_v44, %v3456_v34  ;;  %v3535_v14 = vadd.f32 %v820_v19, %v3459_v5  ;;  %v3538_v16 = vadd.f32 %v821_v6, %v3462_v30 }
  0xee   :  { %v3541_v3 = vadd.f32 %v822_v58, %v3465_v18  ;;  %v3544_v33 = vadd.f32 %v823_v38, %v3468_v26  ;;  %v836_v11 = vadd.f32 %v3304_v8, %v834_v53  ;;  %v837_v52 = vadd.f32 %v3307_v13, %v834_v53 }
  0xef   :  { %v838_v34 = vadd.f32 %v3314_v9, %v834_v53  ;;  %v839_v5 = vadd.f32 %v3317_v42, %v834_v53  ;;  %v840_v30 = vadd.f32 %v3320_v24, %v834_v53  ;;  %v841_v18 = vadd.f32 %v3323_v15, %v834_v53 }
  0xf0   :  { %v842_v26 = vadd.f32 %v3328_v61, %v834_v53  ;;  %v843_v56 = vand.u32 2147483647, %v835_v59  ;;  %v844_v4 = vand.u32 2147483647, %v836_v11  ;;  %v845_v62 = vand.u32 2147483647, %v837_v52 }
  0xf1   :  { %v846_v22 = vand.u32 2147483647, %v838_v34  ;;  %v847_v57 = vand.u32 2147483647, %v839_v5  ;;  %v848_v39 = vand.u32 2147483647, %v840_v30  ;;  %v851_v40 = vstv %s3518_s28 }
  0xf2   :  { %v849_v45 = vand.u32 2147483647, %v841_v18  ;;  %v850_v48 = vand.u32 2147483647, %v842_v26  ;;  %v852_v36 = vmul.f32 %v851_v40, %v843_v56  ;;  %v853_v50 = vmul.f32 %v851_v40, %v844_v4  ;;  %s4066_s28 = sld [smem:[#allocation6 + $0x23]] }
  0xf3   :  { %v854_v51 = vmul.f32 %v851_v40, %v845_v62  ;;  %v855_v25 = vmul.f32 %v851_v40, %v846_v22  ;;  %v856_v41 = vmul.f32 %v851_v40, %v847_v57  ;;  %v857_v49 = vmul.f32 %v851_v40, %v848_v39 }
  0xf4   :  { %v858_v29 = vmul.f32 %v851_v40, %v849_v45  ;;  %v859_v21 = vmul.f32 %v851_v40, %v850_v48  ;;  %v3561_v55 = vadd.f32 %v852_v36, %v3485_v63  ;;  %v3564_v53 = vadd.f32 %v853_v50, %v3488_v60 }
  0xf5   :  { %v3567_v12 = vadd.f32 %v854_v51, %v3491_v35  ;;  %v3570_v46 = vadd.f32 %v855_v25, %v3494_v32  ;;  %v3573_v31 = vadd.f32 %v856_v41, %v3497_v17  ;;  %v3576_v59 = vadd.f32 %v857_v49, %v3500_v10 }
  0xf6   :  { %v3579_v27 = vadd.f32 %v858_v29, %v3503_v43  ;;  %v3582_v63 = vadd.f32 %v859_v21, %v3506_v7  ;;  %v870_v60 = vstv %s3550_s6  ;;  %v887_v20 = vstv %s3548_s5  ;;  %s4096_s5 = sld [smem:[#allocation6 + $0x24]] }
  0xf7   :  { %v871_v35 = vadd.f32 %v3277_v2, %v870_v60  ;;  %v872_v32 = vadd.f32 %v3304_v8, %v870_v60  ;;  %v873_v23 = vadd.f32 %v3307_v13, %v870_v60  ;;  %v874_v17 = vadd.f32 %v3314_v9, %v870_v60  ;;  %s4098_s6 = sld [smem:[#allocation7 + $0x24]] }
  0xf8   :  { %v875_v10 = vadd.f32 %v3317_v42, %v870_v60  ;;  %v876_v54 = vadd.f32 %v3320_v24, %v870_v60  ;;  %v877_v43 = vadd.f32 %v3323_v15, %v870_v60  ;;  %v878_v28 = vadd.f32 %v3328_v61, %v870_v60 }
  0xf9   :  { %v879_v7 = vand.u32 2147483647, %v871_v35  ;;  %v880_v44 = vand.u32 2147483647, %v872_v32  ;;  %v881_v19 = vand.u32 2147483647, %v873_v23  ;;  %v906_v6 = vstv %s3556_s7 }
  0xfa   :  { %v882_v58 = vand.u32 2147483647, %v874_v17  ;;  %v883_v38 = vand.u32 2147483647, %v875_v10  ;;  %v884_v11 = vand.u32 2147483647, %v876_v54  ;;  %v907_v52 = vadd.f32 %v3277_v2, %v906_v6 }
  0xfb   :  { %v885_v34 = vand.u32 2147483647, %v877_v43  ;;  %v886_v5 = vand.u32 2147483647, %v878_v28  ;;  %v888_v30 = vmul.f32 %v887_v20, %v879_v7  ;;  %v889_v18 = vmul.f32 %v887_v20, %v880_v44  ;;  %s4104_s7 = sld [smem:[#allocation7 + $0x25]] }
  0xfc   :  { %v890_v26 = vmul.f32 %v887_v20, %v881_v19  ;;  %v891_v56 = vmul.f32 %v887_v20, %v882_v58  ;;  %v892_v4 = vmul.f32 %v887_v20, %v883_v38  ;;  %v893_v62 = vmul.f32 %v887_v20, %v884_v11 }
  0xfd   :  { %v894_v22 = vmul.f32 %v887_v20, %v885_v34  ;;  %v895_v57 = vmul.f32 %v887_v20, %v886_v5  ;;  %v3599_v39 = vadd.f32 %v888_v30, %v3523_v0  ;;  %v3602_v40 = vadd.f32 %v889_v18, %v3526_v37 }
  0xfe   :  { %v3605_v45 = vadd.f32 %v890_v26, %v3529_v47  ;;  %v3608_v48 = vadd.f32 %v891_v56, %v3532_v1  ;;  %v3611_v36 = vadd.f32 %v892_v4, %v3535_v14  ;;  %v3614_v50 = vadd.f32 %v893_v62, %v3538_v16 }
  0xff   :  { %v3617_v51 = vadd.f32 %v894_v22, %v3541_v3  ;;  %v3620_v0 = vadd.f32 %v895_v57, %v3544_v33  ;;  %v908_v37 = vadd.f32 %v3304_v8, %v906_v6  ;;  %v909_v47 = vadd.f32 %v3307_v13, %v906_v6 }
 0x100   :  { %v910_v1 = vadd.f32 %v3314_v9, %v906_v6  ;;  %v911_v14 = vadd.f32 %v3317_v42, %v906_v6  ;;  %v912_v16 = vadd.f32 %v3320_v24, %v906_v6  ;;  %v913_v3 = vadd.f32 %v3323_v15, %v906_v6 }
 0x101   :  { %v914_v33 = vadd.f32 %v3328_v61, %v906_v6  ;;  %v915_v25 = vand.u32 2147483647, %v907_v52  ;;  %v916_v41 = vand.u32 2147483647, %v908_v37  ;;  %v917_v49 = vand.u32 2147483647, %v909_v47 }
 0x102   :  { %v918_v29 = vand.u32 2147483647, %v910_v1  ;;  %v919_v21 = vand.u32 2147483647, %v911_v14  ;;  %v920_v60 = vand.u32 2147483647, %v912_v16  ;;  %v923_v20 = vstv %s3594_s8 }
 0x103   :  { %v921_v35 = vand.u32 2147483647, %v913_v3  ;;  %v922_v32 = vand.u32 2147483647, %v914_v33  ;;  %v924_v23 = vmul.f32 %v923_v20, %v915_v25  ;;  %v925_v17 = vmul.f32 %v923_v20, %v916_v41  ;;  %s4142_s8 = sld [smem:[#allocation6 + $0x25]] }
 0x104   :  { %v926_v10 = vmul.f32 %v923_v20, %v917_v49  ;;  %v927_v54 = vmul.f32 %v923_v20, %v918_v29  ;;  %v928_v43 = vmul.f32 %v923_v20, %v919_v21  ;;  %v929_v28 = vmul.f32 %v923_v20, %v920_v60 }
 0x105   :  { %v930_v7 = vmul.f32 %v923_v20, %v921_v35  ;;  %v931_v44 = vmul.f32 %v923_v20, %v922_v32  ;;  %v3637_v19 = vadd.f32 %v924_v23, %v3561_v55  ;;  %v3640_v6 = vadd.f32 %v925_v17, %v3564_v53 }
 0x106   :  { %v3643_v58 = vadd.f32 %v926_v10, %v3567_v12  ;;  %v3646_v38 = vadd.f32 %v927_v54, %v3570_v46  ;;  %v3649_v11 = vadd.f32 %v928_v43, %v3573_v31  ;;  %v3652_v52 = vadd.f32 %v929_v28, %v3576_v59 }
 0x107   :  { %v3655_v34 = vadd.f32 %v930_v7, %v3579_v27  ;;  %v3658_v55 = vadd.f32 %v931_v44, %v3582_v63  ;;  %v942_v53 = vstv %s3626_s10  ;;  %v959_v5 = vstv %s3624_s9  ;;  %s4172_s9 = sld [smem:[#allocation6 + $0x26]] }
 0x108   :  { %v943_v12 = vadd.f32 %v3277_v2, %v942_v53  ;;  %v944_v46 = vadd.f32 %v3304_v8, %v942_v53  ;;  %v945_v30 = vadd.f32 %v3307_v13, %v942_v53  ;;  %v946_v31 = vadd.f32 %v3314_v9, %v942_v53  ;;  %s4174_s10 = sld [smem:[#allocation7 + $0x26]] }
 0x109   :  { %v947_v59 = vadd.f32 %v3317_v42, %v942_v53  ;;  %v948_v18 = vadd.f32 %v3320_v24, %v942_v53  ;;  %v949_v27 = vadd.f32 %v3323_v15, %v942_v53  ;;  %v950_v26 = vadd.f32 %v3328_v61, %v942_v53 }
 0x10a   :  { %v951_v63 = vand.u32 2147483647, %v943_v12  ;;  %v952_v56 = vand.u32 2147483647, %v944_v46  ;;  %v953_v4 = vand.u32 2147483647, %v945_v30  ;;  %v978_v62 = vstv %s3632_s11 }
 0x10b   :  { %v954_v22 = vand.u32 2147483647, %v946_v31  ;;  %v955_v57 = vand.u32 2147483647, %v947_v59  ;;  %v956_v37 = vand.u32 2147483647, %v948_v18  ;;  %v979_v47 = vadd.f32 %v3277_v2, %v978_v62 }
 0x10c   :  { %v957_v1 = vand.u32 2147483647, %v949_v27  ;;  %v958_v14 = vand.u32 2147483647, %v950_v26  ;;  %v960_v16 = vmul.f32 %v959_v5, %v951_v63  ;;  %v961_v3 = vmul.f32 %v959_v5, %v952_v56  ;;  %s4180_s11 = sld [smem:[#allocation7 + $0x27]] }
 0x10d   :  { %v962_v33 = vmul.f32 %v959_v5, %v953_v4  ;;  %v963_v25 = vmul.f32 %v959_v5, %v954_v22  ;;  %v964_v41 = vmul.f32 %v959_v5, %v955_v57  ;;  %v965_v49 = vmul.f32 %v959_v5, %v956_v37 }
 0x10e   :  { %v966_v29 = vmul.f32 %v959_v5, %v957_v1  ;;  %v967_v21 = vmul.f32 %v959_v5, %v958_v14  ;;  %v3675_v60 = vadd.f32 %v960_v16, %v3599_v39  ;;  %v3678_v20 = vadd.f32 %v961_v3, %v3602_v40 }
 0x10f   :  { %v3681_v35 = vadd.f32 %v962_v33, %v3605_v45  ;;  %v3684_v32 = vadd.f32 %v963_v25, %v3608_v48  ;;  %v3687_v23 = vadd.f32 %v964_v41, %v3611_v36  ;;  %v3690_v17 = vadd.f32 %v965_v49, %v3614_v50 }
 0x110   :  { %v3693_v10 = vadd.f32 %v966_v29, %v3617_v51  ;;  %v3696_v39 = vadd.f32 %v967_v21, %v3620_v0  ;;  %v980_v40 = vadd.f32 %v3304_v8, %v978_v62  ;;  %v981_v45 = vadd.f32 %v3307_v13, %v978_v62 }
 0x111   :  { %v982_v48 = vadd.f32 %v3314_v9, %v978_v62  ;;  %v983_v36 = vadd.f32 %v3317_v42, %v978_v62  ;;  %v984_v50 = vadd.f32 %v3320_v24, %v978_v62  ;;  %v985_v51 = vadd.f32 %v3323_v15, %v978_v62 }
 0x112   :  { %v986_v0 = vadd.f32 %v3328_v61, %v978_v62  ;;  %v987_v54 = vand.u32 2147483647, %v979_v47  ;;  %v988_v43 = vand.u32 2147483647, %v980_v40  ;;  %v989_v28 = vand.u32 2147483647, %v981_v45 }
 0x113   :  { %v990_v7 = vand.u32 2147483647, %v982_v48  ;;  %v991_v44 = vand.u32 2147483647, %v983_v36  ;;  %v992_v53 = vand.u32 2147483647, %v984_v50  ;;  %v995_v5 = vstv %s3670_s12 }
 0x114   :  { %v993_v12 = vand.u32 2147483647, %v985_v51  ;;  %v994_v46 = vand.u32 2147483647, %v986_v0  ;;  %v996_v30 = vmul.f32 %v995_v5, %v987_v54  ;;  %v997_v31 = vmul.f32 %v995_v5, %v988_v43  ;;  %s4218_s12 = sld [smem:[#allocation6 + $0x27]] }
 0x115   :  { %v998_v59 = vmul.f32 %v995_v5, %v989_v28  ;;  %v999_v18 = vmul.f32 %v995_v5, %v990_v7  ;;  %v1000_v27 = vmul.f32 %v995_v5, %v991_v44  ;;  %v1001_v26 = vmul.f32 %v995_v5, %v992_v53 }
 0x116   :  { %v1002_v63 = vmul.f32 %v995_v5, %v993_v12  ;;  %v1003_v56 = vmul.f32 %v995_v5, %v994_v46  ;;  %v3713_v4 = vadd.f32 %v996_v30, %v3637_v19  ;;  %v3716_v62 = vadd.f32 %v997_v31, %v3640_v6 }
 0x117   :  { %v3719_v22 = vadd.f32 %v998_v59, %v3643_v58  ;;  %v3722_v57 = vadd.f32 %v999_v18, %v3646_v38  ;;  %v3725_v37 = vadd.f32 %v1000_v27, %v3649_v11  ;;  %v3728_v47 = vadd.f32 %v1001_v26, %v3652_v52 }
 0x118   :  { %v3731_v1 = vadd.f32 %v1002_v63, %v3655_v34  ;;  %v3734_v19 = vadd.f32 %v1003_v56, %v3658_v55  ;;  %v1014_v6 = vstv %s3702_s14  ;;  %v1031_v14 = vstv %s3700_s13  ;;  %s4248_s13 = sld [smem:[#allocation6 + $0x28]] }
 0x119   :  { %v1015_v58 = vadd.f32 %v3277_v2, %v1014_v6  ;;  %v1016_v38 = vadd.f32 %v3304_v8, %v1014_v6  ;;  %v1017_v16 = vadd.f32 %v3307_v13, %v1014_v6  ;;  %v1018_v11 = vadd.f32 %v3314_v9, %v1014_v6  ;;  %s4250_s14 = sld [smem:[#allocation7 + $0x28]] }
 0x11a   :  { %v1019_v52 = vadd.f32 %v3317_v42, %v1014_v6  ;;  %v1020_v3 = vadd.f32 %v3320_v24, %v1014_v6  ;;  %v1021_v34 = vadd.f32 %v3323_v15, %v1014_v6  ;;  %v1022_v33 = vadd.f32 %v3328_v61, %v1014_v6 }
 0x11b   :  { %v1023_v55 = vand.u32 2147483647, %v1015_v58  ;;  %v1024_v25 = vand.u32 2147483647, %v1016_v38  ;;  %v1025_v41 = vand.u32 2147483647, %v1017_v16  ;;  %v1050_v49 = vstv %s3708_s0 }
 0x11c   :  { %v1026_v29 = vand.u32 2147483647, %v1018_v11  ;;  %v1027_v21 = vand.u32 2147483647, %v1019_v52  ;;  %v1028_v40 = vand.u32 2147483647, %v1020_v3  ;;  %v1051_v45 = vadd.f32 %v3277_v2, %v1050_v49 }
 0x11d   :  { %v1029_v48 = vand.u32 2147483647, %v1021_v34  ;;  %v1030_v36 = vand.u32 2147483647, %v1022_v33  ;;  %v1032_v50 = vmul.f32 %v1031_v14, %v1023_v55  ;;  %v1033_v51 = vmul.f32 %v1031_v14, %v1024_v25  ;;  %s4256_s0 = sld [smem:[#allocation7 + $0x29]] }
 0x11e   :  { %v1034_v0 = vmul.f32 %v1031_v14, %v1025_v41  ;;  %v1035_v54 = vmul.f32 %v1031_v14, %v1026_v29  ;;  %v1036_v43 = vmul.f32 %v1031_v14, %v1027_v21  ;;  %v1037_v28 = vmul.f32 %v1031_v14, %v1028_v40 }
 0x11f   :  { %v1038_v7 = vmul.f32 %v1031_v14, %v1029_v48  ;;  %v1039_v44 = vmul.f32 %v1031_v14, %v1030_v36  ;;  %v3751_v53 = vadd.f32 %v1032_v50, %v3675_v60  ;;  %v3754_v5 = vadd.f32 %v1033_v51, %v3678_v20 }
 0x120   :  { %v3757_v12 = vadd.f32 %v1034_v0, %v3681_v35  ;;  %v3760_v46 = vadd.f32 %v1035_v54, %v3684_v32  ;;  %v3763_v30 = vadd.f32 %v1036_v43, %v3687_v23  ;;  %v3766_v31 = vadd.f32 %v1037_v28, %v3690_v17 }
 0x121   :  { %v3769_v59 = vadd.f32 %v1038_v7, %v3693_v10  ;;  %v3772_v60 = vadd.f32 %v1039_v44, %v3696_v39  ;;  %v1052_v20 = vadd.f32 %v3304_v8, %v1050_v49  ;;  %v1053_v35 = vadd.f32 %v3307_v13, %v1050_v49 }
 0x122   :  { %v1054_v32 = vadd.f32 %v3314_v9, %v1050_v49  ;;  %v1055_v23 = vadd.f32 %v3317_v42, %v1050_v49  ;;  %v1056_v17 = vadd.f32 %v3320_v24, %v1050_v49  ;;  %v1057_v10 = vadd.f32 %v3323_v15, %v1050_v49 }
 0x123   :  { %v1058_v39 = vadd.f32 %v3328_v61, %v1050_v49  ;;  %v1059_v18 = vand.u32 2147483647, %v1051_v45  ;;  %v1060_v27 = vand.u32 2147483647, %v1052_v20  ;;  %v1061_v26 = vand.u32 2147483647, %v1053_v35 }
 0x124   :  { %v1062_v63 = vand.u32 2147483647, %v1054_v32  ;;  %v1063_v56 = vand.u32 2147483647, %v1055_v23  ;;  %v1064_v6 = vand.u32 2147483647, %v1056_v17  ;;  %v1067_v14 = vstv %s3746_s1 }
 0x125   :  { %v1065_v58 = vand.u32 2147483647, %v1057_v10  ;;  %v1066_v38 = vand.u32 2147483647, %v1058_v39  ;;  %v1068_v16 = vmul.f32 %v1067_v14, %v1059_v18  ;;  %v1069_v11 = vmul.f32 %v1067_v14, %v1060_v27  ;;  %s4294_s1 = sld [smem:[#allocation6 + $0x29]] }
 0x126   :  { %v1070_v52 = vmul.f32 %v1067_v14, %v1061_v26  ;;  %v1071_v3 = vmul.f32 %v1067_v14, %v1062_v63  ;;  %v1072_v34 = vmul.f32 %v1067_v14, %v1063_v56  ;;  %v1073_v33 = vmul.f32 %v1067_v14, %v1064_v6 }
 0x127   :  { %v1074_v55 = vmul.f32 %v1067_v14, %v1065_v58  ;;  %v1075_v25 = vmul.f32 %v1067_v14, %v1066_v38  ;;  %v3789_v41 = vadd.f32 %v1068_v16, %v3713_v4  ;;  %v3792_v49 = vadd.f32 %v1069_v11, %v3716_v62 }
 0x128   :  { %v3795_v29 = vadd.f32 %v1070_v52, %v3719_v22  ;;  %v3798_v21 = vadd.f32 %v1071_v3, %v3722_v57  ;;  %v3801_v40 = vadd.f32 %v1072_v34, %v3725_v37  ;;  %v3804_v45 = vadd.f32 %v1073_v33, %v3728_v47 }
 0x129   :  { %v3807_v48 = vadd.f32 %v1074_v55, %v3731_v1  ;;  %v3810_v4 = vadd.f32 %v1075_v25, %v3734_v19  ;;  %v1086_v62 = vstv %s3778_s15  ;;  %v1103_v36 = vstv %s3776_s3  ;;  %s4324_s3 = sld [smem:[#allocation6 + $0x2a]] }
 0x12a   :  { %v1087_v22 = vadd.f32 %v3277_v2, %v1086_v62  ;;  %v1088_v57 = vadd.f32 %v3304_v8, %v1086_v62  ;;  %v1089_v50 = vadd.f32 %v3307_v13, %v1086_v62  ;;  %v1090_v37 = vadd.f32 %v3314_v9, %v1086_v62  ;;  %s4326_s15 = sld [smem:[#allocation7 + $0x2a]] }
 0x12b   :  { %v1091_v47 = vadd.f32 %v3317_v42, %v1086_v62  ;;  %v1092_v51 = vadd.f32 %v3320_v24, %v1086_v62  ;;  %v1093_v1 = vadd.f32 %v3323_v15, %v1086_v62  ;;  %v1094_v0 = vadd.f32 %v3328_v61, %v1086_v62 }
 0x12c   :  { %v1095_v19 = vand.u32 2147483647, %v1087_v22  ;;  %v1096_v54 = vand.u32 2147483647, %v1088_v57  ;;  %v1097_v43 = vand.u32 2147483647, %v1089_v50  ;;  %v1122_v28 = vstv %s3784_s16 }
 0x12d   :  { %v1098_v7 = vand.u32 2147483647, %v1090_v37  ;;  %v1099_v44 = vand.u32 2147483647, %v1091_v47  ;;  %v1100_v20 = vand.u32 2147483647, %v1092_v51  ;;  %v1123_v35 = vadd.f32 %v3277_v2, %v1122_v28 }
 0x12e   :  { %v1101_v32 = vand.u32 2147483647, %v1093_v1  ;;  %v1102_v23 = vand.u32 2147483647, %v1094_v0  ;;  %v1104_v17 = vmul.f32 %v1103_v36, %v1095_v19  ;;  %v1105_v10 = vmul.f32 %v1103_v36, %v1096_v54  ;;  %s4332_s16 = sld [smem:[#allocation7 + $0x2b]] }
 0x12f   :  { %v1106_v39 = vmul.f32 %v1103_v36, %v1097_v43  ;;  %v1107_v18 = vmul.f32 %v1103_v36, %v1098_v7  ;;  %v1108_v27 = vmul.f32 %v1103_v36, %v1099_v44  ;;  %v1109_v26 = vmul.f32 %v1103_v36, %v1100_v20  ;;  %v3890_v43 = vld [vmem:[#allocation2] sm:$0xff]  ;;  %v3905_v20 = vld [vmem:[#allocation2 + $0x28] sm:$0xff] }
 0x130   :  { %v1110_v63 = vmul.f32 %v1103_v36, %v1101_v32  ;;  %v1111_v56 = vmul.f32 %v1103_v36, %v1102_v23  ;;  %v3827_v6 = vadd.f32 %v1104_v17, %v3751_v53  ;;  %v3830_v14 = vadd.f32 %v1105_v10, %v3754_v5  ;;  %v3902_v7 = vld [vmem:[#allocation2 + $0x20] sm:$0xff]  ;;  %v3908_v32 = vld [vmem:[#allocation2 + $0x30] sm:$0xff]  ;;  %v3911_v17 = vld [vmem:[#allocation2 + $0x38] sm:$0xff] }
 0x131   :  { %v3833_v58 = vadd.f32 %v1106_v39, %v3757_v12  ;;  %v3836_v2 = vadd.f32 %v1107_v18, %v3760_v46  ;;  %v3839_v38 = vadd.f32 %v1108_v27, %v3763_v30  ;;  %v3842_v16 = vadd.f32 %v1109_v26, %v3766_v31 }
 0x132   :  { %v3845_v11 = vadd.f32 %v1110_v63, %v3769_v59  ;;  %v3848_v53 = vadd.f32 %v1111_v56, %v3772_v60  ;;  %v1124_v5 = vadd.f32 %v3304_v8, %v1122_v28  ;;  %v1125_v12 = vadd.f32 %v3307_v13, %v1122_v28 }
 0x133   :  { %v1126_v46 = vadd.f32 %v3314_v9, %v1122_v28  ;;  %v1127_v30 = vadd.f32 %v3317_v42, %v1122_v28  ;;  %v1128_v31 = vadd.f32 %v3320_v24, %v1122_v28  ;;  %v1129_v59 = vadd.f32 %v3323_v15, %v1122_v28 }
 0x134   :  { %v1130_v60 = vadd.f32 %v3328_v61, %v1122_v28  ;;  %v1131_v8 = vand.u32 2147483647, %v1123_v35  ;;  %v1132_v52 = vand.u32 2147483647, %v1124_v5  ;;  %v1133_v3 = vand.u32 2147483647, %v1125_v12 }
 0x135   :  { %v1134_v13 = vand.u32 2147483647, %v1126_v46  ;;  %v1135_v34 = vand.u32 2147483647, %v1127_v30  ;;  %v1136_v33 = vand.u32 2147483647, %v1128_v31  ;;  %v1139_v55 = vstv %s3822_s17 }
 0x136   :  { %v1137_v25 = vand.u32 2147483647, %v1129_v59  ;;  %v1138_v62 = vand.u32 2147483647, %v1130_v60  ;;  %v1140_v9 = vmul.f32 %v1139_v55, %v1131_v8  ;;  %v1141_v42 = vmul.f32 %v1139_v55, %v1132_v52  ;;  %v3896_v28 = vld [vmem:[#allocation2 + $0x10] sm:$0xff]  ;;  %s4370_s17 = sld [smem:[#allocation6 + $0x2b]] }
 0x137   :  { %v1142_v24 = vmul.f32 %v1139_v55, %v1133_v3  ;;  %v1143_v36 = vmul.f32 %v1139_v55, %v1134_v13  ;;  %v1144_v15 = vmul.f32 %v1139_v55, %v1135_v34  ;;  %v1145_v22 = vmul.f32 %v1139_v55, %v1136_v33 }
 0x138   :  { %v1146_v57 = vmul.f32 %v1139_v55, %v1137_v25  ;;  %v1147_v50 = vmul.f32 %v1139_v55, %v1138_v62  ;;  %v3865_v61 = vadd.f32 %v1140_v9, %v3789_v41  ;;  %v3868_v37 = vadd.f32 %v1141_v42, %v3792_v49 }
 0x139   :  { %v3871_v47 = vadd.f32 %v1142_v24, %v3795_v29  ;;  %v3874_v51 = vadd.f32 %v1143_v36, %v3798_v21  ;;  %v3877_v1 = vadd.f32 %v1144_v15, %v3801_v40  ;;  %v3880_v0 = vadd.f32 %v1145_v22, %v3804_v45  ;;  %v3893_v21 = vld [vmem:[#allocation2 + $0x8] sm:$0xff] }
 0x13a   :  { %v3883_v19 = vadd.f32 %v1146_v57, %v3807_v48  ;;  %v3886_v41 = vadd.f32 %v1147_v50, %v3810_v4  ;;  %v1158_v49 = vstv %s3854_s19  ;;  %v1175_v54 = vstv %s3852_s18  ;;  %v3899_v48 = vld [vmem:[#allocation2 + $0x18] sm:$0xff]  ;;  %s4400_s18 = sld [smem:[#allocation6 + $0x2c]] }
 0x13b   :  { %v1159_v29 = vadd.f32 %v3890_v43, %v1158_v49  ;;  %v1160_v40 = vadd.f32 %v3893_v21, %v1158_v49  ;;  %v1161_v45 = vadd.f32 %v3896_v28, %v1158_v49  ;;  %v1162_v4 = vadd.f32 %v3899_v48, %v1158_v49  ;;  %s4402_s19 = sld [smem:[#allocation7 + $0x2c]] }
 0x13c   :  { %v1163_v44 = vadd.f32 %v3902_v7, %v1158_v49  ;;  %v1164_v35 = vadd.f32 %v3905_v20, %v1158_v49  ;;  %v1165_v23 = vadd.f32 %v3908_v32, %v1158_v49  ;;  %v1166_v10 = vadd.f32 %v3911_v17, %v1158_v49 }
 0x13d   :  { %v1167_v39 = vand.u32 2147483647, %v1159_v29  ;;  %v1168_v18 = vand.u32 2147483647, %v1160_v40  ;;  %v1169_v27 = vand.u32 2147483647, %v1161_v45  ;;  %v1194_v26 = vstv %s3860_s20 }
 0x13e   :  { %v1170_v63 = vand.u32 2147483647, %v1162_v4  ;;  %v1171_v56 = vand.u32 2147483647, %v1163_v44  ;;  %v1172_v5 = vand.u32 2147483647, %v1164_v35  ;;  %v1195_v12 = vadd.f32 %v3890_v43, %v1194_v26 }
 0x13f   :  { %v1173_v46 = vand.u32 2147483647, %v1165_v23  ;;  %v1174_v30 = vand.u32 2147483647, %v1166_v10  ;;  %v1176_v31 = vmul.f32 %v1175_v54, %v1167_v39  ;;  %v1177_v59 = vmul.f32 %v1175_v54, %v1168_v18  ;;  %s4408_s20 = sld [smem:[#allocation7 + $0x2d]] }
 0x140   :  { %v1178_v60 = vmul.f32 %v1175_v54, %v1169_v27  ;;  %v1179_v8 = vmul.f32 %v1175_v54, %v1170_v63  ;;  %v1180_v52 = vmul.f32 %v1175_v54, %v1171_v56  ;;  %v1181_v3 = vmul.f32 %v1175_v54, %v1172_v5 }
 0x141   :  { %v1182_v13 = vmul.f32 %v1175_v54, %v1173_v46  ;;  %v1183_v34 = vmul.f32 %v1175_v54, %v1174_v30  ;;  %v3919_v33 = vadd.f32 %v1176_v31, %v3827_v6  ;;  %v3922_v55 = vadd.f32 %v1177_v59, %v3830_v14 }
 0x142   :  { %v3925_v25 = vadd.f32 %v1178_v60, %v3833_v58  ;;  %v3928_v62 = vadd.f32 %v1179_v8, %v3836_v2  ;;  %v3931_v9 = vadd.f32 %v1180_v52, %v3839_v38  ;;  %v3934_v42 = vadd.f32 %v1181_v3, %v3842_v16 }
 0x143   :  { %v3937_v24 = vadd.f32 %v1182_v13, %v3845_v11  ;;  %v3940_v6 = vadd.f32 %v1183_v34, %v3848_v53  ;;  %v1196_v14 = vadd.f32 %v3893_v21, %v1194_v26  ;;  %v1197_v58 = vadd.f32 %v3896_v28, %v1194_v26 }
 0x144   :  { %v1198_v2 = vadd.f32 %v3899_v48, %v1194_v26  ;;  %v1199_v38 = vadd.f32 %v3902_v7, %v1194_v26  ;;  %v1200_v16 = vadd.f32 %v3905_v20, %v1194_v26  ;;  %v1201_v11 = vadd.f32 %v3908_v32, %v1194_v26 }
 0x145   :  { %v1202_v53 = vadd.f32 %v3911_v17, %v1194_v26  ;;  %v1203_v36 = vand.u32 2147483647, %v1195_v12  ;;  %v1204_v15 = vand.u32 2147483647, %v1196_v14  ;;  %v1205_v22 = vand.u32 2147483647, %v1197_v58 }
 0x146   :  { %v1206_v57 = vand.u32 2147483647, %v1198_v2  ;;  %v1207_v50 = vand.u32 2147483647, %v1199_v38  ;;  %v1208_v49 = vand.u32 2147483647, %v1200_v16  ;;  %v1211_v54 = vstv %s3914_s21 }
 0x147   :  { %v1209_v29 = vand.u32 2147483647, %v1201_v11  ;;  %v1210_v40 = vand.u32 2147483647, %v1202_v53  ;;  %v1212_v45 = vmul.f32 %v1211_v54, %v1203_v36  ;;  %v1213_v4 = vmul.f32 %v1211_v54, %v1204_v15  ;;  %s4446_s21 = sld [smem:[#allocation6 + $0x2d]] }
 0x148   :  { %v1214_v44 = vmul.f32 %v1211_v54, %v1205_v22  ;;  %v1215_v35 = vmul.f32 %v1211_v54, %v1206_v57  ;;  %v1216_v23 = vmul.f32 %v1211_v54, %v1207_v50  ;;  %v1217_v10 = vmul.f32 %v1211_v54, %v1208_v49 }
 0x149   :  { %v1218_v39 = vmul.f32 %v1211_v54, %v1209_v29  ;;  %v1219_v18 = vmul.f32 %v1211_v54, %v1210_v40  ;;  %v3957_v27 = vadd.f32 %v1212_v45, %v3865_v61  ;;  %v3960_v26 = vadd.f32 %v1213_v4, %v3868_v37 }
 0x14a   :  { %v3963_v63 = vadd.f32 %v1214_v44, %v3871_v47  ;;  %v3966_v56 = vadd.f32 %v1215_v35, %v3874_v51  ;;  %v3969_v5 = vadd.f32 %v1216_v23, %v3877_v1  ;;  %v3972_v12 = vadd.f32 %v1217_v10, %v3880_v0 }
 0x14b   :  { %v3975_v46 = vadd.f32 %v1218_v39, %v3883_v19  ;;  %v3978_v61 = vadd.f32 %v1219_v18, %v3886_v41  ;;  %v1230_v37 = vstv %s3946_s23  ;;  %v1247_v30 = vstv %s3944_s22  ;;  %s4482_s22 = sld [smem:[#allocation6 + $0x2e]] }
 0x14c   :  { %v1231_v47 = vadd.f32 %v3890_v43, %v1230_v37  ;;  %v1232_v51 = vadd.f32 %v3893_v21, %v1230_v37  ;;  %v1233_v31 = vadd.f32 %v3896_v28, %v1230_v37  ;;  %v1234_v1 = vadd.f32 %v3899_v48, %v1230_v37  ;;  %s4484_s23 = sld [smem:[#allocation7 + $0x2e]] }
 0x14d   :  { %v1235_v0 = vadd.f32 %v3902_v7, %v1230_v37  ;;  %v1236_v59 = vadd.f32 %v3905_v20, %v1230_v37  ;;  %v1237_v19 = vadd.f32 %v3908_v32, %v1230_v37  ;;  %v1238_v60 = vadd.f32 %v3911_v17, %v1230_v37 }
 0x14e   :  { %v1239_v41 = vand.u32 2147483647, %v1231_v47  ;;  %v1240_v8 = vand.u32 2147483647, %v1232_v51  ;;  %v1241_v52 = vand.u32 2147483647, %v1233_v31  ;;  %v1266_v3 = vstv %s3952_s24 }
 0x14f   :  { %v1242_v13 = vand.u32 2147483647, %v1234_v1  ;;  %v1243_v34 = vand.u32 2147483647, %v1235_v0  ;;  %v1244_v14 = vand.u32 2147483647, %v1236_v59  ;;  %v1267_v58 = vadd.f32 %v3890_v43, %v1266_v3 }
 0x150   :  { %v1245_v2 = vand.u32 2147483647, %v1237_v19  ;;  %v1246_v38 = vand.u32 2147483647, %v1238_v60  ;;  %v1248_v16 = vmul.f32 %v1247_v30, %v1239_v41  ;;  %v1249_v11 = vmul.f32 %v1247_v30, %v1240_v8  ;;  %s4498_s24 = sld [smem:[#allocation7 + $0x2f]] }
 0x151   :  { %v1250_v53 = vmul.f32 %v1247_v30, %v1241_v52  ;;  %v1251_v36 = vmul.f32 %v1247_v30, %v1242_v13  ;;  %v1252_v15 = vmul.f32 %v1247_v30, %v1243_v34  ;;  %v1253_v22 = vmul.f32 %v1247_v30, %v1244_v14 }
 0x152   :  { %v1254_v57 = vmul.f32 %v1247_v30, %v1245_v2  ;;  %v1255_v50 = vmul.f32 %v1247_v30, %v1246_v38  ;;  %v3995_v49 = vadd.f32 %v1248_v16, %v3919_v33  ;;  %v3998_v54 = vadd.f32 %v1249_v11, %v3922_v55 }
 0x153   :  { %v4001_v29 = vadd.f32 %v1250_v53, %v3925_v25  ;;  %v4004_v40 = vadd.f32 %v1251_v36, %v3928_v62  ;;  %v4007_v45 = vadd.f32 %v1252_v15, %v3931_v9  ;;  %v4010_v4 = vadd.f32 %v1253_v22, %v3934_v42 }
 0x154   :  { %v4013_v44 = vadd.f32 %v1254_v57, %v3937_v24  ;;  %v4016_v33 = vadd.f32 %v1255_v50, %v3940_v6  ;;  %v1268_v55 = vadd.f32 %v3893_v21, %v1266_v3  ;;  %v1269_v25 = vadd.f32 %v3896_v28, %v1266_v3 }
 0x155   :  { %v1270_v62 = vadd.f32 %v3899_v48, %v1266_v3  ;;  %v1271_v9 = vadd.f32 %v3902_v7, %v1266_v3  ;;  %v1272_v42 = vadd.f32 %v3905_v20, %v1266_v3  ;;  %v1273_v24 = vadd.f32 %v3908_v32, %v1266_v3 }
 0x156   :  { %v1274_v6 = vadd.f32 %v3911_v17, %v1266_v3  ;;  %v1275_v35 = vand.u32 2147483647, %v1267_v58  ;;  %v1276_v23 = vand.u32 2147483647, %v1268_v55  ;;  %v1277_v10 = vand.u32 2147483647, %v1269_v25 }
 0x157   :  { %v1278_v39 = vand.u32 2147483647, %v1270_v62  ;;  %v1279_v18 = vand.u32 2147483647, %v1271_v9  ;;  %v1280_v37 = vand.u32 2147483647, %v1272_v42  ;;  %v1283_v30 = vstv %s3990_s25 }
 0x158   :  { %v1281_v47 = vand.u32 2147483647, %v1273_v24  ;;  %v1282_v51 = vand.u32 2147483647, %v1274_v6  ;;  %v1284_v31 = vmul.f32 %v1283_v30, %v1275_v35  ;;  %v1285_v1 = vmul.f32 %v1283_v30, %v1276_v23  ;;  %s4538_s25 = sld [smem:[#allocation6 + $0x2f]] }
 0x159   :  { %v1286_v0 = vmul.f32 %v1283_v30, %v1277_v10  ;;  %v1287_v59 = vmul.f32 %v1283_v30, %v1278_v39  ;;  %v1288_v19 = vmul.f32 %v1283_v30, %v1279_v18  ;;  %v1289_v60 = vmul.f32 %v1283_v30, %v1280_v37 }
 0x15a   :  { %v1290_v41 = vmul.f32 %v1283_v30, %v1281_v47  ;;  %v1291_v8 = vmul.f32 %v1283_v30, %v1282_v51  ;;  %v4033_v52 = vadd.f32 %v1284_v31, %v3957_v27  ;;  %v4036_v3 = vadd.f32 %v1285_v1, %v3960_v26 }
 0x15b   :  { %v4039_v13 = vadd.f32 %v1286_v0, %v3963_v63  ;;  %v4042_v34 = vadd.f32 %v1287_v59, %v3966_v56  ;;  %v4045_v14 = vadd.f32 %v1288_v19, %v3969_v5  ;;  %v4048_v58 = vadd.f32 %v1289_v60, %v3972_v12 }
 0x15c   :  { %v4051_v2 = vadd.f32 %v1290_v41, %v3975_v46  ;;  %v4054_v27 = vadd.f32 %v1291_v8, %v3978_v61  ;;  %v1302_v26 = vstv %s4022_s26  ;;  %v1319_v38 = vstv %s4020_s2  ;;  %s4568_s2 = sld [smem:[#allocation6 + $0x30]] }
 0x15d   :  { %v1303_v63 = vadd.f32 %v3890_v43, %v1302_v26  ;;  %v1304_v56 = vadd.f32 %v3893_v21, %v1302_v26  ;;  %v1305_v16 = vadd.f32 %v3896_v28, %v1302_v26  ;;  %v1306_v5 = vadd.f32 %v3899_v48, %v1302_v26  ;;  %s4570_s26 = sld [smem:[#allocation7 + $0x30]] }
 0x15e   :  { %v1307_v12 = vadd.f32 %v3902_v7, %v1302_v26  ;;  %v1308_v11 = vadd.f32 %v3905_v20, %v1302_v26  ;;  %v1309_v46 = vadd.f32 %v3908_v32, %v1302_v26  ;;  %v1310_v53 = vadd.f32 %v3911_v17, %v1302_v26 }
 0x15f   :  { %v1311_v61 = vand.u32 2147483647, %v1303_v63  ;;  %v1312_v36 = vand.u32 2147483647, %v1304_v56  ;;  %v1313_v15 = vand.u32 2147483647, %v1305_v16  ;;  %v1338_v22 = vstv %s4028_s27 }
 0x160   :  { %v1314_v57 = vand.u32 2147483647, %v1306_v5  ;;  %v1315_v50 = vand.u32 2147483647, %v1307_v12  ;;  %v1316_v55 = vand.u32 2147483647, %v1308_v11  ;;  %v1339_v25 = vadd.f32 %v3890_v43, %v1338_v22 }
 0x161   :  { %v1317_v62 = vand.u32 2147483647, %v1309_v46  ;;  %v1318_v9 = vand.u32 2147483647, %v1310_v53  ;;  %v1320_v42 = vmul.f32 %v1319_v38, %v1311_v61  ;;  %v1321_v24 = vmul.f32 %v1319_v38, %v1312_v36  ;;  %s4576_s27 = sld [smem:[#allocation7 + $0x31]] }
 0x162   :  { %v1322_v6 = vmul.f32 %v1319_v38, %v1313_v15  ;;  %v1323_v35 = vmul.f32 %v1319_v38, %v1314_v57  ;;  %v1324_v23 = vmul.f32 %v1319_v38, %v1315_v50  ;;  %v1325_v10 = vmul.f32 %v1319_v38, %v1316_v55 }
 0x163   :  { %v1326_v39 = vmul.f32 %v1319_v38, %v1317_v62  ;;  %v1327_v18 = vmul.f32 %v1319_v38, %v1318_v9  ;;  %v4071_v37 = vadd.f32 %v1320_v42, %v3995_v49  ;;  %v4074_v30 = vadd.f32 %v1321_v24, %v3998_v54 }
 0x164   :  { %v4077_v47 = vadd.f32 %v1322_v6, %v4001_v29  ;;  %v4080_v51 = vadd.f32 %v1323_v35, %v4004_v40  ;;  %v4083_v31 = vadd.f32 %v1324_v23, %v4007_v45  ;;  %v4086_v1 = vadd.f32 %v1325_v10, %v4010_v4 }
 0x165   :  { %v4089_v0 = vadd.f32 %v1326_v39, %v4013_v44  ;;  %v4092_v49 = vadd.f32 %v1327_v18, %v4016_v33  ;;  %v1340_v54 = vadd.f32 %v3893_v21, %v1338_v22  ;;  %v1341_v29 = vadd.f32 %v3896_v28, %v1338_v22 }
 0x166   :  { %v1342_v40 = vadd.f32 %v3899_v48, %v1338_v22  ;;  %v1343_v45 = vadd.f32 %v3902_v7, %v1338_v22  ;;  %v1344_v4 = vadd.f32 %v3905_v20, %v1338_v22  ;;  %v1345_v44 = vadd.f32 %v3908_v32, %v1338_v22 }
 0x167   :  { %v1346_v33 = vadd.f32 %v3911_v17, %v1338_v22  ;;  %v1347_v59 = vand.u32 2147483647, %v1339_v25  ;;  %v1348_v19 = vand.u32 2147483647, %v1340_v54  ;;  %v1349_v60 = vand.u32 2147483647, %v1341_v29 }
 0x168   :  { %v1350_v41 = vand.u32 2147483647, %v1342_v40  ;;  %v1351_v8 = vand.u32 2147483647, %v1343_v45  ;;  %v1352_v26 = vand.u32 2147483647, %v1344_v4  ;;  %v1355_v38 = vstv %s4066_s28 }
 0x169   :  { %v1353_v63 = vand.u32 2147483647, %v1345_v44  ;;  %v1354_v56 = vand.u32 2147483647, %v1346_v33  ;;  %v1356_v16 = vmul.f32 %v1355_v38, %v1347_v59  ;;  %v1357_v5 = vmul.f32 %v1355_v38, %v1348_v19  ;;  %s4614_s28 = sld [smem:[#allocation6 + $0x31]] }
 0x16a   :  { %v1358_v12 = vmul.f32 %v1355_v38, %v1349_v60  ;;  %v1359_v11 = vmul.f32 %v1355_v38, %v1350_v41  ;;  %v1360_v46 = vmul.f32 %v1355_v38, %v1351_v8  ;;  %v1361_v53 = vmul.f32 %v1355_v38, %v1352_v26 }
 0x16b   :  { %v1362_v61 = vmul.f32 %v1355_v38, %v1353_v63  ;;  %v1363_v36 = vmul.f32 %v1355_v38, %v1354_v56  ;;  %v4109_v15 = vadd.f32 %v1356_v16, %v4033_v52  ;;  %v4112_v22 = vadd.f32 %v1357_v5, %v4036_v3 }
 0x16c   :  { %v4115_v57 = vadd.f32 %v1358_v12, %v4039_v13  ;;  %v4118_v50 = vadd.f32 %v1359_v11, %v4042_v34  ;;  %v4121_v55 = vadd.f32 %v1360_v46, %v4045_v14  ;;  %v4124_v25 = vadd.f32 %v1361_v53, %v4048_v58 }
 0x16d   :  { %v4127_v62 = vadd.f32 %v1362_v61, %v4051_v2  ;;  %v4130_v52 = vadd.f32 %v1363_v36, %v4054_v27  ;;  %v1374_v3 = vstv %s4098_s6  ;;  %v1391_v9 = vstv %s4096_s5  ;;  %s4644_s5 = sld [smem:[#allocation6 + $0x32]] }
 0x16e   :  { %v1375_v13 = vadd.f32 %v3890_v43, %v1374_v3  ;;  %v1376_v34 = vadd.f32 %v3893_v21, %v1374_v3  ;;  %v1377_v42 = vadd.f32 %v3896_v28, %v1374_v3  ;;  %v1378_v14 = vadd.f32 %v3899_v48, %v1374_v3  ;;  %s4646_s6 = sld [smem:[#allocation7 + $0x32]] }
 0x16f   :  { %v1379_v58 = vadd.f32 %v3902_v7, %v1374_v3  ;;  %v1380_v24 = vadd.f32 %v3905_v20, %v1374_v3  ;;  %v1381_v2 = vadd.f32 %v3908_v32, %v1374_v3  ;;  %v1382_v6 = vadd.f32 %v3911_v17, %v1374_v3 }
 0x170   :  { %v1383_v27 = vand.u32 2147483647, %v1375_v13  ;;  %v1384_v35 = vand.u32 2147483647, %v1376_v34  ;;  %v1385_v23 = vand.u32 2147483647, %v1377_v42  ;;  %v1410_v10 = vstv %s4104_s7 }
 0x171   :  { %v1386_v39 = vand.u32 2147483647, %v1378_v14  ;;  %v1387_v18 = vand.u32 2147483647, %v1379_v58  ;;  %v1388_v54 = vand.u32 2147483647, %v1380_v24  ;;  %v1411_v29 = vadd.f32 %v3890_v43, %v1410_v10 }
 0x172   :  { %v1389_v40 = vand.u32 2147483647, %v1381_v2  ;;  %v1390_v45 = vand.u32 2147483647, %v1382_v6  ;;  %v1392_v4 = vmul.f32 %v1391_v9, %v1383_v27  ;;  %v1393_v44 = vmul.f32 %v1391_v9, %v1384_v35  ;;  %s4652_s7 = sld [smem:[#allocation7 + $0x33]] }
 0x173   :  { %v1394_v33 = vmul.f32 %v1391_v9, %v1385_v23  ;;  %v1395_v59 = vmul.f32 %v1391_v9, %v1386_v39  ;;  %v1396_v19 = vmul.f32 %v1391_v9, %v1387_v18  ;;  %v1397_v60 = vmul.f32 %v1391_v9, %v1388_v54 }
 0x174   :  { %v1398_v41 = vmul.f32 %v1391_v9, %v1389_v40  ;;  %v1399_v8 = vmul.f32 %v1391_v9, %v1390_v45  ;;  %v4147_v26 = vadd.f32 %v1392_v4, %v4071_v37  ;;  %v4150_v38 = vadd.f32 %v1393_v44, %v4074_v30 }
 0x175   :  { %v4153_v63 = vadd.f32 %v1394_v33, %v4077_v47  ;;  %v4156_v56 = vadd.f32 %v1395_v59, %v4080_v51  ;;  %v4159_v16 = vadd.f32 %v1396_v19, %v4083_v31  ;;  %v4162_v5 = vadd.f32 %v1397_v60, %v4086_v1 }
 0x176   :  { %v4165_v12 = vadd.f32 %v1398_v41, %v4089_v0  ;;  %v4168_v37 = vadd.f32 %v1399_v8, %v4092_v49  ;;  %v1412_v30 = vadd.f32 %v3893_v21, %v1410_v10  ;;  %v1413_v47 = vadd.f32 %v3896_v28, %v1410_v10 }
 0x177   :  { %v1414_v51 = vadd.f32 %v3899_v48, %v1410_v10  ;;  %v1415_v31 = vadd.f32 %v3902_v7, %v1410_v10  ;;  %v1416_v1 = vadd.f32 %v3905_v20, %v1410_v10  ;;  %v1417_v0 = vadd.f32 %v3908_v32, %v1410_v10 }
 0x178   :  { %v1418_v49 = vadd.f32 %v3911_v17, %v1410_v10  ;;  %v1419_v11 = vand.u32 2147483647, %v1411_v29  ;;  %v1420_v46 = vand.u32 2147483647, %v1412_v30  ;;  %v1421_v53 = vand.u32 2147483647, %v1413_v47 }
 0x179   :  { %v1422_v61 = vand.u32 2147483647, %v1414_v51  ;;  %v1423_v36 = vand.u32 2147483647, %v1415_v31  ;;  %v1424_v3 = vand.u32 2147483647, %v1416_v1  ;;  %v1427_v9 = vstv %s4142_s8 }
 0x17a   :  { %v1425_v13 = vand.u32 2147483647, %v1417_v0  ;;  %v1426_v34 = vand.u32 2147483647, %v1418_v49  ;;  %v1428_v42 = vmul.f32 %v1427_v9, %v1419_v11  ;;  %v1429_v14 = vmul.f32 %v1427_v9, %v1420_v46  ;;  %s4690_s8 = sld [smem:[#allocation6 + $0x33]] }
 0x17b   :  { %v1430_v58 = vmul.f32 %v1427_v9, %v1421_v53  ;;  %v1431_v24 = vmul.f32 %v1427_v9, %v1422_v61  ;;  %v1432_v2 = vmul.f32 %v1427_v9, %v1423_v36  ;;  %v1433_v6 = vmul.f32 %v1427_v9, %v1424_v3 }
 0x17c   :  { %v1434_v27 = vmul.f32 %v1427_v9, %v1425_v13  ;;  %v1435_v35 = vmul.f32 %v1427_v9, %v1426_v34  ;;  %v4185_v23 = vadd.f32 %v1428_v42, %v4109_v15  ;;  %v4188_v10 = vadd.f32 %v1429_v14, %v4112_v22 }
 0x17d   :  { %v4191_v39 = vadd.f32 %v1430_v58, %v4115_v57  ;;  %v4194_v18 = vadd.f32 %v1431_v24, %v4118_v50  ;;  %v4197_v54 = vadd.f32 %v1432_v2, %v4121_v55  ;;  %v4200_v29 = vadd.f32 %v1433_v6, %v4124_v25 }
 0x17e   :  { %v4203_v40 = vadd.f32 %v1434_v27, %v4127_v62  ;;  %v4206_v15 = vadd.f32 %v1435_v35, %v4130_v52  ;;  %v1446_v22 = vstv %s4174_s10  ;;  %v1463_v45 = vstv %s4172_s9  ;;  %s4720_s9 = sld [smem:[#allocation6 + $0x34]] }
 0x17f   :  { %v1447_v57 = vadd.f32 %v3890_v43, %v1446_v22  ;;  %v1448_v50 = vadd.f32 %v3893_v21, %v1446_v22  ;;  %v1449_v4 = vadd.f32 %v3896_v28, %v1446_v22  ;;  %v1450_v55 = vadd.f32 %v3899_v48, %v1446_v22  ;;  %s4722_s10 = sld [smem:[#allocation7 + $0x34]] }
 0x180   :  { %v1451_v25 = vadd.f32 %v3902_v7, %v1446_v22  ;;  %v1452_v44 = vadd.f32 %v3905_v20, %v1446_v22  ;;  %v1453_v62 = vadd.f32 %v3908_v32, %v1446_v22  ;;  %v1454_v33 = vadd.f32 %v3911_v17, %v1446_v22 }
 0x181   :  { %v1455_v52 = vand.u32 2147483647, %v1447_v57  ;;  %v1456_v59 = vand.u32 2147483647, %v1448_v50  ;;  %v1457_v19 = vand.u32 2147483647, %v1449_v4  ;;  %v1482_v60 = vstv %s4180_s11 }
 0x182   :  { %v1458_v41 = vand.u32 2147483647, %v1450_v55  ;;  %v1459_v8 = vand.u32 2147483647, %v1451_v25  ;;  %v1460_v30 = vand.u32 2147483647, %v1452_v44  ;;  %v1483_v47 = vadd.f32 %v3890_v43, %v1482_v60 }
 0x183   :  { %v1461_v51 = vand.u32 2147483647, %v1453_v62  ;;  %v1462_v31 = vand.u32 2147483647, %v1454_v33  ;;  %v1464_v1 = vmul.f32 %v1463_v45, %v1455_v52  ;;  %v1465_v0 = vmul.f32 %v1463_v45, %v1456_v59  ;;  %s4728_s11 = sld [smem:[#allocation7 + $0x35]] }
 0x184   :  { %v1466_v49 = vmul.f32 %v1463_v45, %v1457_v19  ;;  %v1467_v11 = vmul.f32 %v1463_v45, %v1458_v41  ;;  %v1468_v46 = vmul.f32 %v1463_v45, %v1459_v8  ;;  %v1469_v53 = vmul.f32 %v1463_v45, %v1460_v30 }
 0x185   :  { %v1470_v61 = vmul.f32 %v1463_v45, %v1461_v51  ;;  %v1471_v36 = vmul.f32 %v1463_v45, %v1462_v31  ;;  %v4223_v3 = vadd.f32 %v1464_v1, %v4147_v26  ;;  %v4226_v9 = vadd.f32 %v1465_v0, %v4150_v38 }
 0x186   :  { %v4229_v13 = vadd.f32 %v1466_v49, %v4153_v63  ;;  %v4232_v34 = vadd.f32 %v1467_v11, %v4156_v56  ;;  %v4235_v42 = vadd.f32 %v1468_v46, %v4159_v16  ;;  %v4238_v14 = vadd.f32 %v1469_v53, %v4162_v5 }
 0x187   :  { %v4241_v58 = vadd.f32 %v1470_v61, %v4165_v12  ;;  %v4244_v26 = vadd.f32 %v1471_v36, %v4168_v37  ;;  %v1484_v38 = vadd.f32 %v3893_v21, %v1482_v60  ;;  %v1485_v63 = vadd.f32 %v3896_v28, %v1482_v60 }
 0x188   :  { %v1486_v56 = vadd.f32 %v3899_v48, %v1482_v60  ;;  %v1487_v16 = vadd.f32 %v3902_v7, %v1482_v60  ;;  %v1488_v5 = vadd.f32 %v3905_v20, %v1482_v60  ;;  %v1489_v12 = vadd.f32 %v3908_v32, %v1482_v60 }
 0x189   :  { %v1490_v37 = vadd.f32 %v3911_v17, %v1482_v60  ;;  %v1491_v24 = vand.u32 2147483647, %v1483_v47  ;;  %v1492_v2 = vand.u32 2147483647, %v1484_v38  ;;  %v1493_v6 = vand.u32 2147483647, %v1485_v63 }
 0x18a   :  { %v1494_v27 = vand.u32 2147483647, %v1486_v56  ;;  %v1495_v35 = vand.u32 2147483647, %v1487_v16  ;;  %v1496_v22 = vand.u32 2147483647, %v1488_v5  ;;  %v1499_v45 = vstv %s4218_s12 }
 0x18b   :  { %v1497_v57 = vand.u32 2147483647, %v1489_v12  ;;  %v1498_v50 = vand.u32 2147483647, %v1490_v37  ;;  %v1500_v4 = vmul.f32 %v1499_v45, %v1491_v24  ;;  %v1501_v55 = vmul.f32 %v1499_v45, %v1492_v2  ;;  %s4766_s12 = sld [smem:[#allocation6 + $0x35]] }
 0x18c   :  { %v1502_v25 = vmul.f32 %v1499_v45, %v1493_v6  ;;  %v1503_v44 = vmul.f32 %v1499_v45, %v1494_v27  ;;  %v1504_v62 = vmul.f32 %v1499_v45, %v1495_v35  ;;  %v1505_v33 = vmul.f32 %v1499_v45, %v1496_v22 }
 0x18d   :  { %v1506_v52 = vmul.f32 %v1499_v45, %v1497_v57  ;;  %v1507_v59 = vmul.f32 %v1499_v45, %v1498_v50  ;;  %v4261_v19 = vadd.f32 %v1500_v4, %v4185_v23  ;;  %v4264_v60 = vadd.f32 %v1501_v55, %v4188_v10 }
 0x18e   :  { %v4267_v41 = vadd.f32 %v1502_v25, %v4191_v39  ;;  %v4270_v8 = vadd.f32 %v1503_v44, %v4194_v18  ;;  %v4273_v30 = vadd.f32 %v1504_v62, %v4197_v54  ;;  %v4276_v47 = vadd.f32 %v1505_v33, %v4200_v29 }
 0x18f   :  { %v4279_v51 = vadd.f32 %v1506_v52, %v4203_v40  ;;  %v4282_v23 = vadd.f32 %v1507_v59, %v4206_v15  ;;  %v1518_v10 = vstv %s4250_s14  ;;  %v1535_v31 = vstv %s4248_s13  ;;  %s4796_s13 = sld [smem:[#allocation6 + $0x36]] }
 0x190   :  { %v1519_v39 = vadd.f32 %v3890_v43, %v1518_v10  ;;  %v1520_v18 = vadd.f32 %v3893_v21, %v1518_v10  ;;  %v1521_v1 = vadd.f32 %v3896_v28, %v1518_v10  ;;  %v1522_v54 = vadd.f32 %v3899_v48, %v1518_v10  ;;  %s4798_s14 = sld [smem:[#allocation7 + $0x36]] }
 0x191   :  { %v1523_v29 = vadd.f32 %v3902_v7, %v1518_v10  ;;  %v1524_v0 = vadd.f32 %v3905_v20, %v1518_v10  ;;  %v1525_v40 = vadd.f32 %v3908_v32, %v1518_v10  ;;  %v1526_v49 = vadd.f32 %v3911_v17, %v1518_v10 }
 0x192   :  { %v1527_v15 = vand.u32 2147483647, %v1519_v39  ;;  %v1528_v11 = vand.u32 2147483647, %v1520_v18  ;;  %v1529_v46 = vand.u32 2147483647, %v1521_v1  ;;  %v1554_v53 = vstv %s4256_s0 }
 0x193   :  { %v1530_v61 = vand.u32 2147483647, %v1522_v54  ;;  %v1531_v36 = vand.u32 2147483647, %v1523_v29  ;;  %v1532_v38 = vand.u32 2147483647, %v1524_v0  ;;  %v1555_v63 = vadd.f32 %v3890_v43, %v1554_v53 }
 0x194   :  { %v1533_v56 = vand.u32 2147483647, %v1525_v40  ;;  %v1534_v16 = vand.u32 2147483647, %v1526_v49  ;;  %v1536_v5 = vmul.f32 %v1535_v31, %v1527_v15  ;;  %v1537_v12 = vmul.f32 %v1535_v31, %v1528_v11  ;;  %s4804_s0 = sld [smem:[#allocation7 + $0x37]] }
 0x195   :  { %v1538_v37 = vmul.f32 %v1535_v31, %v1529_v46  ;;  %v1539_v24 = vmul.f32 %v1535_v31, %v1530_v61  ;;  %v1540_v2 = vmul.f32 %v1535_v31, %v1531_v36  ;;  %v1541_v6 = vmul.f32 %v1535_v31, %v1532_v38 }
 0x196   :  { %v1542_v27 = vmul.f32 %v1535_v31, %v1533_v56  ;;  %v1543_v35 = vmul.f32 %v1535_v31, %v1534_v16  ;;  %v4299_v22 = vadd.f32 %v1536_v5, %v4223_v3  ;;  %v4302_v45 = vadd.f32 %v1537_v12, %v4226_v9 }
 0x197   :  { %v4305_v57 = vadd.f32 %v1538_v37, %v4229_v13  ;;  %v4308_v50 = vadd.f32 %v1539_v24, %v4232_v34  ;;  %v4311_v4 = vadd.f32 %v1540_v2, %v4235_v42  ;;  %v4314_v55 = vadd.f32 %v1541_v6, %v4238_v14 }
 0x198   :  { %v4317_v25 = vadd.f32 %v1542_v27, %v4241_v58  ;;  %v4320_v3 = vadd.f32 %v1543_v35, %v4244_v26  ;;  %v1556_v9 = vadd.f32 %v3893_v21, %v1554_v53  ;;  %v1557_v13 = vadd.f32 %v3896_v28, %v1554_v53 }
 0x199   :  { %v1558_v34 = vadd.f32 %v3899_v48, %v1554_v53  ;;  %v1559_v42 = vadd.f32 %v3902_v7, %v1554_v53  ;;  %v1560_v14 = vadd.f32 %v3905_v20, %v1554_v53  ;;  %v1561_v58 = vadd.f32 %v3908_v32, %v1554_v53 }
 0x19a   :  { %v1562_v26 = vadd.f32 %v3911_v17, %v1554_v53  ;;  %v1563_v44 = vand.u32 2147483647, %v1555_v63  ;;  %v1564_v62 = vand.u32 2147483647, %v1556_v9  ;;  %v1565_v33 = vand.u32 2147483647, %v1557_v13 }
 0x19b   :  { %v1566_v52 = vand.u32 2147483647, %v1558_v34  ;;  %v1567_v59 = vand.u32 2147483647, %v1559_v42  ;;  %v1568_v10 = vand.u32 2147483647, %v1560_v14  ;;  %v1571_v31 = vstv %s4294_s1 }
 0x19c   :  { %v1569_v39 = vand.u32 2147483647, %v1561_v58  ;;  %v1570_v18 = vand.u32 2147483647, %v1562_v26  ;;  %v1572_v1 = vmul.f32 %v1571_v31, %v1563_v44  ;;  %v1573_v54 = vmul.f32 %v1571_v31, %v1564_v62  ;;  %s4842_s1 = sld [smem:[#allocation6 + $0x37]] }
 0x19d   :  { %v1574_v29 = vmul.f32 %v1571_v31, %v1565_v33  ;;  %v1575_v0 = vmul.f32 %v1571_v31, %v1566_v52  ;;  %v1576_v40 = vmul.f32 %v1571_v31, %v1567_v59  ;;  %v1577_v49 = vmul.f32 %v1571_v31, %v1568_v10 }
 0x19e   :  { %v1578_v15 = vmul.f32 %v1571_v31, %v1569_v39  ;;  %v1579_v11 = vmul.f32 %v1571_v31, %v1570_v18  ;;  %v4337_v46 = vadd.f32 %v1572_v1, %v4261_v19  ;;  %v4340_v53 = vadd.f32 %v1573_v54, %v4264_v60 }
 0x19f   :  { %v4343_v61 = vadd.f32 %v1574_v29, %v4267_v41  ;;  %v4346_v36 = vadd.f32 %v1575_v0, %v4270_v8  ;;  %v4349_v38 = vadd.f32 %v1576_v40, %v4273_v30  ;;  %v4352_v63 = vadd.f32 %v1577_v49, %v4276_v47 }
 0x1a0   :  { %v4355_v56 = vadd.f32 %v1578_v15, %v4279_v51  ;;  %v4358_v19 = vadd.f32 %v1579_v11, %v4282_v23  ;;  %v1590_v60 = vstv %s4326_s15  ;;  %v1607_v16 = vstv %s4324_s3  ;;  %s4872_s3 = sld [smem:[#allocation6 + $0x38]] }
 0x1a1   :  { %v1591_v41 = vadd.f32 %v3890_v43, %v1590_v60  ;;  %v1592_v8 = vadd.f32 %v3893_v21, %v1590_v60  ;;  %v1593_v5 = vadd.f32 %v3896_v28, %v1590_v60  ;;  %v1594_v30 = vadd.f32 %v3899_v48, %v1590_v60  ;;  %s4874_s15 = sld [smem:[#allocation7 + $0x38]] }
 0x1a2   :  { %v1595_v47 = vadd.f32 %v3902_v7, %v1590_v60  ;;  %v1596_v12 = vadd.f32 %v3905_v20, %v1590_v60  ;;  %v1597_v51 = vadd.f32 %v3908_v32, %v1590_v60  ;;  %v1598_v37 = vadd.f32 %v3911_v17, %v1590_v60 }
 0x1a3   :  { %v1599_v23 = vand.u32 2147483647, %v1591_v41  ;;  %v1600_v24 = vand.u32 2147483647, %v1592_v8  ;;  %v1601_v2 = vand.u32 2147483647, %v1593_v5  ;;  %v1626_v6 = vstv %s4332_s16 }
 0x1a4   :  { %v1602_v27 = vand.u32 2147483647, %v1594_v30  ;;  %v1603_v35 = vand.u32 2147483647, %v1595_v47  ;;  %v1604_v9 = vand.u32 2147483647, %v1596_v12  ;;  %v1627_v13 = vadd.f32 %v3890_v43, %v1626_v6 }
 0x1a5   :  { %v1605_v34 = vand.u32 2147483647, %v1597_v51  ;;  %v1606_v42 = vand.u32 2147483647, %v1598_v37  ;;  %v1608_v14 = vmul.f32 %v1607_v16, %v1599_v23  ;;  %v1609_v58 = vmul.f32 %v1607_v16, %v1600_v24  ;;  %s4880_s16 = sld [smem:[#allocation7 + $0x39]] }
 0x1a6   :  { %v1610_v26 = vmul.f32 %v1607_v16, %v1601_v2  ;;  %v1611_v44 = vmul.f32 %v1607_v16, %v1602_v27  ;;  %v1612_v62 = vmul.f32 %v1607_v16, %v1603_v35  ;;  %v1613_v33 = vmul.f32 %v1607_v16, %v1604_v9 }
 0x1a7   :  { %v1614_v52 = vmul.f32 %v1607_v16, %v1605_v34  ;;  %v1615_v59 = vmul.f32 %v1607_v16, %v1606_v42  ;;  %v4375_v10 = vadd.f32 %v1608_v14, %v4299_v22  ;;  %v4378_v31 = vadd.f32 %v1609_v58, %v4302_v45 }
 0x1a8   :  { %v4381_v39 = vadd.f32 %v1610_v26, %v4305_v57  ;;  %v4384_v18 = vadd.f32 %v1611_v44, %v4308_v50  ;;  %v4387_v1 = vadd.f32 %v1612_v62, %v4311_v4  ;;  %v4390_v54 = vadd.f32 %v1613_v33, %v4314_v55 }
 0x1a9   :  { %v4393_v29 = vadd.f32 %v1614_v52, %v4317_v25  ;;  %v4396_v22 = vadd.f32 %v1615_v59, %v4320_v3  ;;  %v1628_v45 = vadd.f32 %v3893_v21, %v1626_v6  ;;  %v1629_v57 = vadd.f32 %v3896_v28, %v1626_v6 }
 0x1aa   :  { %v1630_v50 = vadd.f32 %v3899_v48, %v1626_v6  ;;  %v1631_v4 = vadd.f32 %v3902_v7, %v1626_v6  ;;  %v1632_v55 = vadd.f32 %v3905_v20, %v1626_v6  ;;  %v1633_v25 = vadd.f32 %v3908_v32, %v1626_v6 }
 0x1ab   :  { %v1634_v3 = vadd.f32 %v3911_v17, %v1626_v6  ;;  %v1635_v0 = vand.u32 2147483647, %v1627_v13  ;;  %v1636_v40 = vand.u32 2147483647, %v1628_v45  ;;  %v1637_v49 = vand.u32 2147483647, %v1629_v57 }
 0x1ac   :  { %v1638_v15 = vand.u32 2147483647, %v1630_v50  ;;  %v1639_v11 = vand.u32 2147483647, %v1631_v4  ;;  %v1640_v60 = vand.u32 2147483647, %v1632_v55  ;;  %v1643_v16 = vstv %s4370_s17 }
 0x1ad   :  { %v1641_v41 = vand.u32 2147483647, %v1633_v25  ;;  %v1642_v8 = vand.u32 2147483647, %v1634_v3  ;;  %v1644_v5 = vmul.f32 %v1643_v16, %v1635_v0  ;;  %v1645_v30 = vmul.f32 %v1643_v16, %v1636_v40  ;;  %s4918_s17 = sld [smem:[#allocation6 + $0x39]] }
 0x1ae   :  { %v1646_v47 = vmul.f32 %v1643_v16, %v1637_v49  ;;  %v1647_v12 = vmul.f32 %v1643_v16, %v1638_v15  ;;  %v1648_v51 = vmul.f32 %v1643_v16, %v1639_v11  ;;  %v1649_v37 = vmul.f32 %v1643_v16, %v1640_v60  ;;  %v4479_v60 = vld [vmem:[#allocation2 + $0x10] sm:$0xff] }
 0x1af   :  { %v1650_v23 = vmul.f32 %v1643_v16, %v1641_v41  ;;  %v1651_v24 = vmul.f32 %v1643_v16, %v1642_v8  ;;  %v4413_v2 = vadd.f32 %v1644_v5, %v4337_v46  ;;  %v4416_v6 = vadd.f32 %v1645_v30, %v4340_v53  ;;  %v4492_v16 = vld [vmem:[#allocation2 + $0x28] sm:$0xff]  ;;  %v4495_v8 = vld [vmem:[#allocation2 + $0x30] sm:$0xff]  ;;  %v4500_v30 = vld [vmem:[#allocation2 + $0x38] sm:$0xff] }
 0x1b0   :  { %v4419_v27 = vadd.f32 %v1646_v47, %v4343_v61  ;;  %v4422_v35 = vadd.f32 %v1647_v12, %v4346_v36  ;;  %v4425_v9 = vadd.f32 %v1648_v51, %v4349_v38  ;;  %v4428_v13 = vadd.f32 %v1649_v37, %v4352_v63 }
 0x1b1   :  { %v4431_v34 = vadd.f32 %v1650_v23, %v4355_v56  ;;  %v4434_v46 = vadd.f32 %v1651_v24, %v4358_v19  ;;  %v1662_v53 = vstv %s4402_s19  ;;  %v1679_v42 = vstv %s4400_s18  ;;  %s4948_s18 = sld [smem:[#allocation6 + $0x3a]] }
 0x1b2   :  { %v1663_v61 = vadd.f32 %v3890_v43, %v1662_v53  ;;  %v1664_v36 = vadd.f32 %v3893_v21, %v1662_v53  ;;  %v1665_v14 = vadd.f32 %v3896_v28, %v1662_v53  ;;  %v1666_v38 = vadd.f32 %v3899_v48, %v1662_v53  ;;  %v4449_v28 = vld [vmem:[#allocation2] sm:$0xff]  ;;  %s4950_s19 = sld [smem:[#allocation7 + $0x3a]] }
 0x1b3   :  { %v1667_v63 = vadd.f32 %v3902_v7, %v1662_v53  ;;  %v1668_v58 = vadd.f32 %v3905_v20, %v1662_v53  ;;  %v1669_v56 = vadd.f32 %v3908_v32, %v1662_v53  ;;  %v1670_v26 = vadd.f32 %v3911_v17, %v1662_v53 }
 0x1b4   :  { %v1671_v19 = vand.u32 2147483647, %v1663_v61  ;;  %v1672_v44 = vand.u32 2147483647, %v1664_v36  ;;  %v1673_v62 = vand.u32 2147483647, %v1665_v14  ;;  %v1698_v43 = vstv %s4408_s20 }
 0x1b5   :  { %v1674_v33 = vand.u32 2147483647, %v1666_v38  ;;  %v1675_v21 = vand.u32 2147483647, %v1667_v63  ;;  %v1676_v52 = vand.u32 2147483647, %v1668_v58  ;;  %v1699_v48 = vadd.f32 %v4449_v28, %v1698_v43 }
 0x1b6   :  { %v1677_v7 = vand.u32 2147483647, %v1669_v56  ;;  %v1678_v59 = vand.u32 2147483647, %v1670_v26  ;;  %v1680_v20 = vmul.f32 %v1679_v42, %v1671_v19  ;;  %v1681_v45 = vmul.f32 %v1679_v42, %v1672_v44  ;;  %s4956_s20 = sld [smem:[#allocation7 + $0x3b]] }
 0x1b7   :  { %v1682_v32 = vmul.f32 %v1679_v42, %v1673_v62  ;;  %v1683_v57 = vmul.f32 %v1679_v42, %v1674_v33  ;;  %v1684_v17 = vmul.f32 %v1679_v42, %v1675_v21  ;;  %v1685_v50 = vmul.f32 %v1679_v42, %v1676_v52 }
 0x1b8   :  { %v1686_v4 = vmul.f32 %v1679_v42, %v1677_v7  ;;  %v1687_v55 = vmul.f32 %v1679_v42, %v1678_v59  ;;  %v4453_v25 = vadd.f32 %v1680_v20, %v4375_v10  ;;  %v4456_v3 = vadd.f32 %v1681_v45, %v4378_v31  ;;  %v4476_v31 = vld [vmem:[#allocation2 + $0x8] sm:$0xff] }
 0x1b9   :  { %v4459_v0 = vadd.f32 %v1682_v32, %v4381_v39  ;;  %v4462_v40 = vadd.f32 %v1683_v57, %v4384_v18  ;;  %v4465_v49 = vadd.f32 %v1684_v17, %v4387_v1  ;;  %v4468_v15 = vadd.f32 %v1685_v50, %v4390_v54  ;;  %v4486_v1 = vld [vmem:[#allocation2 + $0x18] sm:$0xff] }
 0x1ba   :  { %v4471_v11 = vadd.f32 %v1686_v4, %v4393_v29  ;;  %v4474_v10 = vadd.f32 %v1687_v55, %v4396_v22  ;;  %v1700_v39 = vadd.f32 %v4476_v31, %v1698_v43  ;;  %v1701_v18 = vadd.f32 %v4479_v60, %v1698_v43  ;;  %v4489_v29 = vld [vmem:[#allocation2 + $0x20] sm:$0xff] }
 0x1bb   :  { %v1702_v54 = vadd.f32 %v4486_v1, %v1698_v43  ;;  %v1703_v22 = vadd.f32 %v4489_v29, %v1698_v43  ;;  %v1704_v41 = vadd.f32 %v4492_v16, %v1698_v43  ;;  %v1705_v5 = vadd.f32 %v4495_v8, %v1698_v43 }
 0x1bc   :  { %v1706_v47 = vadd.f32 %v4500_v30, %v1698_v43  ;;  %v1707_v12 = vand.u32 2147483647, %v1699_v48  ;;  %v1708_v51 = vand.u32 2147483647, %v1700_v39  ;;  %v1709_v37 = vand.u32 2147483647, %v1701_v18 }
 0x1bd   :  { %v1710_v23 = vand.u32 2147483647, %v1702_v54  ;;  %v1711_v24 = vand.u32 2147483647, %v1703_v22  ;;  %v1712_v53 = vand.u32 2147483647, %v1704_v41  ;;  %v1715_v42 = vstv %s4446_s21 }
 0x1be   :  { %v1713_v61 = vand.u32 2147483647, %v1705_v5  ;;  %v1714_v36 = vand.u32 2147483647, %v1706_v47  ;;  %v1716_v14 = vmul.f32 %v1715_v42, %v1707_v12  ;;  %v1717_v38 = vmul.f32 %v1715_v42, %v1708_v51  ;;  %s4994_s21 = sld [smem:[#allocation6 + $0x3b]] }
 0x1bf   :  { %v1718_v63 = vmul.f32 %v1715_v42, %v1709_v37  ;;  %v1719_v58 = vmul.f32 %v1715_v42, %v1710_v23  ;;  %v1720_v56 = vmul.f32 %v1715_v42, %v1711_v24  ;;  %v1721_v26 = vmul.f32 %v1715_v42, %v1712_v53 }
 0x1c0   :  { %v1722_v19 = vmul.f32 %v1715_v42, %v1713_v61  ;;  %v1723_v44 = vmul.f32 %v1715_v42, %v1714_v36  ;;  %v4505_v62 = vadd.f32 %v1716_v14, %v4413_v2  ;;  %v4508_v43 = vadd.f32 %v1717_v38, %v4416_v6 }
 0x1c1   :  { %v4511_v33 = vadd.f32 %v1718_v63, %v4419_v27  ;;  %v4514_v21 = vadd.f32 %v1719_v58, %v4422_v35  ;;  %v4517_v52 = vadd.f32 %v1720_v56, %v4425_v9  ;;  %v4520_v48 = vadd.f32 %v1721_v26, %v4428_v13 }
 0x1c2   :  { %v4523_v7 = vadd.f32 %v1722_v19, %v4431_v34  ;;  %v4526_v2 = vadd.f32 %v1723_v44, %v4434_v46  ;;  %v1734_v6 = vstv %s4484_s23  ;;  %v1751_v59 = vstv %s4482_s22  ;;  %s5024_s22 = sld [smem:[#allocation6 + $0x3c]] }
 0x1c3   :  { %v1735_v27 = vadd.f32 %v4449_v28, %v1734_v6  ;;  %v1736_v35 = vadd.f32 %v4476_v31, %v1734_v6  ;;  %v1737_v20 = vadd.f32 %v4479_v60, %v1734_v6  ;;  %v1738_v9 = vadd.f32 %v4486_v1, %v1734_v6  ;;  %s5026_s23 = sld [smem:[#allocation7 + $0x3c]] }
 0x1c4   :  { %v1739_v13 = vadd.f32 %v4489_v29, %v1734_v6  ;;  %v1740_v45 = vadd.f32 %v4492_v16, %v1734_v6  ;;  %v1741_v34 = vadd.f32 %v4495_v8, %v1734_v6  ;;  %v1742_v32 = vadd.f32 %v4500_v30, %v1734_v6 }
 0x1c5   :  { %v1743_v46 = vand.u32 2147483647, %v1735_v27  ;;  %v1744_v57 = vand.u32 2147483647, %v1736_v35  ;;  %v1745_v17 = vand.u32 2147483647, %v1737_v20  ;;  %v1770_v50 = vstv %s4498_s24 }
 0x1c6   :  { %v1746_v4 = vand.u32 2147483647, %v1738_v9  ;;  %v1747_v55 = vand.u32 2147483647, %v1739_v13  ;;  %v1748_v39 = vand.u32 2147483647, %v1740_v45  ;;  %v1771_v18 = vadd.f32 %v4449_v28, %v1770_v50 }
 0x1c7   :  { %v1749_v54 = vand.u32 2147483647, %v1741_v34  ;;  %v1750_v22 = vand.u32 2147483647, %v1742_v32  ;;  %v1752_v41 = vmul.f32 %v1751_v59, %v1743_v46  ;;  %v1753_v5 = vmul.f32 %v1751_v59, %v1744_v57  ;;  %s5032_s24 = sld [smem:[#allocation7 + $0x3d]] }
 0x1c8   :  { %v1754_v47 = vmul.f32 %v1751_v59, %v1745_v17  ;;  %v1755_v12 = vmul.f32 %v1751_v59, %v1746_v4  ;;  %v1756_v51 = vmul.f32 %v1751_v59, %v1747_v55  ;;  %v1757_v37 = vmul.f32 %v1751_v59, %v1748_v39 }
 0x1c9   :  { %v1758_v23 = vmul.f32 %v1751_v59, %v1749_v54  ;;  %v1759_v24 = vmul.f32 %v1751_v59, %v1750_v22  ;;  %v4543_v53 = vadd.f32 %v1752_v41, %v4453_v25  ;;  %v4546_v42 = vadd.f32 %v1753_v5, %v4456_v3 }
 0x1ca   :  { %v4549_v61 = vadd.f32 %v1754_v47, %v4459_v0  ;;  %v4552_v36 = vadd.f32 %v1755_v12, %v4462_v40  ;;  %v4555_v14 = vadd.f32 %v1756_v51, %v4465_v49  ;;  %v4558_v38 = vadd.f32 %v1757_v37, %v4468_v15 }
 0x1cb   :  { %v4561_v63 = vadd.f32 %v1758_v23, %v4471_v11  ;;  %v4564_v25 = vadd.f32 %v1759_v24, %v4474_v10  ;;  %v1772_v3 = vadd.f32 %v4476_v31, %v1770_v50  ;;  %v1773_v0 = vadd.f32 %v4479_v60, %v1770_v50 }
 0x1cc   :  { %v1774_v40 = vadd.f32 %v4486_v1, %v1770_v50  ;;  %v1775_v49 = vadd.f32 %v4489_v29, %v1770_v50  ;;  %v1776_v15 = vadd.f32 %v4492_v16, %v1770_v50  ;;  %v1777_v11 = vadd.f32 %v4495_v8, %v1770_v50 }
 0x1cd   :  { %v1778_v10 = vadd.f32 %v4500_v30, %v1770_v50  ;;  %v1779_v58 = vand.u32 2147483647, %v1771_v18  ;;  %v1780_v56 = vand.u32 2147483647, %v1772_v3  ;;  %v1781_v26 = vand.u32 2147483647, %v1773_v0 }
 0x1ce   :  { %v1782_v19 = vand.u32 2147483647, %v1774_v40  ;;  %v1783_v44 = vand.u32 2147483647, %v1775_v49  ;;  %v1784_v6 = vand.u32 2147483647, %v1776_v15  ;;  %v1787_v59 = vstv %s4538_s25 }
 0x1cf   :  { %v1785_v27 = vand.u32 2147483647, %v1777_v11  ;;  %v1786_v35 = vand.u32 2147483647, %v1778_v10  ;;  %v1788_v20 = vmul.f32 %v1787_v59, %v1779_v58  ;;  %v1789_v9 = vmul.f32 %v1787_v59, %v1780_v56  ;;  %s5086_s25 = sld [smem:[#allocation6 + $0x3d]] }
 0x1d0   :  { %v1790_v13 = vmul.f32 %v1787_v59, %v1781_v26  ;;  %v1791_v45 = vmul.f32 %v1787_v59, %v1782_v19  ;;  %v1792_v34 = vmul.f32 %v1787_v59, %v1783_v44  ;;  %v1793_v32 = vmul.f32 %v1787_v59, %v1784_v6 }
 0x1d1   :  { %v1794_v46 = vmul.f32 %v1787_v59, %v1785_v27  ;;  %v1795_v57 = vmul.f32 %v1787_v59, %v1786_v35  ;;  %v4581_v17 = vadd.f32 %v1788_v20, %v4505_v62  ;;  %v4584_v50 = vadd.f32 %v1789_v9, %v4508_v43 }
 0x1d2   :  { %v4587_v4 = vadd.f32 %v1790_v13, %v4511_v33  ;;  %v4590_v55 = vadd.f32 %v1791_v45, %v4514_v21  ;;  %v4593_v39 = vadd.f32 %v1792_v34, %v4517_v52  ;;  %v4596_v18 = vadd.f32 %v1793_v32, %v4520_v48 }
 0x1d3   :  { %v4599_v54 = vadd.f32 %v1794_v46, %v4523_v7  ;;  %v4602_v62 = vadd.f32 %v1795_v57, %v4526_v2  ;;  %v1806_v43 = vstv %s4570_s26  ;;  %v1823_v22 = vstv %s4568_s2  ;;  %s5116_s2 = sld [smem:[#allocation6 + $0x3e]] }
 0x1d4   :  { %v1807_v33 = vadd.f32 %v4449_v28, %v1806_v43  ;;  %v1808_v21 = vadd.f32 %v4476_v31, %v1806_v43  ;;  %v1809_v41 = vadd.f32 %v4479_v60, %v1806_v43  ;;  %v1810_v52 = vadd.f32 %v4486_v1, %v1806_v43  ;;  %s5118_s26 = sld [smem:[#allocation7 + $0x3e]] }
 0x1d5   :  { %v1811_v48 = vadd.f32 %v4489_v29, %v1806_v43  ;;  %v1812_v5 = vadd.f32 %v4492_v16, %v1806_v43  ;;  %v1813_v7 = vadd.f32 %v4495_v8, %v1806_v43  ;;  %v1814_v47 = vadd.f32 %v4500_v30, %v1806_v43 }
 0x1d6   :  { %v1815_v2 = vand.u32 2147483647, %v1807_v33  ;;  %v1816_v12 = vand.u32 2147483647, %v1808_v21  ;;  %v1817_v51 = vand.u32 2147483647, %v1809_v41  ;;  %v1842_v37 = vstv %s4576_s27 }
 0x1d7   :  { %v1818_v23 = vand.u32 2147483647, %v1810_v52  ;;  %v1819_v24 = vand.u32 2147483647, %v1811_v48  ;;  %v1820_v3 = vand.u32 2147483647, %v1812_v5  ;;  %v1843_v0 = vadd.f32 %v4449_v28, %v1842_v37 }
 0x1d8   :  { %v1821_v40 = vand.u32 2147483647, %v1813_v7  ;;  %v1822_v49 = vand.u32 2147483647, %v1814_v47  ;;  %v1824_v15 = vmul.f32 %v1823_v22, %v1815_v2  ;;  %v1825_v11 = vmul.f32 %v1823_v22, %v1816_v12  ;;  %s5124_s27 = sld [smem:[#allocation7 + $0x3f]] }
 0x1d9   :  { %v1826_v10 = vmul.f32 %v1823_v22, %v1817_v51  ;;  %v1827_v58 = vmul.f32 %v1823_v22, %v1818_v23  ;;  %v1828_v56 = vmul.f32 %v1823_v22, %v1819_v24  ;;  %v1829_v26 = vmul.f32 %v1823_v22, %v1820_v3 }
 0x1da   :  { %v1830_v19 = vmul.f32 %v1823_v22, %v1821_v40  ;;  %v1831_v44 = vmul.f32 %v1823_v22, %v1822_v49  ;;  %v4619_v6 = vadd.f32 %v1824_v15, %v4543_v53  ;;  %v4622_v59 = vadd.f32 %v1825_v11, %v4546_v42 }
 0x1db   :  { %v4625_v27 = vadd.f32 %v1826_v10, %v4549_v61  ;;  %v4628_v35 = vadd.f32 %v1827_v58, %v4552_v36  ;;  %v4631_v20 = vadd.f32 %v1828_v56, %v4555_v14  ;;  %v4634_v9 = vadd.f32 %v1829_v26, %v4558_v38 }
 0x1dc   :  { %v4637_v13 = vadd.f32 %v1830_v19, %v4561_v63  ;;  %v4640_v53 = vadd.f32 %v1831_v44, %v4564_v25  ;;  %v1844_v42 = vadd.f32 %v4476_v31, %v1842_v37  ;;  %v1845_v61 = vadd.f32 %v4479_v60, %v1842_v37 }
 0x1dd   :  { %v1846_v36 = vadd.f32 %v4486_v1, %v1842_v37  ;;  %v1847_v14 = vadd.f32 %v4489_v29, %v1842_v37  ;;  %v1848_v38 = vadd.f32 %v4492_v16, %v1842_v37  ;;  %v1849_v63 = vadd.f32 %v4495_v8, %v1842_v37 }
 0x1de   :  { %v1850_v25 = vadd.f32 %v4500_v30, %v1842_v37  ;;  %v1851_v45 = vand.u32 2147483647, %v1843_v0  ;;  %v1852_v34 = vand.u32 2147483647, %v1844_v42  ;;  %v1853_v32 = vand.u32 2147483647, %v1845_v61 }
 0x1df   :  { %v1854_v46 = vand.u32 2147483647, %v1846_v36  ;;  %v1855_v57 = vand.u32 2147483647, %v1847_v14  ;;  %v1856_v43 = vand.u32 2147483647, %v1848_v38  ;;  %v1859_v22 = vstv %s4614_s28 }
 0x1e0   :  { %v1857_v33 = vand.u32 2147483647, %v1849_v63  ;;  %v1858_v21 = vand.u32 2147483647, %v1850_v25  ;;  %v1860_v41 = vmul.f32 %v1859_v22, %v1851_v45  ;;  %v1861_v52 = vmul.f32 %v1859_v22, %v1852_v34  ;;  %s5162_s28 = sld [smem:[#allocation6 + $0x3f]] }
 0x1e1   :  { %v1862_v48 = vmul.f32 %v1859_v22, %v1853_v32  ;;  %v1863_v5 = vmul.f32 %v1859_v22, %v1854_v46  ;;  %v1864_v7 = vmul.f32 %v1859_v22, %v1855_v57  ;;  %v1865_v47 = vmul.f32 %v1859_v22, %v1856_v43 }
 0x1e2   :  { %v1866_v2 = vmul.f32 %v1859_v22, %v1857_v33  ;;  %v1867_v12 = vmul.f32 %v1859_v22, %v1858_v21  ;;  %v4657_v51 = vadd.f32 %v1860_v41, %v4581_v17  ;;  %v4660_v37 = vadd.f32 %v1861_v52, %v4584_v50 }
 0x1e3   :  { %v4663_v23 = vadd.f32 %v1862_v48, %v4587_v4  ;;  %v4666_v24 = vadd.f32 %v1863_v5, %v4590_v55  ;;  %v4669_v3 = vadd.f32 %v1864_v7, %v4593_v39  ;;  %v4672_v0 = vadd.f32 %v1865_v47, %v4596_v18 }
 0x1e4   :  { %v4675_v40 = vadd.f32 %v1866_v2, %v4599_v54  ;;  %v4678_v17 = vadd.f32 %v1867_v12, %v4602_v62  ;;  %v1878_v50 = vstv %s4646_s6  ;;  %v1895_v49 = vstv %s4644_s5  ;;  %s5180_s5 = sld [smem:[#allocation9]]  ;;  %s5182_s6 = sld [smem:[#allocation9 + $0x1]] }
 0x1e5   :  { %v1879_v4 = vadd.f32 %v4449_v28, %v1878_v50  ;;  %v1880_v55 = vadd.f32 %v4476_v31, %v1878_v50  ;;  %v1881_v15 = vadd.f32 %v4479_v60, %v1878_v50  ;;  %v1882_v39 = vadd.f32 %v4486_v1, %v1878_v50 }
 0x1e6   :  { %v1883_v18 = vadd.f32 %v4489_v29, %v1878_v50  ;;  %v1884_v11 = vadd.f32 %v4492_v16, %v1878_v50  ;;  %v1885_v54 = vadd.f32 %v4495_v8, %v1878_v50  ;;  %v1886_v10 = vadd.f32 %v4500_v30, %v1878_v50 }
 0x1e7   :  { %v1887_v62 = vand.u32 2147483647, %v1879_v4  ;;  %v1888_v58 = vand.u32 2147483647, %v1880_v55  ;;  %v1889_v56 = vand.u32 2147483647, %v1881_v15  ;;  %v1914_v26 = vstv %s4652_s7 }
 0x1e8   :  { %v1890_v19 = vand.u32 2147483647, %v1882_v39  ;;  %v1891_v44 = vand.u32 2147483647, %v1883_v18  ;;  %v1892_v42 = vand.u32 2147483647, %v1884_v11  ;;  %v1915_v61 = vadd.f32 %v4449_v28, %v1914_v26 }
 0x1e9   :  { %v1893_v36 = vand.u32 2147483647, %v1885_v54  ;;  %v1894_v14 = vand.u32 2147483647, %v1886_v10  ;;  %v1896_v38 = vmul.f32 %v1895_v49, %v1887_v62  ;;  %v1897_v63 = vmul.f32 %v1895_v49, %v1888_v58  ;;  %s2703_s7 = smov [#allocation10]  }
 0x1ea   :  { %v1898_v25 = vmul.f32 %v1895_v49, %v1889_v56  ;;  %v1899_v45 = vmul.f32 %v1895_v49, %v1890_v19  ;;  %v1900_v34 = vmul.f32 %v1895_v49, %v1891_v44  ;;  %v1901_v32 = vmul.f32 %v1895_v49, %v1892_v42 }
 0x1eb   :  { %v1902_v46 = vmul.f32 %v1895_v49, %v1893_v36  ;;  %v1903_v57 = vmul.f32 %v1895_v49, %v1894_v14  ;;  %v4695_v43 = vadd.f32 %v1896_v38, %v4619_v6  ;;  %v4698_v22 = vadd.f32 %v1897_v63, %v4622_v59 }
 0x1ec   :  { %v4701_v33 = vadd.f32 %v1898_v25, %v4625_v27  ;;  %v4704_v21 = vadd.f32 %v1899_v45, %v4628_v35  ;;  %v4707_v41 = vadd.f32 %v1900_v34, %v4631_v20  ;;  %v4710_v52 = vadd.f32 %v1901_v32, %v4634_v9 }
 0x1ed   :  { %v4713_v48 = vadd.f32 %v1902_v46, %v4637_v13  ;;  %v4716_v6 = vadd.f32 %v1903_v57, %v4640_v53  ;;  %v1916_v59 = vadd.f32 %v4476_v31, %v1914_v26  ;;  %v1917_v27 = vadd.f32 %v4479_v60, %v1914_v26 }
 0x1ee   :  { %v1918_v35 = vadd.f32 %v4486_v1, %v1914_v26  ;;  %v1919_v20 = vadd.f32 %v4489_v29, %v1914_v26  ;;  %v1920_v9 = vadd.f32 %v4492_v16, %v1914_v26  ;;  %v1921_v13 = vadd.f32 %v4495_v8, %v1914_v26 }
 0x1ef   :  { %v1922_v53 = vadd.f32 %v4500_v30, %v1914_v26  ;;  %v1923_v5 = vand.u32 2147483647, %v1915_v61  ;;  %v1924_v7 = vand.u32 2147483647, %v1916_v59  ;;  %v1925_v47 = vand.u32 2147483647, %v1917_v27 }
 0x1f0   :  { %v1926_v2 = vand.u32 2147483647, %v1918_v35  ;;  %v1927_v12 = vand.u32 2147483647, %v1919_v20  ;;  %v1928_v50 = vand.u32 2147483647, %v1920_v9  ;;  %v1931_v49 = vstv %s4690_s8 }
 0x1f1   :  { %v1929_v4 = vand.u32 2147483647, %v1921_v13  ;;  %v1930_v55 = vand.u32 2147483647, %v1922_v53  ;;  %v1932_v15 = vmul.f32 %v1931_v49, %v1923_v5  ;;  %v1933_v39 = vmul.f32 %v1931_v49, %v1924_v7  ;;  %s2429_s8 = sshll.u32 %s2703_s7, 4  ;;  %s2430_s8 = int_to_ptr.vmem [resolvable:$true] %s2429_s8 }
 0x1f2   :  { %v1934_v18 = vmul.f32 %v1931_v49, %v1925_v47  ;;  %v1935_v11 = vmul.f32 %v1931_v49, %v1926_v2  ;;  %v1936_v54 = vmul.f32 %v1931_v49, %v1927_v12  ;;  %v1937_v10 = vmul.f32 %v1931_v49, %v1928_v50  ;;  %p2672_p10 = scmp.lt.s32.totalorder %s2430_s8, %s2430_s8 }
 0x1f3   :  { %v1938_v62 = vmul.f32 %v1931_v49, %v1929_v4  ;;  %v1939_v58 = vmul.f32 %v1931_v49, %v1930_v55  ;;  %v4733_v56 = vadd.f32 %v1932_v15, %v4657_v51  ;;  %v4736_v26 = vadd.f32 %v1933_v39, %v4660_v37 }
 0x1f4   :  { %v4739_v19 = vadd.f32 %v1934_v18, %v4663_v23  ;;  %v4742_v44 = vadd.f32 %v1935_v11, %v4666_v24  ;;  %v4745_v42 = vadd.f32 %v1936_v54, %v4669_v3  ;;  %v4748_v61 = vadd.f32 %v1937_v10, %v4672_v0 }
 0x1f5   :  { %v4751_v36 = vadd.f32 %v1938_v62, %v4675_v40  ;;  %v4754_v51 = vadd.f32 %v1939_v58, %v4678_v17  ;;  %v1950_v37 = vstv %s4722_s10  ;;  %v1967_v14 = vstv %s4720_s9  ;;  %s2667_s9 = scalar_lea.vmem %s2430_s8, 1024 }
 0x1f6   :  { %v1951_v23 = vadd.f32 %v4449_v28, %v1950_v37  ;;  %v1952_v24 = vadd.f32 %v4476_v31, %v1950_v37  ;;  %v1953_v38 = vadd.f32 %v4479_v60, %v1950_v37  ;;  %v1954_v3 = vadd.f32 %v4486_v1, %v1950_v37  ;;  %p2668_p9 = scmp.ne.s32.totalorder %s2430_s8, %s2667_s9  ;;  %p2673_p11 = scmp.lt.s32.totalorder %s2667_s9, %s2667_s9 }
 0x1f7   :  { %v1955_v0 = vadd.f32 %v4489_v29, %v1950_v37  ;;  %v1956_v63 = vadd.f32 %v4492_v16, %v1950_v37  ;;  %v1957_v40 = vadd.f32 %v4495_v8, %v1950_v37  ;;  %v1958_v25 = vadd.f32 %v4500_v30, %v1950_v37 }
 0x1f8   :  { %v1959_v17 = vand.u32 2147483647, %v1951_v23  ;;  %v1960_v45 = vand.u32 2147483647, %v1952_v24  ;;  %v1961_v34 = vand.u32 2147483647, %v1953_v38  ;;  %v1986_v32 = vstv %s4728_s11  ;;  %p2674_p12 = por %p2673_p11, %p2672_p10 }
 0x1f9   :  { %v1962_v46 = vand.u32 2147483647, %v1954_v3  ;;  %v1963_v57 = vand.u32 2147483647, %v1955_v0  ;;  %v1964_v59 = vand.u32 2147483647, %v1956_v63  ;;  %v1987_v27 = vadd.f32 %v4449_v28, %v1986_v32 }
 0x1fa   :  { %v1965_v35 = vand.u32 2147483647, %v1957_v40  ;;  %v1966_v20 = vand.u32 2147483647, %v1958_v25  ;;  %v1968_v9 = vmul.f32 %v1967_v14, %v1959_v17  ;;  %v1969_v13 = vmul.f32 %v1967_v14, %v1960_v45  ;;  %p2675_p13 = pnand %p2674_p12, %p2668_p9 }
 0x1fb   :  { %v1970_v53 = vmul.f32 %v1967_v14, %v1961_v34  ;;  %v1971_v5 = vmul.f32 %v1967_v14, %v1962_v46  ;;  %v1972_v7 = vmul.f32 %v1967_v14, %v1963_v57  ;;  %v1973_v47 = vmul.f32 %v1967_v14, %v1964_v59 }
 0x1fc   :  { %v1974_v2 = vmul.f32 %v1967_v14, %v1965_v35  ;;  %v1975_v12 = vmul.f32 %v1967_v14, %v1966_v20  ;;  %v4771_v50 = vadd.f32 %v1968_v9, %v4695_v43  ;;  %v4774_v49 = vadd.f32 %v1969_v13, %v4698_v22 }
 0x1fd   :  { %v4777_v4 = vadd.f32 %v1970_v53, %v4701_v33  ;;  %v4780_v55 = vadd.f32 %v1971_v5, %v4704_v21  ;;  %v4783_v15 = vadd.f32 %v1972_v7, %v4707_v41  ;;  %v4786_v39 = vadd.f32 %v1973_v47, %v4710_v52 }
 0x1fe   :  { %v4789_v18 = vadd.f32 %v1974_v2, %v4713_v48  ;;  %v4792_v43 = vadd.f32 %v1975_v12, %v4716_v6  ;;  %v1988_v22 = vadd.f32 %v4476_v31, %v1986_v32  ;;  %v1989_v33 = vadd.f32 %v4479_v60, %v1986_v32 }
 0x1ff   :  { %v1990_v21 = vadd.f32 %v4486_v1, %v1986_v32  ;;  %v1991_v41 = vadd.f32 %v4489_v29, %v1986_v32  ;;  %v1992_v52 = vadd.f32 %v4492_v16, %v1986_v32  ;;  %v1993_v48 = vadd.f32 %v4495_v8, %v1986_v32 }
 0x200   :  { %v1994_v6 = vadd.f32 %v4500_v30, %v1986_v32  ;;  %v1995_v11 = vand.u32 2147483647, %v1987_v27  ;;  %v1996_v54 = vand.u32 2147483647, %v1988_v22  ;;  %v1997_v10 = vand.u32 2147483647, %v1989_v33 }
 0x201   :  { %v1998_v62 = vand.u32 2147483647, %v1990_v21  ;;  %v1999_v58 = vand.u32 2147483647, %v1991_v41  ;;  %v2000_v37 = vand.u32 2147483647, %v1992_v52  ;;  %v2003_v14 = vstv %s4766_s12 }
 0x202   :  { %v2001_v23 = vand.u32 2147483647, %v1993_v48  ;;  %v2002_v24 = vand.u32 2147483647, %v1994_v6  ;;  %v2004_v38 = vmul.f32 %v2003_v14, %v1995_v11  ;;  %v2005_v3 = vmul.f32 %v2003_v14, %v1996_v54 }
 0x203   :  { %v2006_v0 = vmul.f32 %v2003_v14, %v1997_v10  ;;  %v2007_v63 = vmul.f32 %v2003_v14, %v1998_v62  ;;  %v2008_v40 = vmul.f32 %v2003_v14, %v1999_v58  ;;  %v2009_v25 = vmul.f32 %v2003_v14, %v2000_v37 }
 0x204   :  { %v2010_v17 = vmul.f32 %v2003_v14, %v2001_v23  ;;  %v2011_v45 = vmul.f32 %v2003_v14, %v2002_v24  ;;  %v4809_v34 = vadd.f32 %v2004_v38, %v4733_v56  ;;  %v4812_v32 = vadd.f32 %v2005_v3, %v4736_v26 }
 0x205   :  { %v4815_v46 = vadd.f32 %v2006_v0, %v4739_v19  ;;  %v4818_v57 = vadd.f32 %v2007_v63, %v4742_v44  ;;  %v4821_v59 = vadd.f32 %v2008_v40, %v4745_v42  ;;  %v4824_v27 = vadd.f32 %v2009_v25, %v4748_v61 }
 0x206   :  { %v4827_v35 = vadd.f32 %v2010_v17, %v4751_v36  ;;  %v4830_v56 = vadd.f32 %v2011_v45, %v4754_v51  ;;  %v2022_v26 = vstv %s4798_s14  ;;  %v2039_v20 = vstv %s4796_s13 }
 0x207   :  { %v2023_v19 = vadd.f32 %v4449_v28, %v2022_v26  ;;  %v2024_v44 = vadd.f32 %v4476_v31, %v2022_v26  ;;  %v2025_v9 = vadd.f32 %v4479_v60, %v2022_v26  ;;  %v2026_v42 = vadd.f32 %v4486_v1, %v2022_v26 }
 0x208   :  { %v2027_v61 = vadd.f32 %v4489_v29, %v2022_v26  ;;  %v2028_v13 = vadd.f32 %v4492_v16, %v2022_v26  ;;  %v2029_v36 = vadd.f32 %v4495_v8, %v2022_v26  ;;  %v2030_v53 = vadd.f32 %v4500_v30, %v2022_v26 }
 0x209   :  { %v2031_v51 = vand.u32 2147483647, %v2023_v19  ;;  %v2032_v5 = vand.u32 2147483647, %v2024_v44  ;;  %v2033_v7 = vand.u32 2147483647, %v2025_v9  ;;  %v2058_v47 = vstv %s4804_s0 }
 0x20a   :  { %v2034_v2 = vand.u32 2147483647, %v2026_v42  ;;  %v2035_v12 = vand.u32 2147483647, %v2027_v61  ;;  %v2036_v22 = vand.u32 2147483647, %v2028_v13  ;;  %v2059_v33 = vadd.f32 %v4449_v28, %v2058_v47 }
 0x20b   :  { %v2037_v21 = vand.u32 2147483647, %v2029_v36  ;;  %v2038_v41 = vand.u32 2147483647, %v2030_v53  ;;  %v2040_v52 = vmul.f32 %v2039_v20, %v2031_v51  ;;  %v2041_v48 = vmul.f32 %v2039_v20, %v2032_v5 }
 0x20c   :  { %v2042_v6 = vmul.f32 %v2039_v20, %v2033_v7  ;;  %v2043_v11 = vmul.f32 %v2039_v20, %v2034_v2  ;;  %v2044_v54 = vmul.f32 %v2039_v20, %v2035_v12  ;;  %v2045_v10 = vmul.f32 %v2039_v20, %v2036_v22 }
 0x20d   :  { %v2046_v62 = vmul.f32 %v2039_v20, %v2037_v21  ;;  %v2047_v58 = vmul.f32 %v2039_v20, %v2038_v41  ;;  %v4847_v37 = vadd.f32 %v2040_v52, %v4771_v50  ;;  %v4850_v14 = vadd.f32 %v2041_v48, %v4774_v49 }
 0x20e   :  { %v4853_v23 = vadd.f32 %v2042_v6, %v4777_v4  ;;  %v4856_v24 = vadd.f32 %v2043_v11, %v4780_v55  ;;  %v4859_v38 = vadd.f32 %v2044_v54, %v4783_v15  ;;  %v4862_v3 = vadd.f32 %v2045_v10, %v4786_v39 }
 0x20f   :  { %v4865_v0 = vadd.f32 %v2046_v62, %v4789_v18  ;;  %v4868_v50 = vadd.f32 %v2047_v58, %v4792_v43  ;;  %v2060_v49 = vadd.f32 %v4476_v31, %v2058_v47  ;;  %v2061_v4 = vadd.f32 %v4479_v60, %v2058_v47 }
 0x210   :  { %v2062_v55 = vadd.f32 %v4486_v1, %v2058_v47  ;;  %v2063_v15 = vadd.f32 %v4489_v29, %v2058_v47  ;;  %v2064_v39 = vadd.f32 %v4492_v16, %v2058_v47  ;;  %v2065_v18 = vadd.f32 %v4495_v8, %v2058_v47 }
 0x211   :  { %v2066_v43 = vadd.f32 %v4500_v30, %v2058_v47  ;;  %v2067_v63 = vand.u32 2147483647, %v2059_v33  ;;  %v2068_v40 = vand.u32 2147483647, %v2060_v49  ;;  %v2069_v25 = vand.u32 2147483647, %v2061_v4 }
 0x212   :  { %v2070_v17 = vand.u32 2147483647, %v2062_v55  ;;  %v2071_v45 = vand.u32 2147483647, %v2063_v15  ;;  %v2072_v26 = vand.u32 2147483647, %v2064_v39  ;;  %v2075_v20 = vstv %s4842_s1 }
 0x213   :  { %v2073_v19 = vand.u32 2147483647, %v2065_v18  ;;  %v2074_v44 = vand.u32 2147483647, %v2066_v43  ;;  %v2076_v9 = vmul.f32 %v2075_v20, %v2067_v63  ;;  %v2077_v42 = vmul.f32 %v2075_v20, %v2068_v40 }
 0x214   :  { %v2078_v61 = vmul.f32 %v2075_v20, %v2069_v25  ;;  %v2079_v13 = vmul.f32 %v2075_v20, %v2070_v17  ;;  %v2080_v36 = vmul.f32 %v2075_v20, %v2071_v45  ;;  %v2081_v53 = vmul.f32 %v2075_v20, %v2072_v26 }
 0x215   :  { %v2082_v51 = vmul.f32 %v2075_v20, %v2073_v19  ;;  %v2083_v5 = vmul.f32 %v2075_v20, %v2074_v44  ;;  %v4885_v7 = vadd.f32 %v2076_v9, %v4809_v34  ;;  %v4888_v47 = vadd.f32 %v2077_v42, %v4812_v32 }
 0x216   :  { %v4891_v2 = vadd.f32 %v2078_v61, %v4815_v46  ;;  %v4894_v12 = vadd.f32 %v2079_v13, %v4818_v57  ;;  %v4897_v22 = vadd.f32 %v2080_v36, %v4821_v59  ;;  %v4900_v33 = vadd.f32 %v2081_v53, %v4824_v27 }
 0x217   :  { %v4903_v21 = vadd.f32 %v2082_v51, %v4827_v35  ;;  %v4906_v34 = vadd.f32 %v2083_v5, %v4830_v56  ;;  %v2094_v32 = vstv %s4874_s15  ;;  %v2111_v41 = vstv %s4872_s3 }
 0x218   :  { %v2095_v46 = vadd.f32 %v4449_v28, %v2094_v32  ;;  %v2096_v57 = vadd.f32 %v4476_v31, %v2094_v32  ;;  %v2097_v52 = vadd.f32 %v4479_v60, %v2094_v32  ;;  %v2098_v59 = vadd.f32 %v4486_v1, %v2094_v32 }
 0x219   :  { %v2099_v27 = vadd.f32 %v4489_v29, %v2094_v32  ;;  %v2100_v48 = vadd.f32 %v4492_v16, %v2094_v32  ;;  %v2101_v35 = vadd.f32 %v4495_v8, %v2094_v32  ;;  %v2102_v6 = vadd.f32 %v4500_v30, %v2094_v32 }
 0x21a   :  { %v2103_v56 = vand.u32 2147483647, %v2095_v46  ;;  %v2104_v11 = vand.u32 2147483647, %v2096_v57  ;;  %v2105_v54 = vand.u32 2147483647, %v2097_v52  ;;  %v2130_v10 = vstv %s4880_s16 }
 0x21b   :  { %v2106_v62 = vand.u32 2147483647, %v2098_v59  ;;  %v2107_v58 = vand.u32 2147483647, %v2099_v27  ;;  %v2108_v49 = vand.u32 2147483647, %v2100_v48  ;;  %v2131_v4 = vadd.f32 %v4449_v28, %v2130_v10 }
 0x21c   :  { %v2109_v55 = vand.u32 2147483647, %v2101_v35  ;;  %v2110_v15 = vand.u32 2147483647, %v2102_v6  ;;  %v2112_v39 = vmul.f32 %v2111_v41, %v2103_v56  ;;  %v2113_v18 = vmul.f32 %v2111_v41, %v2104_v11 }
 0x21d   :  { %v2114_v43 = vmul.f32 %v2111_v41, %v2105_v54  ;;  %v2115_v63 = vmul.f32 %v2111_v41, %v2106_v62  ;;  %v2116_v40 = vmul.f32 %v2111_v41, %v2107_v58  ;;  %v2117_v25 = vmul.f32 %v2111_v41, %v2108_v49 }
 0x21e   :  { %v2118_v17 = vmul.f32 %v2111_v41, %v2109_v55  ;;  %v2119_v45 = vmul.f32 %v2111_v41, %v2110_v15  ;;  %v4923_v26 = vadd.f32 %v2112_v39, %v4847_v37  ;;  %v4926_v20 = vadd.f32 %v2113_v18, %v4850_v14 }
 0x21f   :  { %v4929_v19 = vadd.f32 %v2114_v43, %v4853_v23  ;;  %v4932_v44 = vadd.f32 %v2115_v63, %v4856_v24  ;;  %v4935_v9 = vadd.f32 %v2116_v40, %v4859_v38  ;;  %v4938_v42 = vadd.f32 %v2117_v25, %v4862_v3 }
 0x220   :  { %v4941_v61 = vadd.f32 %v2118_v17, %v4865_v0  ;;  %v4944_v37 = vadd.f32 %v2119_v45, %v4868_v50  ;;  %v2132_v14 = vadd.f32 %v4476_v31, %v2130_v10  ;;  %v2133_v23 = vadd.f32 %v4479_v60, %v2130_v10 }
 0x221   :  { %v2134_v24 = vadd.f32 %v4486_v1, %v2130_v10  ;;  %v2135_v38 = vadd.f32 %v4489_v29, %v2130_v10  ;;  %v2136_v3 = vadd.f32 %v4492_v16, %v2130_v10  ;;  %v2137_v0 = vadd.f32 %v4495_v8, %v2130_v10 }
 0x222   :  { %v2138_v50 = vadd.f32 %v4500_v30, %v2130_v10  ;;  %v2139_v13 = vand.u32 2147483647, %v2131_v4  ;;  %v2140_v36 = vand.u32 2147483647, %v2132_v14  ;;  %v2141_v53 = vand.u32 2147483647, %v2133_v23 }
 0x223   :  { %v2142_v51 = vand.u32 2147483647, %v2134_v24  ;;  %v2143_v5 = vand.u32 2147483647, %v2135_v38  ;;  %v2144_v32 = vand.u32 2147483647, %v2136_v3  ;;  %v2147_v41 = vstv %s4918_s17 }
 0x224   :  { %v2145_v46 = vand.u32 2147483647, %v2137_v0  ;;  %v2146_v57 = vand.u32 2147483647, %v2138_v50  ;;  %v2148_v52 = vmul.f32 %v2147_v41, %v2139_v13  ;;  %v2149_v59 = vmul.f32 %v2147_v41, %v2140_v36 }
 0x225   :  { %v2150_v27 = vmul.f32 %v2147_v41, %v2141_v53  ;;  %v2151_v48 = vmul.f32 %v2147_v41, %v2142_v51  ;;  %v2152_v35 = vmul.f32 %v2147_v41, %v2143_v5  ;;  %v2153_v6 = vmul.f32 %v2147_v41, %v2144_v32 }
 0x226   :  { %v2154_v56 = vmul.f32 %v2147_v41, %v2145_v46  ;;  %v2155_v11 = vmul.f32 %v2147_v41, %v2146_v57  ;;  %v4961_v54 = vadd.f32 %v2148_v52, %v4885_v7  ;;  %v4964_v10 = vadd.f32 %v2149_v59, %v4888_v47 }
 0x227   :  { %v4967_v62 = vadd.f32 %v2150_v27, %v4891_v2  ;;  %v4970_v58 = vadd.f32 %v2151_v48, %v4894_v12  ;;  %v4973_v49 = vadd.f32 %v2152_v35, %v4897_v22  ;;  %v4976_v4 = vadd.f32 %v2153_v6, %v4900_v33 }
 0x228   :  { %v4979_v55 = vadd.f32 %v2154_v56, %v4903_v21  ;;  %v4982_v7 = vadd.f32 %v2155_v11, %v4906_v34  ;;  %v2166_v47 = vstv %s4950_s19  ;;  %v2183_v15 = vstv %s4948_s18 }
 0x229   :  { %v2167_v2 = vadd.f32 %v4449_v28, %v2166_v47  ;;  %v2168_v12 = vadd.f32 %v4476_v31, %v2166_v47  ;;  %v2169_v39 = vadd.f32 %v4479_v60, %v2166_v47  ;;  %v2170_v22 = vadd.f32 %v4486_v1, %v2166_v47 }
 0x22a   :  { %v2171_v33 = vadd.f32 %v4489_v29, %v2166_v47  ;;  %v2172_v18 = vadd.f32 %v4492_v16, %v2166_v47  ;;  %v2173_v21 = vadd.f32 %v4495_v8, %v2166_v47  ;;  %v2174_v43 = vadd.f32 %v4500_v30, %v2166_v47 }
 0x22b   :  { %v2175_v34 = vand.u32 2147483647, %v2167_v2  ;;  %v2176_v63 = vand.u32 2147483647, %v2168_v12  ;;  %v2177_v40 = vand.u32 2147483647, %v2169_v39  ;;  %v2202_v25 = vstv %s4956_s20 }
 0x22c   :  { %v2178_v17 = vand.u32 2147483647, %v2170_v22  ;;  %v2179_v45 = vand.u32 2147483647, %v2171_v33  ;;  %v2180_v14 = vand.u32 2147483647, %v2172_v18  ;;  %v2203_v23 = vadd.f32 %v4449_v28, %v2202_v25 }
 0x22d   :  { %v2181_v24 = vand.u32 2147483647, %v2173_v21  ;;  %v2182_v38 = vand.u32 2147483647, %v2174_v43  ;;  %v2184_v3 = vmul.f32 %v2183_v15, %v2175_v34  ;;  %v2185_v0 = vmul.f32 %v2183_v15, %v2176_v63 }
 0x22e   :  { %v2186_v50 = vmul.f32 %v2183_v15, %v2177_v40  ;;  %v2187_v13 = vmul.f32 %v2183_v15, %v2178_v17  ;;  %v2188_v36 = vmul.f32 %v2183_v15, %v2179_v45  ;;  %v2189_v53 = vmul.f32 %v2183_v15, %v2180_v14  ;;  %v5062_v40 = vld [vmem:[#allocation2] sm:$0xff]  ;;  %v5077_v14 = vld [vmem:[#allocation2 + $0x28] sm:$0xff] }
 0x22f   :  { %v2190_v51 = vmul.f32 %v2183_v15, %v2181_v24  ;;  %v2191_v5 = vmul.f32 %v2183_v15, %v2182_v38  ;;  %v4999_v32 = vadd.f32 %v2184_v3, %v4923_v26  ;;  %v5002_v41 = vadd.f32 %v2185_v0, %v4926_v20  ;;  %v5074_v17 = vld [vmem:[#allocation2 + $0x20] sm:$0xff]  ;;  %v5080_v24 = vld [vmem:[#allocation2 + $0x30] sm:$0xff]  ;;  %v5083_v3 = vld [vmem:[#allocation2 + $0x38] sm:$0xff] }
 0x230   :  { %v5005_v46 = vadd.f32 %v2186_v50, %v4929_v19  ;;  %v5008_v28 = vadd.f32 %v2187_v13, %v4932_v44  ;;  %v5011_v57 = vadd.f32 %v2188_v36, %v4935_v9  ;;  %v5014_v52 = vadd.f32 %v2189_v53, %v4938_v42 }
 0x231   :  { %v5017_v59 = vadd.f32 %v2190_v51, %v4941_v61  ;;  %v5020_v26 = vadd.f32 %v2191_v5, %v4944_v37  ;;  %v2204_v20 = vadd.f32 %v4476_v31, %v2202_v25  ;;  %v2205_v19 = vadd.f32 %v4479_v60, %v2202_v25 }
 0x232   :  { %v2206_v44 = vadd.f32 %v4486_v1, %v2202_v25  ;;  %v2207_v9 = vadd.f32 %v4489_v29, %v2202_v25  ;;  %v2208_v42 = vadd.f32 %v4492_v16, %v2202_v25  ;;  %v2209_v61 = vadd.f32 %v4495_v8, %v2202_v25 }
 0x233   :  { %v2210_v37 = vadd.f32 %v4500_v30, %v2202_v25  ;;  %v2211_v31 = vand.u32 2147483647, %v2203_v23  ;;  %v2212_v27 = vand.u32 2147483647, %v2204_v20  ;;  %v2213_v48 = vand.u32 2147483647, %v2205_v19 }
 0x234   :  { %v2214_v60 = vand.u32 2147483647, %v2206_v44  ;;  %v2215_v35 = vand.u32 2147483647, %v2207_v9  ;;  %v2216_v6 = vand.u32 2147483647, %v2208_v42  ;;  %v2219_v56 = vstv %s4994_s21 }
 0x235   :  { %v2217_v11 = vand.u32 2147483647, %v2209_v61  ;;  %v2218_v47 = vand.u32 2147483647, %v2210_v37  ;;  %v2220_v1 = vmul.f32 %v2219_v56, %v2211_v31  ;;  %v2221_v29 = vmul.f32 %v2219_v56, %v2212_v27  ;;  %v5068_v25 = vld [vmem:[#allocation2 + $0x10] sm:$0xff] }
 0x236   :  { %v2222_v16 = vmul.f32 %v2219_v56, %v2213_v48  ;;  %v2223_v15 = vmul.f32 %v2219_v56, %v2214_v60  ;;  %v2224_v8 = vmul.f32 %v2219_v56, %v2215_v35  ;;  %v2225_v2 = vmul.f32 %v2219_v56, %v2216_v6 }
 0x237   :  { %v2226_v12 = vmul.f32 %v2219_v56, %v2217_v11  ;;  %v2227_v39 = vmul.f32 %v2219_v56, %v2218_v47  ;;  %v5037_v30 = vadd.f32 %v2220_v1, %v4961_v54  ;;  %v5040_v22 = vadd.f32 %v2221_v29, %v4964_v10 }
 0x238   :  { %v5043_v33 = vadd.f32 %v2222_v16, %v4967_v62  ;;  %v5046_v18 = vadd.f32 %v2223_v15, %v4970_v58  ;;  %v5049_v21 = vadd.f32 %v2224_v8, %v4973_v49  ;;  %v5052_v43 = vadd.f32 %v2225_v2, %v4976_v4  ;;  %v5065_v58 = vld [vmem:[#allocation2 + $0x8] sm:$0xff] }
 0x239   :  { %v5055_v34 = vadd.f32 %v2226_v12, %v4979_v55  ;;  %v5058_v54 = vadd.f32 %v2227_v39, %v4982_v7  ;;  %v2238_v10 = vstv %s5026_s23  ;;  %v2255_v63 = vstv %s5024_s22  ;;  %v5071_v55 = vld [vmem:[#allocation2 + $0x18] sm:$0xff] }
 0x23a   :  { %v2239_v62 = vadd.f32 %v5062_v40, %v2238_v10  ;;  %v2240_v49 = vadd.f32 %v5065_v58, %v2238_v10  ;;  %v2241_v4 = vadd.f32 %v5068_v25, %v2238_v10  ;;  %v2242_v7 = vadd.f32 %v5071_v55, %v2238_v10 }
 0x23b   :  { %v2243_v45 = vadd.f32 %v5074_v17, %v2238_v10  ;;  %v2244_v23 = vadd.f32 %v5077_v14, %v2238_v10  ;;  %v2245_v38 = vadd.f32 %v5080_v24, %v2238_v10  ;;  %v2246_v0 = vadd.f32 %v5083_v3, %v2238_v10 }
 0x23c   :  { %v2247_v50 = vand.u32 2147483647, %v2239_v62  ;;  %v2248_v13 = vand.u32 2147483647, %v2240_v49  ;;  %v2249_v36 = vand.u32 2147483647, %v2241_v4  ;;  %v2274_v53 = vstv %s5032_s24 }
 0x23d   :  { %v2250_v51 = vand.u32 2147483647, %v2242_v7  ;;  %v2251_v5 = vand.u32 2147483647, %v2243_v45  ;;  %v2252_v20 = vand.u32 2147483647, %v2244_v23  ;;  %v2275_v19 = vadd.f32 %v5062_v40, %v2274_v53 }
 0x23e   :  { %v2253_v44 = vand.u32 2147483647, %v2245_v38  ;;  %v2254_v9 = vand.u32 2147483647, %v2246_v0  ;;  %v2256_v42 = vmul.f32 %v2255_v63, %v2247_v50  ;;  %v2257_v61 = vmul.f32 %v2255_v63, %v2248_v13 }
 0x23f   :  { %v2258_v37 = vmul.f32 %v2255_v63, %v2249_v36  ;;  %v2259_v31 = vmul.f32 %v2255_v63, %v2250_v51  ;;  %v2260_v27 = vmul.f32 %v2255_v63, %v2251_v5  ;;  %v2261_v48 = vmul.f32 %v2255_v63, %v2252_v20 }
 0x240   :  { %v2262_v60 = vmul.f32 %v2255_v63, %v2253_v44  ;;  %v2263_v35 = vmul.f32 %v2255_v63, %v2254_v9  ;;  %v5091_v6 = vadd.f32 %v2256_v42, %v4999_v32  ;;  %v5094_v56 = vadd.f32 %v2257_v61, %v5002_v41 }
 0x241   :  { %v5097_v11 = vadd.f32 %v2258_v37, %v5005_v46  ;;  %v5100_v47 = vadd.f32 %v2259_v31, %v5008_v28  ;;  %v5103_v1 = vadd.f32 %v2260_v27, %v5011_v57  ;;  %v5106_v29 = vadd.f32 %v2261_v48, %v5014_v52 }
 0x242   :  { %v5109_v16 = vadd.f32 %v2262_v60, %v5017_v59  ;;  %v5112_v32 = vadd.f32 %v2263_v35, %v5020_v26  ;;  %v2276_v41 = vadd.f32 %v5065_v58, %v2274_v53  ;;  %v2277_v46 = vadd.f32 %v5068_v25, %v2274_v53 }
 0x243   :  { %v2278_v28 = vadd.f32 %v5071_v55, %v2274_v53  ;;  %v2279_v57 = vadd.f32 %v5074_v17, %v2274_v53  ;;  %v2280_v52 = vadd.f32 %v5077_v14, %v2274_v53  ;;  %v2281_v59 = vadd.f32 %v5080_v24, %v2274_v53 }
 0x244   :  { %v2282_v26 = vadd.f32 %v5083_v3, %v2274_v53  ;;  %v2283_v15 = vand.u32 2147483647, %v2275_v19  ;;  %v2284_v8 = vand.u32 2147483647, %v2276_v41  ;;  %v2285_v2 = vand.u32 2147483647, %v2277_v46 }
 0x245   :  { %v2286_v12 = vand.u32 2147483647, %v2278_v28  ;;  %v2287_v39 = vand.u32 2147483647, %v2279_v57  ;;  %v2288_v10 = vand.u32 2147483647, %v2280_v52  ;;  %v2291_v63 = vstv %s5086_s25 }
 0x246   :  { %v2289_v62 = vand.u32 2147483647, %v2281_v59  ;;  %v2290_v49 = vand.u32 2147483647, %v2282_v26  ;;  %v2292_v4 = vmul.f32 %v2291_v63, %v2283_v15  ;;  %v2293_v7 = vmul.f32 %v2291_v63, %v2284_v8 }
 0x247   :  { %v2294_v45 = vmul.f32 %v2291_v63, %v2285_v2  ;;  %v2295_v23 = vmul.f32 %v2291_v63, %v2286_v12  ;;  %v2296_v38 = vmul.f32 %v2291_v63, %v2287_v39  ;;  %v2297_v0 = vmul.f32 %v2291_v63, %v2288_v10 }
 0x248   :  { %v2298_v50 = vmul.f32 %v2291_v63, %v2289_v62  ;;  %v2299_v13 = vmul.f32 %v2291_v63, %v2290_v49  ;;  %v5129_v36 = vadd.f32 %v2292_v4, %v5037_v30  ;;  %v5132_v53 = vadd.f32 %v2293_v7, %v5040_v22 }
 0x249   :  { %v5135_v51 = vadd.f32 %v2294_v45, %v5043_v33  ;;  %v5138_v5 = vadd.f32 %v2295_v23, %v5046_v18  ;;  %v5141_v20 = vadd.f32 %v2296_v38, %v5049_v21  ;;  %v5144_v19 = vadd.f32 %v2297_v0, %v5052_v43 }
 0x24a   :  { %v5147_v44 = vadd.f32 %v2298_v50, %v5055_v34  ;;  %v5150_v30 = vadd.f32 %v2299_v13, %v5058_v54  ;;  %v2310_v22 = vstv %s5118_s26  ;;  %v2327_v9 = vstv %s5116_s2 }
 0x24b   :  { %v2311_v33 = vadd.f32 %v5062_v40, %v2310_v22  ;;  %v2312_v18 = vadd.f32 %v5065_v58, %v2310_v22  ;;  %v2313_v42 = vadd.f32 %v5068_v25, %v2310_v22  ;;  %v2314_v21 = vadd.f32 %v5071_v55, %v2310_v22 }
 0x24c   :  { %v2315_v43 = vadd.f32 %v5074_v17, %v2310_v22  ;;  %v2316_v61 = vadd.f32 %v5077_v14, %v2310_v22  ;;  %v2317_v34 = vadd.f32 %v5080_v24, %v2310_v22  ;;  %v2318_v37 = vadd.f32 %v5083_v3, %v2310_v22 }
 0x24d   :  { %v2319_v54 = vand.u32 2147483647, %v2311_v33  ;;  %v2320_v31 = vand.u32 2147483647, %v2312_v18  ;;  %v2321_v27 = vand.u32 2147483647, %v2313_v42  ;;  %v2346_v48 = vstv %s5124_s27 }
 0x24e   :  { %v2322_v60 = vand.u32 2147483647, %v2314_v21  ;;  %v2323_v35 = vand.u32 2147483647, %v2315_v43  ;;  %v2324_v41 = vand.u32 2147483647, %v2316_v61  ;;  %v2347_v46 = vadd.f32 %v5062_v40, %v2346_v48 }
 0x24f   :  { %v2325_v28 = vand.u32 2147483647, %v2317_v34  ;;  %v2326_v57 = vand.u32 2147483647, %v2318_v37  ;;  %v2328_v52 = vmul.f32 %v2327_v9, %v2319_v54  ;;  %v2329_v59 = vmul.f32 %v2327_v9, %v2320_v31 }
 0x250   :  { %v2330_v26 = vmul.f32 %v2327_v9, %v2321_v27  ;;  %v2331_v15 = vmul.f32 %v2327_v9, %v2322_v60  ;;  %v2332_v8 = vmul.f32 %v2327_v9, %v2323_v35  ;;  %v2333_v2 = vmul.f32 %v2327_v9, %v2324_v41 }
 0x251   :  { %v2334_v12 = vmul.f32 %v2327_v9, %v2325_v28  ;;  %v2335_v39 = vmul.f32 %v2327_v9, %v2326_v57  ;;  %v2336_v10 = vadd.f32 %v2328_v52, %v5091_v6  ;;  %v2337_v63 = vadd.f32 %v2329_v59, %v5094_v56 }
 0x252   :  { %v2338_v62 = vadd.f32 %v2330_v26, %v5097_v11  ;;  %v2339_v49 = vadd.f32 %v2331_v15, %v5100_v47  ;;  %v2340_v4 = vadd.f32 %v2332_v8, %v5103_v1  ;;  %v2341_v7 = vadd.f32 %v2333_v2, %v5106_v29 }
 0x253   :  { %v2342_v45 = vadd.f32 %v2334_v12, %v5109_v16  ;;  %v2343_v23 = vadd.f32 %v2335_v39, %v5112_v32  ;;  %v2348_v38 = vadd.f32 %v5065_v58, %v2346_v48  ;;  %v2349_v0 = vadd.f32 %v5068_v25, %v2346_v48 }
 0x254   :  { %v2350_v6 = vadd.f32 %v5071_v55, %v2346_v48  ;;  %v2351_v56 = vadd.f32 %v5074_v17, %v2346_v48  ;;  %v2352_v11 = vadd.f32 %v5077_v14, %v2346_v48  ;;  %v2353_v47 = vadd.f32 %v5080_v24, %v2346_v48 }
 0x255   :  { %v2354_v1 = vadd.f32 %v5083_v3, %v2346_v48  ;;  %v2355_v29 = vand.u32 2147483647, %v2347_v46  ;;  %v2356_v16 = vand.u32 2147483647, %v2348_v38  ;;  %v2357_v32 = vand.u32 2147483647, %v2349_v0 }
 0x256   :  { %v2358_v50 = vand.u32 2147483647, %v2350_v6  ;;  %v2359_v13 = vand.u32 2147483647, %v2351_v56  ;;  %v2360_v22 = vand.u32 2147483647, %v2352_v11  ;;  %v2363_v9 = vstv %s5162_s28 }
 0x257   :  { %v2361_v33 = vand.u32 2147483647, %v2353_v47  ;;  %v2362_v18 = vand.u32 2147483647, %v2354_v1  ;;  %v2364_v42 = vmul.f32 %v2363_v9, %v2355_v29  ;;  %v2365_v21 = vmul.f32 %v2363_v9, %v2356_v16 }
 0x258   :  { %v2366_v43 = vmul.f32 %v2363_v9, %v2357_v32  ;;  %v2367_v61 = vmul.f32 %v2363_v9, %v2358_v50  ;;  %v2368_v34 = vmul.f32 %v2363_v9, %v2359_v13  ;;  %v2369_v37 = vmul.f32 %v2363_v9, %v2360_v22 }
 0x259   :  { %v2370_v54 = vmul.f32 %v2363_v9, %v2361_v33  ;;  %v2371_v31 = vmul.f32 %v2363_v9, %v2362_v18  ;;  %v2372_v27 = vadd.f32 %v2364_v42, %v5129_v36  ;;  %v2373_v48 = vadd.f32 %v2365_v21, %v5132_v53 }
 0x25a   :  { %v2374_v60 = vadd.f32 %v2366_v43, %v5135_v51  ;;  %v2375_v35 = vadd.f32 %v2367_v61, %v5138_v5  ;;  %v2376_v41 = vadd.f32 %v2368_v34, %v5141_v20  ;;  %v2377_v46 = vadd.f32 %v2369_v37, %v5144_v19 }
 0x25b   :  { %v2378_v28 = vadd.f32 %v2370_v54, %v5147_v44  ;;  %v2379_v57 = vadd.f32 %v2371_v31, %v5150_v30  ;;  %v2380_v52 = vadd.f32 %v2372_v27, %v2336_v10  ;;  %v2381_v59 = vadd.f32 %v2373_v48, %v2337_v63 }
 0x25c   :  { %v2382_v26 = vadd.f32 %v2374_v60, %v2338_v62  ;;  %v2383_v36 = vadd.f32 %v2375_v35, %v2339_v49  ;;  %v2384_v15 = vadd.f32 %v2376_v41, %v2340_v4  ;;  %v2385_v8 = vadd.f32 %v2377_v46, %v2341_v7 }
 0x25d   :  { %v2386_v53 = vadd.f32 %v2378_v28, %v2342_v45  ;;  %v2387_v2 = vadd.f32 %v2379_v57, %v2343_v23  ;;  %v2389_v12 = vstv %s5180_s5  ;;  %v2399_v51 = vstv %s5182_s6 }
 0x25e   :  { %v2390_v5 = vmul.f32 %v5062_v40, %v2389_v12  ;;  %v2391_v20 = vmul.f32 %v5065_v58, %v2389_v12  ;;  %v2392_v19 = vmul.f32 %v5068_v25, %v2389_v12  ;;  %v2393_v44 = vmul.f32 %v5071_v55, %v2389_v12 }
 0x25f   :  { %v2394_v30 = vmul.f32 %v5074_v17, %v2389_v12  ;;  %v2395_v39 = vmul.f32 %v5077_v14, %v2389_v12  ;;  %v2396_v10 = vmul.f32 %v5080_v24, %v2389_v12  ;;  %v2397_v63 = vmul.f32 %v5083_v3, %v2389_v12 }
 0x260   :  { %v2400_v62 = vadd.f32 %v2399_v51, %v2390_v5  ;;  %v2401_v49 = vadd.f32 %v2399_v51, %v2391_v20  ;;  %v2402_v4 = vadd.f32 %v2399_v51, %v2392_v19  ;;  %v2403_v7 = vadd.f32 %v2399_v51, %v2393_v44 }
 0x261   :  { %v2404_v40 = vadd.f32 %v2399_v51, %v2394_v30  ;;  %v2405_v58 = vadd.f32 %v2399_v51, %v2395_v39  ;;  %v2406_v45 = vadd.f32 %v2399_v51, %v2396_v10  ;;  %v2407_v25 = vadd.f32 %v2399_v51, %v2397_v63 }
 0x262   :  { %v2408_v23 = vadd.f32 %v2400_v62, %v2380_v52  ;;  %v2409_v55 = vadd.f32 %v2401_v49, %v2381_v59  ;;  %v2410_v38 = vadd.f32 %v2402_v4, %v2382_v26  ;;  %v2411_v17 = vadd.f32 %v2403_v7, %v2383_v36 }
 0x263   :  { %v2412_v0 = vadd.f32 %v2404_v40, %v2384_v15  ;;  %v2413_v14 = vadd.f32 %v2405_v58, %v2385_v8  ;;  %v2414_v6 = vadd.f32 %v2406_v45, %v2386_v53  ;;  %v2415_v24 = vadd.f32 %v2407_v25, %v2387_v2 }
 0x264   :  { %2416 = vst [vmem:[#allocation10] sm:$0xff] %v2408_v23  ;;  %2417 = vst [vmem:[#allocation10 + $0x8] sm:$0xff] %v2409_v55 }
 0x265   :  { %2418 = vst [vmem:[#allocation10 + $0x10] sm:$0xff] %v2410_v38  ;;  %2419 = vst [vmem:[#allocation10 + $0x18] sm:$0xff] %v2411_v17 }
 0x266   :  { %2420 = vst [vmem:[#allocation10 + $0x20] sm:$0xff] %v2412_v0  ;;  %2421 = vst [vmem:[#allocation10 + $0x28] sm:$0xff] %v2413_v14 }
 0x267   :  { %2422 = vst [vmem:[#allocation10 + $0x30] sm:$0xff] %v2414_v6  ;;  %2423 = vst [vmem:[#allocation10 + $0x38] sm:$0xff] %v2415_v24 }
 0x268   :  { %2678 = shalt.err (!%p2675_p13)
}
 0x269   :  { %s2679_s12 = scalar_lea.hbm %s5223_s4, 1024 }
 0x26a   :  { %p2680_p0 = scmp.ne.s32.totalorder %s5223_s4, %s2679_s12  ;;  %p2683_p1 = scmp.lt.u32.totalorder %s2679_s12, %s5223_s4 }
 0x26c   :  { %p2685_p2 = pnand %p2683_p1, %p2680_p0 }
 0x26e   :  { %2688 = shalt.err (!%p2685_p2)
}
 0x26f   :  { %2435 = dma.vmem_to_hbm [thread:$0]  %s2430_s8, 1024, %s5223_s4, [#allocation4], %s2699_s29, %s2699_s29, %s2700_s30  }
 0x270   :  { %2695 = dma.done.wait [#allocation4], 1024  }
 0x271   :  { %2696 = vsyncadd [#allocation4], 4294966272 }
 0x272   :  { %2439 = vsyncpa [#allocation3], 1 }
 0x273   :  { %2440 = vsyncpa [#allocation4], 1 }
 0x274   :  { %2441 = vsyncpa [#allocation5], 1 }
 0x275   :  { %2442 = vsyncpa [#allocation8], 1 }

</bundles_post_ra>
